<compile_context>
chip_gen: v5e
topology: v5e:2x2
jax: 0.10.0
libtpu: 0.0.40
codegen_flags: <defaults>
</compile_context>

<pallas_src>
from functools import partial

import jax
import jax.numpy as jnp
from jax.experimental import pallas as pl
from jax.experimental.pallas import tpu as pltpu

# ----------------------------------------------------------------------------- #
# Helpers
# ----------------------------------------------------------------------------- #


def _rup(x, m):
    return -(-x // m) * m


def _pick_tile(padded, granule, cap):
    """Largest `granule`-multiple tile <= cap that divides `padded`."""
    t = min(cap, padded)
    while padded % t:
        t -= granule
    return t


# ----------------------------------------------------------------------------- #
# Pallas GEMM kernels (bf16 operands on the MXU, f32 accumulate, fused epilogue)
# ----------------------------------------------------------------------------- #


def _gemm_single_kernel(a_ref, w_ref, b_ref, o_ref, *, relu):
    y = jnp.dot(a_ref[...], w_ref[...], preferred_element_type=jnp.float32) + b_ref[...]
    if relu:
        y = jnp.maximum(y, 0.0)
    o_ref[...] = y.astype(o_ref.dtype)


def _gemm_single_res_kernel(a_ref, w_ref, b_ref, r_ref, o_ref, *, relu):
    # out = act(a @ w + bias) + residual   (residual add fused into the epilogue)
    y = jnp.dot(a_ref[...], w_ref[...], preferred_element_type=jnp.float32) + b_ref[...]
    if relu:
        y = jnp.maximum(y, 0.0)
    y = y + r_ref[...].astype(jnp.float32)
    o_ref[...] = y.astype(o_ref.dtype)


def _gemm_kloop_kernel(a_ref, w_ref, b_ref, o_ref, acc_ref, *, relu):
    k = pl.program_id(2)

    @pl.when(k == 0)
    def _():
        acc_ref[...] = jnp.zeros_like(acc_ref)

    acc_ref[...] += jnp.dot(a_ref[...], w_ref[...], preferred_element_type=jnp.float32)

    @pl.when(k == pl.num_programs(2) - 1)
    def _():
        y = acc_ref[...] + b_ref[...]
        if relu:
            y = jnp.maximum(y, 0.0)
        o_ref[...] = y.astype(o_ref.dtype)


TM_CAP = 512   # big stem GEMMs (M=2048) still only ~2 MiB/buffer with TK<=2048
TN_CAP = 256
TK_CAP = 2048  # single-K-block cap; worst-case live VMEM stays well under 16 MiB (v5e)


def gemm_bias_act(a, w, bias, *, relu=True, residual=None, out_dtype=jnp.bfloat16):
    """out = act(a @ w + bias) (+ residual).

    a: [M, K] (cast to bf16), w: [K, N] bf16 with BN scale pre-folded,
    bias: [N] f32, residual: optional [M, N] added after the activation.
    """
    M, K = a.shape
    Kw, N = w.shape
    assert Kw == K

    Mp = _rup(M, 16)            # bf16 sublane granule, not 128 -> no 8-16x M padding
    Np = _rup(N, 128)           # lane-dense output blocks
    TM = _pick_tile(Mp, 16, TM_CAP)
    TN = _pick_tile(Np, 128, TN_CAP)

    # K tiling: one block if the 128-padded reduction fits TK_CAP; otherwise split into
    # near-equal 128-multiple chunks (minimal padding instead of rounding up to 512s).
    Kp0 = _rup(K, 128)
    nk = -(-Kp0 // TK_CAP)
    TK = _rup(-(-Kp0 // nk), 128)
    Kp = nk * TK

    # v7x has 2 TensorCores: guarantee >= 2 blocks on a parallel grid axis when possible.
    if (Mp // TM) * (Np // TN) == 1:
        if TM >= 32 and (TM // 2) % 16 == 0:
            TM //= 2
        elif TN >= 256:
            TN //= 2

    a_p = a.astype(jnp.bfloat16)
    w_p = w.astype(jnp.bfloat16)
    if (Mp, Kp) != (M, K):
        a_p = jnp.pad(a_p, ((0, Mp - M), (0, Kp - K)))
    if (Kp, Np) != (K, N):
        w_p = jnp.pad(w_p, ((0, Kp - K), (0, Np - N)))
    b_p = bias.astype(jnp.float32)
    if Np != N:
        b_p = jnp.pad(b_p, (0, Np - N))
    b_p = b_p.reshape(1, Np)

    if nk == 1:
        in_specs = [
            pl.BlockSpec((TM, Kp), lambda i, j: (i, 0)),
            pl.BlockSpec((Kp, TN), lambda i, j: (0, j)),
            pl.BlockSpec((1, TN), lambda i, j: (0, j)),
        ]
        operands = [a_p, w_p, b_p]
        if residual is not None:
            r_p = residual.astype(jnp.bfloat16)
            if (Mp, Np) != residual.shape:
                r_p = jnp.pad(r_p, ((0, Mp - M), (0, Np - N)))
            in_specs.append(pl.BlockSpec((TM, TN), lambda i, j: (i, j)))
            operands.append(r_p)
            kern = partial(_gemm_single_res_kernel, relu=relu)
        else:
            kern = partial(_gemm_single_kernel, relu=relu)
        out = pl.pallas_call(
            kern,
            out_shape=jax.ShapeDtypeStruct((Mp, Np), out_dtype),
            grid_spec=pltpu.PrefetchScalarGridSpec(
                num_scalar_prefetch=0,
                grid=(Mp // TM, Np // TN),
                in_specs=in_specs,
                out_specs=pl.BlockSpec((TM, TN), lambda i, j: (i, j)),
            ),
            compiler_params=pltpu.CompilerParams(
                dimension_semantics=("parallel", "parallel")
            ),
        )(*operands)
    else:
        assert residual is None  # residual fusion only ever needed for 1x1 (small K)
        out = pl.pallas_call(
            partial(_gemm_kloop_kernel, relu=relu),
            out_shape=jax.ShapeDtypeStruct((Mp, Np), out_dtype),
            grid_spec=pltpu.PrefetchScalarGridSpec(
                num_scalar_prefetch=0,
                grid=(Mp // TM, Np // TN, nk),
                in_specs=[
                    pl.BlockSpec((TM, TK), lambda i, j, k: (i, k)),
                    pl.BlockSpec((TK, TN), lambda i, j, k: (k, j)),
                    pl.BlockSpec((1, TN), lambda i, j, k: (0, j)),
                ],
                out_specs=pl.BlockSpec((TM, TN), lambda i, j, k: (i, j)),
                scratch_shapes=[pltpu.VMEM((TM, TN), jnp.float32)],
            ),
            compiler_params=pltpu.CompilerParams(
                dimension_semantics=("parallel", "parallel", "arbitrary")
            ),
        )(a_p, w_p, b_p)
    return out[:M, :N]


# ----------------------------------------------------------------------------- #
# Global average pool (Pallas, tiled over channels)
# ----------------------------------------------------------------------------- #


def _mean_kernel(x_ref, o_ref):
    o_ref[...] = jnp.mean(x_ref[...].astype(jnp.float32), axis=1)


@jax.jit
def global_avg_pool(x):
    """x: [N, T, H, W, C] channels-last -> [N, C] f32 (global average over T,H,W).

    The original I3D uses AvgPool3d((2,7,7)); at this toy resolution the feature map is
    (1,1,1) so global average pooling is equivalent.
    """
    N, T, H, W, C = x.shape
    S = T * H * W
    x2 = x.reshape(N, S, C)
    TC = min(512, _rup(C, 128))
    Cp = _rup(C, TC)
    if Cp != C:
        x2 = jnp.pad(x2, ((0, 0), (0, 0), (0, Cp - C)))
    out = pl.pallas_call(
        _mean_kernel,
        out_shape=jax.ShapeDtypeStruct((N, Cp), jnp.float32),
        grid=(Cp // TC,),
        in_specs=[pl.BlockSpec((N, S, TC), lambda j: (0, 0, j))],
        out_specs=pl.BlockSpec((N, TC), lambda j: (0, j)),
    )(x2)
    return out[:, :C]


# ----------------------------------------------------------------------------- #
# Conv / pool glue (channels-last NDHWC, bf16)
# ----------------------------------------------------------------------------- #


@partial(jax.jit, static_argnames=("ksize", "stride", "padding", "relu"))
def _conv3d_impl(x, wmat, bias, *, ksize, stride, padding, relu):
    """x: [N, T, H, W, Cin] bf16; wmat: [kt*kh*kw*Cin, Cout] bf16 (scale folded)."""
    N, T, H, W, Cin = x.shape
    kt, kh, kw = ksize
    st, sh, sw = stride
    pt, ph, pw = padding
    To = (T + 2 * pt - kt) // st + 1
    Ho = (H + 2 * ph - kh) // sh + 1
    Wo = (W + 2 * pw - kw) // sw + 1

    if ksize == (1, 1, 1) and stride == (1, 1, 1):
        a = x.reshape(N * T * H * W, Cin)
    else:
        # TODO(synk): fold the kt*kh*kw window offsets into the GEMM reduction grid
        # (element-offset BlockSpecs / manual DMA) instead of materializing the bf16
        # patch matrix; at toy resolution it is a few MB.
        xp = jnp.pad(x, ((0, 0), (pt, pt), (ph, ph), (pw, pw), (0, 0)))
        cols = []
        for a_ in range(kt):
            for b_ in range(kh):
                for c_ in range(kw):
                    cols.append(
                        xp[:, a_ : a_ + st * To : st, b_ : b_ + sh * Ho : sh,
                           c_ : c_ + sw * Wo : sw, :]
                    )
        # channel-axis concat (no big transpose); matches wmat row order (a,b,c,cin)
        a = jnp.concatenate(cols, axis=-1).reshape(N * To * Ho * Wo, kt * kh * kw * Cin)

    out = gemm_bias_act(a, wmat, bias, relu=relu)  # [M, Cout] bf16
    return out.reshape(N, To, Ho, Wo, -1)


def unit3d(x, p, stride=(1, 1, 1), padding=(0, 0, 0)):
    return _conv3d_impl(
        x, p["wmat"], p["bias"],
        ksize=p["ksize"], stride=tuple(stride), padding=tuple(padding), relu=True,
    )


def _pool1d_max(x, axis, k, s, p):
    if k == 1 and s == 1 and p == 0:
        return x
    pad_cfg = [(0, 0)] * x.ndim
    pad_cfg[axis] = (p, p)
    xp = jnp.pad(x, pad_cfg, constant_values=-jnp.inf)
    L = x.shape[axis] + 2 * p
    Lo = (L - k) // s + 1
    out = None
    for a in range(k):
        idx = [slice(None)] * x.ndim
        idx[axis] = slice(a, a + s * Lo, s)
        v = xp[tuple(idx)]
        out = v if out is None else jnp.maximum(out, v)
    return out


@partial(jax.jit, static_argnames=("ksize", "stride", "padding"))
def maxpool3d(x, *, ksize, stride, padding):
    """Channels-last max pool, separable (w -> h -> t): 3+3+3 operands, one HBM read."""
    kt, kh, kw = ksize
    st, sh, sw = stride
    pt, ph, pw = padding
    x = _pool1d_max(x, 3, kw, sw, pw)
    x = _pool1d_max(x, 2, kh, sh, ph)
    x = _pool1d_max(x, 1, kt, st, pt)
    return x


@jax.jit
def _fusion_gemm(a, wmat, bias, residual):
    return gemm_bias_act(a, wmat, bias, relu=True, residual=residual)


# ----------------------------------------------------------------------------- #
# Parameter initialization (deterministic, synthetic) with hoisted weight layout
# ----------------------------------------------------------------------------- #

BN_EPS = 1e-3


def init_unit(key, cin, cout, k):
    kt, kh, kw = k
    fan_in = cin * kt * kh * kw
    w = jax.random.normal(key, (cout, cin, kt, kh, kw), jnp.float32) * jnp.sqrt(2.0 / fan_in)
    gamma = jnp.ones((cout,), jnp.float32)
    beta = jnp.zeros((cout,), jnp.float32)
    rmean = jnp.zeros((cout,), jnp.float32)
    rvar = jnp.ones((cout,), jnp.float32)
    scale = gamma / jnp.sqrt(rvar + BN_EPS)
    bias = beta - rmean * scale
    # hoisted GEMM layout: rows ordered (a, b, c, cin) to match im2col column order;
    # BN scale folded into the weight columns -> GEMM epilogue is just +bias, ReLU.
    wmat = w.transpose(2, 3, 4, 1, 0).reshape(kt * kh * kw * cin, cout)
    wmat = (wmat * scale[None, :]).astype(jnp.bfloat16)
    return {"wmat": wmat, "bias": bias, "ksize": (kt, kh, kw)}


def init_mixed(key, cin, cfg):
    ks = jax.random.split(key, 6)
    b0 = init_unit(ks[0], cin, cfg[0], (1, 1, 1))
    b1a = init_unit(ks[1], cin, cfg[1], (1, 1, 1))
    b1b = init_unit(ks[2], cfg[1], cfg[2], (3, 3, 3))
    b2a = init_unit(ks[3], cin, cfg[3], (1, 1, 1))
    b2b = init_unit(ks[4], cfg[3], cfg[4], (3, 3, 3))
    b3 = init_unit(ks[5], cin, cfg[5], (1, 1, 1))
    # Fuse the three same-input 1x1x1 branch convs into one GEMM (concat along N).
    fused = {
        "wmat": jnp.concatenate([b0["wmat"], b1a["wmat"], b2a["wmat"]], axis=1),
        "bias": jnp.concatenate([b0["bias"], b1a["bias"], b2a["bias"]]),
        "ksize": (1, 1, 1),
    }
    return {
        "fused_1x1": fused,
        "splits": (cfg[0], cfg[1], cfg[3]),
        "b1b": b1b,
        "b2b": b2b,
        "b3": b3,
    }


def init_i3d(key, in_channels):
    ks = jax.random.split(key, 12)
    return {
        "conv1a": init_unit(ks[0], in_channels, 64, (7, 7, 7)),
        "conv2b": init_unit(ks[1], 64, 64, (1, 1, 1)),
        "conv2c": init_unit(ks[2], 64, 192, (3, 3, 3)),
        "mixed_3b": init_mixed(ks[3], 192, [64, 96, 128, 16, 32, 32]),
        "mixed_3c": init_mixed(ks[4], 256, [128, 128, 192, 32, 96, 64]),
        "mixed_4b": init_mixed(ks[5], 480, [192, 96, 208, 16, 48, 64]),
        "mixed_4c": init_mixed(ks[6], 512, [160, 112, 224, 24, 64, 64]),
        "mixed_4d": init_mixed(ks[7], 512, [128, 128, 256, 24, 64, 64]),
        "mixed_4e": init_mixed(ks[8], 512, [112, 144, 288, 32, 64, 64]),
        "mixed_4f": init_mixed(ks[9], 528, [256, 160, 320, 32, 128, 128]),
        "mixed_5b": init_mixed(ks[10], 832, [256, 160, 320, 32, 128, 128]),
        "mixed_5c": init_mixed(ks[11], 832, [384, 192, 384, 48, 128, 128]),
    }


def init_backbone(key, rgb_in=3, pose_in=17):
    k = jax.random.split(key, 6)
    return {
        "rgb_path": init_i3d(k[0], rgb_in),
        "pose_path": init_i3d(k[1], pose_in),
        "rgb_fusion_layer2": init_unit(k[2], 192, 192, (1, 1, 1)),
        "rgb_fusion_layer3": init_unit(k[3], 480, 480, (1, 1, 1)),
        "pose_fusion_layer2": init_unit(k[4], 192, 192, (1, 1, 1)),
        "pose_fusion_layer3": init_unit(k[5], 480, 480, (1, 1, 1)),
    }


# ----------------------------------------------------------------------------- #
# Forward pass (channels-last bf16 internally, PyTorch NCDHW at the boundaries)
# ----------------------------------------------------------------------------- #

RGB_DETACH = False
POSE_DETACH = False


def to_channels_last(x):  # NCDHW f32 -> NDHWC bf16
    return jnp.transpose(x, (0, 2, 3, 4, 1)).astype(jnp.bfloat16)


def from_channels_last(x):  # NDHWC bf16 -> NCDHW f32
    return jnp.transpose(x, (0, 4, 1, 2, 3)).astype(jnp.float32)


def mixed(x, p):
    c0, c1a, _ = p["splits"]
    y = unit3d(x, p["fused_1x1"])            # fused b0 / b1a / b2a 1x1 convs
    b0 = y[..., :c0]
    x1 = y[..., c0 : c0 + c1a]
    x2 = y[..., c0 + c1a :]
    b1 = unit3d(x1, p["b1b"], padding=(1, 1, 1))
    b2 = unit3d(x2, p["b2b"], padding=(1, 1, 1))
    b3 = unit3d(
        maxpool3d(x, ksize=(3, 3, 3), stride=(1, 1, 1), padding=(1, 1, 1)), p["b3"]
    )
    # TODO(synk): write each branch GEMM directly into its channel slice of one
    # preallocated [M, C_total] output instead of concatenating.
    return jnp.concatenate([b0, b1, b2, b3], axis=-1)


def fusion(x, other, p):
    # cross-modal residual fusion: x + ReLU(BN(Conv1x1(other))); add fused into the
    # GEMM epilogue (no separate elementwise-add pass over HBM).
    C = other.shape[-1]
    a = other.reshape(-1, C)
    r = x.reshape(-1, x.shape[-1])
    out = _fusion_gemm(a, p["wmat"], p["bias"], r)
    return out.reshape(x.shape)


def i3d_stem(x, p):
    x = unit3d(x, p["conv1a"], stride=(2, 2, 2), padding=(3, 3, 3))
    x = maxpool3d(x, ksize=(1, 3, 3), stride=(1, 2, 2), padding=(0, 1, 1))
    x = unit3d(x, p["conv2b"])
    x = unit3d(x, p["conv2c"], padding=(1, 1, 1))
    x = maxpool3d(x, ksize=(1, 3, 3), stride=(1, 2, 2), padding=(0, 1, 1))
    return x


def backbone_forward(params, rgb_video_1, rgb_video_2, pose_video_1, pose_video_2):
    total_rgb = jnp.concatenate([rgb_video_1, rgb_video_2], axis=0)
    total_pose = jnp.concatenate([pose_video_1, pose_video_2], axis=0)
    n_total = total_rgb.shape[0]
    n_total_p = total_pose.shape[0]
    pr, pp = params["rgb_path"], params["pose_path"]

    rgb = i3d_stem(to_channels_last(total_rgb), pr)
    pose = i3d_stem(to_channels_last(total_pose), pp)

    feat_pose = jax.lax.stop_gradient(pose) if POSE_DETACH else pose
    rgb_f2 = fusion(rgb, feat_pose, params["rgb_fusion_layer2"])
    feat_rgb = jax.lax.stop_gradient(rgb) if RGB_DETACH else rgb
    pose_f2 = fusion(pose, feat_rgb, params["pose_fusion_layer2"])

    rgb = mixed(rgb_f2, pr["mixed_3b"])
    rgb = mixed(rgb, pr["mixed_3c"])
    rgb = maxpool3d(rgb, ksize=(3, 3, 3), stride=(2, 2, 2), padding=(1, 1, 1))
    pose = mixed(pose_f2, pp["mixed_3b"])
    pose = mixed(pose, pp["mixed_3c"])
    pose = maxpool3d(pose, ksize=(3, 3, 3), stride=(2, 2, 2), padding=(1, 1, 1))

    feat_pose = jax.lax.stop_gradient(pose) if POSE_DETACH else pose
    rgb_f3 = fusion(rgb, feat_pose, params["rgb_fusion_layer3"])
    feat_rgb = jax.lax.stop_gradient(rgb) if RGB_DETACH else rgb
    pose_f3 = fusion(pose, feat_rgb, params["pose_fusion_layer3"])

    rgb = mixed(rgb_f3, pr["mixed_4b"])
    rgb = mixed(rgb, pr["mixed_4c"])
    rgb = mixed(rgb, pr["mixed_4d"])
    rgb = mixed(rgb, pr["mixed_4e"])
    rgb = mixed(rgb, pr["mixed_4f"])
    rgb = maxpool3d(rgb, ksize=(2, 2, 2), stride=(2, 2, 2), padding=(0, 0, 0))
    pose = mixed(pose_f3, pp["mixed_4b"])
    pose = mixed(pose, pp["mixed_4c"])
    pose = mixed(pose, pp["mixed_4d"])
    pose = mixed(pose, pp["mixed_4e"])
    pose = mixed(pose, pp["mixed_4f"])
    pose = maxpool3d(pose, ksize=(2, 2, 2), stride=(2, 2, 2), padding=(0, 0, 0))

    rgb = mixed(rgb, pr["mixed_5b"])
    feature_map_rgb_cl = mixed(rgb, pr["mixed_5c"])
    feature_rgb = global_avg_pool(feature_map_rgb_cl)     # [N, C] f32
    pose = mixed(pose, pp["mixed_5b"])
    feature_map_pose_cl = mixed(pose, pp["mixed_5c"])
    feature_pose = global_avg_pool(feature_map_pose_cl)   # [N, C] f32

    feature_map_rgb = from_channels_last(feature_map_rgb_cl)
    feature_map_pose = from_channels_last(feature_map_pose_cl)

    feature_rgb = feature_rgb.reshape(n_total, 1, -1)
    Nt, C, T, H, W = feature_map_rgb.shape
    feature_map_rgb = feature_map_rgb.reshape(n_total, 1, C, T, H, W)
    half = n_total // 2
    rgb_out = [
        feature_rgb[:half],
        feature_rgb[half:],
        feature_map_rgb[:half],
        feature_map_rgb[half:],
    ]

    feature_pose = feature_pose.reshape(n_total_p, 1, -1)
    Nt, C, T, H, W = feature_map_pose.shape
    feature_map_pose = feature_map_pose.reshape(n_total_p, 1, C, T, H, W)
    half_p = n_total_p // 2
    pose_out = [
        feature_pose[:half_p],
        feature_pose[half_p:],
        feature_map_pose[:half_p],
        feature_map_pose[half_p:],
    ]
    return rgb_out, pose_out


# ----------------------------------------------------------------------------- #
# Main
# ----------------------------------------------------------------------------- #

if __name__ == "__main__":
    key = jax.random.PRNGKey(0)
    kp, kd = jax.random.split(key)
    params = init_backbone(kp, rgb_in=3, pose_in=17)

    kr1, kr2, kq1, kq2 = jax.random.split(kd, 4)
    B, T, H, W = 1, 8, 32, 32
    rgb_video_1 = jax.random.normal(kr1, (B, 3, T, H, W), jnp.float32)
    rgb_video_2 = jax.random.normal(kr2, (B, 3, T, H, W), jnp.float32)
    pose_video_1 = jax.random.normal(kq1, (B, 17, T, H, W), jnp.float32)
    pose_video_2 = jax.random.normal(kq2, (B, 17, T, H, W), jnp.float32)

    rgb_out, pose_out = backbone_forward(
        params, rgb_video_1, rgb_video_2, pose_video_1, pose_video_2
    )
    jax.block_until_ready((rgb_out, pose_out))
    print("KERNEL_OK")
</pallas_src>

<mosaic_0001>
module attributes {stable_mosaic.version = 11 : i64} {
  func.func @_gemm_single_kernel(%arg0: i32, %arg1: i32, %arg2: memref<512x1152xbf16, #tpu.memory_space<vmem>>, %arg3: memref<1152x128xbf16, #tpu.memory_space<vmem>>, %arg4: memref<1x128xf32, #tpu.memory_space<vmem>>, %arg5: memref<512x128xbf16, #tpu.memory_space<vmem>>) attributes {dimension_semantics = [#tpu.dimension_semantics<parallel>, #tpu.dimension_semantics<parallel>], iteration_bounds = array<i64: 4, 1>, scalar_prefetch = 0 : i64, scratch_operands = 0 : i64, tpu.core_type = #tpu.core_type<tc>, window_params = [{transform_indices = @transform_0, window_bounds = array<i64: 512, 1152>}, {transform_indices = @transform_1, window_bounds = array<i64: 1152, 128>}, {transform_indices = @transform_2, window_bounds = array<i64: 1, 128>}, {transform_indices = @transform_3, window_bounds = array<i64: 512, 128>}]} {
    %c0 = arith.constant 0 : index
    %c0_0 = arith.constant 0 : index
    %0 = vector.load %arg2[%c0, %c0_0] : memref<512x1152xbf16, #tpu.memory_space<vmem>>, vector<512x1152xbf16>
    %c0_1 = arith.constant 0 : index
    %c0_2 = arith.constant 0 : index
    %1 = vector.load %arg3[%c0_1, %c0_2] : memref<1152x128xbf16, #tpu.memory_space<vmem>>, vector<1152x128xbf16>
    %cst = arith.constant dense<0.000000e+00> : vector<512x128xf32>
    %2 = tpu.matmul %0, %1, %cst {dimension_numbers = #tpu.dot_dimension_numbers<[1], [0], [0], [1], [0, 0, 1, 1], [], []>} : vector<512x1152xbf16>, vector<1152x128xbf16>, vector<512x128xf32> -> vector<512x128xf32>
    %c0_3 = arith.constant 0 : index
    %c0_4 = arith.constant 0 : index
    %3 = vector.load %arg4[%c0_3, %c0_4] : memref<1x128xf32, #tpu.memory_space<vmem>>, vector<1x128xf32>
    %4 = vector.broadcast %3 : vector<1x128xf32> to vector<512x128xf32>
    %5 = arith.addf %2, %4 : vector<512x128xf32>
    %cst_5 = arith.constant 0.000000e+00 : f32
    %6 = vector.broadcast %cst_5 : f32 to vector<512x128xf32>
    %7 = arith.maximumf %5, %6 : vector<512x128xf32>
    %8 = arith.truncf %7 : vector<512x128xf32> to vector<512x128xbf16>
    %c0_6 = arith.constant 0 : index
    %c0_7 = arith.constant 0 : index
    %9 = vector.load %arg5[%c0_6, %c0_7] : memref<512x128xbf16, #tpu.memory_space<vmem>>, vector<512x128xbf16>
    tpu.vector_store %arg5[%c0_6, %c0_7], %8 {strides = array<i32>} : memref<512x128xbf16, #tpu.memory_space<vmem>>, vector<512x128xbf16>,
    return
  }
  func.func @transform_0(%arg0: i32, %arg1: i32) -> (i32, i32) {
    %c0_i32 = arith.constant 0 : i32
    %c0_i32_0 = arith.constant 0 : i32
    return %arg0, %c0_i32 : i32, i32
  }
  func.func @transform_1(%arg0: i32, %arg1: i32) -> (i32, i32) {
    %c0_i32 = arith.constant 0 : i32
    %c0_i32_0 = arith.constant 0 : i32
    return %c0_i32, %arg1 : i32, i32
  }
  func.func @transform_2(%arg0: i32, %arg1: i32) -> (i32, i32) {
    %c0_i32 = arith.constant 0 : i32
    %c0_i32_0 = arith.constant 0 : i32
    return %c0_i32, %arg1 : i32, i32
  }
  func.func @transform_3(%arg0: i32, %arg1: i32) -> (i32, i32) {
    %c0_i32 = arith.constant 0 : i32
    return %arg0, %arg1 : i32, i32
  }
}

</mosaic_0001>

<bundles_post_ra>
// kernel: _conv3d_impl.1
= control target key start
LH: loop header
LB: loop body
LE: loop exit
PB: predicated region body
PF: predicated region fallthrough
CT: control target
= control target key end

     0   :  { %8 = vsyncpa [#allocation3], 0  ;;  %s8007_s0 = inlined_call_operand.vmem [shape: bf16[2048,1152], index: 0, kind: input, shape index: {}]   ;;  %s8008_s1 = inlined_call_operand.vmem [shape: bf16[1152,128], index: 1, kind: input, shape index: {}]   ;;  %s8009_s2 = inlined_call_operand.vmem [shape: f32[1,128], index: 2, kind: input, shape index: {}]   ;;  %s8010_s3 = inlined_call_operand.hbm [shape: bf16[2048,128], index: 3, kind: output, shape index: {}]  }
   0x1   :  { %10 = vsyncpa [#allocation3 + $0x1], 0  ;;  %s6615_s12 = smov 0   ;;  %s6617_s13 = smov 0  }
   0x2   :  { %s6619_s14 = smov 0   ;;  %s6621_s15 = smov 0  }
   0x3   :  { %s6623_s16 = smov 0   ;;  %s6625_s17 = smov 0  }
   0x4 LB: > { %s4421_s18 = sadd.s32 4294967295, %s6591_s17   ;;  %s4422_s19 = sadd.s32 4294967294, %s6591_s17   ;;  %s6591_s17 = sphi %s6625_s17, %s16_s17   ;;  %s6587_s16 = sphi %s6623_s16, %s8113_s16   ;;  %s6583_s15 = sphi %s6621_s15, %s8112_s15   ;;  %s6579_s14 = sphi %s6619_s14, %s8111_s14   ;;  %s6575_s13 = sphi %s6617_s13, %s8110_s13   ;;  %s6571_s12 = sphi %s6615_s12, %s8109_s12  }
   0x5   : > { %s28_s20 = sadd.s32 1, %s6587_s16  ;;  %s115_s21 = sadd.s32 1, %s6579_s14 }
   0x6   : > { %p30_p0 = scmp.ge.s32.totalorder %s28_s20, 4  ;;  %p125_p1 = scmp.ne.s32.totalorder %s6579_s14, %s6575_s13 }
   0x7   : > { %p126_p2 = scmp.eq.s32.totalorder %s4421_s18, 3  ;;  %p131_p3 = scmp.ne.s32.totalorder %s6575_s13, %s6571_s12 }
   0x8   : > { %s8115_s20 = smov (%p30_p0, %s28_s20), 0  ;;  %p132_p5 = scmp.eq.s32.totalorder %s4422_s19, 3 }
   0x9   : > { %p6655_p4 = por %p126_p2, %p125_p1  ;;  %s110_s23 = ssub.s32 %s6587_s16, %s8115_s20 }
   0xa   : > { %p4427_p6 = scmp.ge.s32.totalorder %s6591_s17, 1  ;;  %p113_p7 = scmp.eq.s32.totalorder %s110_s23, 0 }
   0xb   : > { %p6662_p8 = por %p132_p5, %p131_p3  ;;  %p173_p9 = scmp.lt.s32.totalorder %s6591_s17, 5 }
   0xc   : > { %s6668_s25 = scalar_select %p113_p7, %s6579_s14, %s115_s21  }
   0xd   : > { %p174_p10 = pnand %p4427_p6, %p173_p9 }
   0xf   : > { %177 = sbr.rel (%p174_p10) target bundleno = 1342 (0x53e), region = 32 }
  0x14   : > { %v6171_v0 = vld [vmem:[%s8008_s1 + $0x38] sm:$0xff]  ;;  %v6170_v1 = vld [vmem:[%s8008_s1 + $0x30] sm:$0xff]  ;;  %v6169_v2 = vld [vmem:[%s8008_s1 + $0x28] sm:$0xff]  ;;  %s4429_s5 = sshll.u32 %s6583_s15, 6  ;;  %s202_s9 = sand.u32 1, %s6575_s13  }
  0x15   : > { %6428 = vmatpush.bf16.msra.mxu1 %v6171_v0  ;;  %6429 = vmatpush.bf16.msra.mxu2 %v6171_v0  ;;  %v6168_v3 = vld [vmem:[%s8008_s1 + $0x20] sm:$0xff]  ;;  %p206_p11 = scmp.lt.s32.totalorder %s4429_s5, 255  ;;  %v6167_v4 = vld [vmem:[%s8008_s1 + $0x18] sm:$0xff]  ;;  %v6166_v5 = vld [vmem:[%s8008_s1 + $0x10] sm:$0xff]  ;;  %s4428_s10 = sshll.u32 %s202_s9, 8 }
  0x16   : > { %6430 = vmatpush.bf16.msra.mxu3 %v6171_v0  ;;  %2592 = vmatpush.bf16.msra.mxu0 %v6171_v0  ;;  %v6165_v6 = vld [vmem:[%s8008_s1 + $0x8] sm:$0xff]  ;;  %v6164_v7 = vld [vmem:[%s8008_s1] sm:$0xff]  ;;  %v6187_v16 = vld [vmem:[%s8008_s1 + $0xb8] sm:$0xff]  ;;  %s7697_s11 = scalar_lea.vmem [#allocation2], %s4428_s10 }
  0x17   : > { %s8117_s5 = smov (!%p206_p11, %s4429_s5), 255  ;;  %v6195_v17 = vld [vmem:[%s8008_s1 + $0xf8] sm:$0xff]  ;;  %v6186_v24 = vld [vmem:[%s8008_s1 + $0xb0] sm:$0xff]  ;;  %v6185_v28 = vld [vmem:[%s8008_s1 + $0xa8] sm:$0xff]  ;;  %s4319_s23 = sshll.u32 %s7697_s11, 4  ;;  %s4320_s23 = int_to_ptr.vmem [resolvable:$true] %s4319_s23 }
  0x18   : > { %s6452_s18 = smul.u32 36, %s8117_s5  ;;  %v6179_v22 = vld [vmem:[%s8008_s1 + $0x78] sm:$0xff]  ;;  %v6194_v25 = vld [vmem:[%s8008_s1 + $0xf0] sm:$0xff]  ;;  %v6193_v29 = vld [vmem:[%s8008_s1 + $0xe8] sm:$0xff]  ;;  %s6533_s5 = scalar_lea.hbm %s8010_s3, 1024 }
  0x19   : > { %6431 = vmatpush.bf16.msra.mxu1 %v6170_v1  ;;  %6432 = vmatpush.bf16.msra.mxu2 %v6170_v1  ;;  %v6203_v23 = vld [vmem:[%s8008_s1 + $0x138] sm:$0xff]  ;;  %v6178_v26 = vld [vmem:[%s8008_s1 + $0x70] sm:$0xff]  ;;  %v6177_v30 = vld [vmem:[%s8008_s1 + $0x68] sm:$0xff] }
  0x1a   : > { %6433 = vmatpush.bf16.msra.mxu3 %v6170_v1  ;;  %2593 = vmatpush.bf16.msra.mxu0 %v6170_v1  ;;  %s6695_s27 = scalar_lea.vmem %s8007_s0, %s6452_s18  ;;  %v6202_v27 = vld [vmem:[%s8008_s1 + $0x130] sm:$0xff]  ;;  %v6201_v31 = vld [vmem:[%s8008_s1 + $0x128] sm:$0xff]  ;;  %v6184_v44 = vld [vmem:[%s8008_s1 + $0xa0] sm:$0xff] }
  0x1b   : > { %v4721_v8 = vld [vmem:[%s6695_s27 + $0x240] sm:$0xf]  ;;  %v5952_v9 = vld [vmem:[%s6695_s27 + $0x260] sm:$0xf0]  ;;  %v4757_v32 = vld [vmem:[%s6695_s27 + $0x288] sm:$0xf] }
  0x1c   : > { %v5009_v10 = vld [vmem:[%s6695_s27 + $0x480] sm:$0xf]  ;;  %v6024_v11 = vld [vmem:[%s6695_s27 + $0x4a0] sm:$0xf0]  ;;  %v4722_v18 = vor.u32 %v5952_v9, %v4721_v8  ;;  %v5961_v33 = vld [vmem:[%s6695_s27 + $0x2a8] sm:$0xf0] }
  0x1d   : > { %6434 = vmatpush.bf16.msra.mxu1 %v6169_v2  ;;  %6435 = vmatpush.bf16.msra.mxu2 %v6169_v2  ;;  %v5297_v12 = vld [vmem:[%s6695_s27 + $0x6c0] sm:$0xf]  ;;  %v6096_v13 = vld [vmem:[%s6695_s27 + $0x6e0] sm:$0xf0]  ;;  %v5010_v19 = vor.u32 %v6024_v11, %v5009_v10  ;;  %v5045_v34 = vld [vmem:[%s6695_s27 + $0x4c8] sm:$0xf]  ;;  %v4758_v40 = vor.u32 %v5961_v33, %v4757_v32 }
  0x1e   : > { %6436 = vmatpush.bf16.msra.mxu3 %v6169_v2  ;;  %2594 = vmatpush.bf16.msra.mxu0 %v6169_v2  ;;  %v4433_v14 = vld [vmem:[%s6695_s27] sm:$0xf]  ;;  %v5880_v15 = vld [vmem:[%s6695_s27 + $0x20] sm:$0xf0]  ;;  %v5298_v20 = vor.u32 %v6096_v13, %v5297_v12  ;;  %v6033_v35 = vld [vmem:[%s6695_s27 + $0x4e8] sm:$0xf0] }
  0x1f   : > { %v4434_v21 = vor.u32 %v5880_v15, %v4433_v14  ;;  %v5333_v36 = vld [vmem:[%s6695_s27 + $0x708] sm:$0xf]  ;;  %v6105_v37 = vld [vmem:[%s6695_s27 + $0x728] sm:$0xf0]  ;;  %v5046_v41 = vor.u32 %v6033_v35, %v5045_v34  ;;  %v6192_v45 = vld [vmem:[%s8008_s1 + $0xe0] sm:$0xff] }
  0x20   : > { %v4469_v38 = vld [vmem:[%s6695_s27 + $0x48] sm:$0xf]  ;;  %v5889_v39 = vld [vmem:[%s6695_s27 + $0x68] sm:$0xf0]  ;;  %v5334_v42 = vor.u32 %v6105_v37, %v5333_v36  ;;  %v6176_v46 = vld [vmem:[%s8008_s1 + $0x60] sm:$0xff] }
  0x21   : > { %6437 = vmatpush.bf16.msra.mxu1 %v6168_v3  ;;  %6438 = vmatpush.bf16.msra.mxu2 %v6168_v3  ;;  %v4470_v43 = vor.u32 %v5889_v39, %v4469_v38  ;;  %v6200_v47 = vld [vmem:[%s8008_s1 + $0x120] sm:$0xff]  ;;  %v4793_v48 = vld [vmem:[%s6695_s27 + $0x2d0] sm:$0xf]  ;;  %v5970_v49 = vld [vmem:[%s6695_s27 + $0x2f0] sm:$0xf0] }
  0x22   : > { %6439 = vmatpush.bf16.msra.mxu3 %v6168_v3  ;;  %2595 = vmatpush.bf16.msra.mxu0 %v6168_v3  ;;  %v5081_v50 = vld [vmem:[%s6695_s27 + $0x510] sm:$0xf]  ;;  %v6042_v51 = vld [vmem:[%s6695_s27 + $0x530] sm:$0xf0]  ;;  %v4794_v56 = vor.u32 %v5970_v49, %v4793_v48  ;;  %v6183_v60 = vld [vmem:[%s8008_s1 + $0x98] sm:$0xff] }
  0x23   : > { %v5369_v52 = vld [vmem:[%s6695_s27 + $0x750] sm:$0xf]  ;;  %v6114_v53 = vld [vmem:[%s6695_s27 + $0x770] sm:$0xf0]  ;;  %v5082_v57 = vor.u32 %v6042_v51, %v5081_v50  ;;  %v6191_v61 = vld [vmem:[%s8008_s1 + $0xd8] sm:$0xff] }
  0x24   : > { %v4505_v54 = vld [vmem:[%s6695_s27 + $0x90] sm:$0xf]  ;;  %v5898_v55 = vld [vmem:[%s6695_s27 + $0xb0] sm:$0xf0]  ;;  %v5370_v58 = vor.u32 %v6114_v53, %v5369_v52  ;;  %v6175_v62 = vld [vmem:[%s8008_s1 + $0x58] sm:$0xff] }
  0x25   : > { %6440 = vmatpush.bf16.msra.mxu1 %v6167_v4  ;;  %6441 = vmatpush.bf16.msra.mxu2 %v6167_v4  ;;  %v4506_v59 = vor.u32 %v5898_v55, %v4505_v54  ;;  %v6199_v63 = vld [vmem:[%s8008_s1 + $0x118] sm:$0xff]  ;;  %v6182_v12 = vld [vmem:[%s8008_s1 + $0x90] sm:$0xff]  ;;  %v4901_v32 = vld [vmem:[%s6695_s27 + $0x3a8] sm:$0xf] }
  0x26   : > { %6442 = vmatpush.bf16.msra.mxu3 %v6167_v4  ;;  %2596 = vmatpush.bf16.msra.mxu0 %v6167_v4  ;;  %v4829_v0 = vld [vmem:[%s6695_s27 + $0x318] sm:$0xf]  ;;  %v5979_v1 = vld [vmem:[%s6695_s27 + $0x338] sm:$0xf0]  ;;  %v6190_v13 = vld [vmem:[%s8008_s1 + $0xd0] sm:$0xff] }
  0x27   : > { %v5117_v2 = vld [vmem:[%s6695_s27 + $0x558] sm:$0xf]  ;;  %v6051_v3 = vld [vmem:[%s6695_s27 + $0x578] sm:$0xf0]  ;;  %v4830_v8 = vor.u32 %v5979_v1, %v4829_v0  ;;  %v6174_v14 = vld [vmem:[%s8008_s1 + $0x50] sm:$0xff] }
  0x28   : > { %v5405_v4 = vld [vmem:[%s6695_s27 + $0x798] sm:$0xf]  ;;  %v5118_v9 = vor.u32 %v6051_v3, %v5117_v2  ;;  %v6198_v15 = vld [vmem:[%s8008_s1 + $0x110] sm:$0xff]  ;;  %v5997_v33 = vld [vmem:[%s6695_s27 + $0x3c8] sm:$0xf0] }
  0x29   : > { %6443 = vmatpush.bf16.msra.mxu1 %v6166_v5  ;;  %6444 = vmatpush.bf16.msra.mxu2 %v6166_v5  ;;  %v5189_v34 = vld [vmem:[%s6695_s27 + $0x5e8] sm:$0xf]  ;;  %v6069_v35 = vld [vmem:[%s6695_s27 + $0x608] sm:$0xf0]  ;;  %v4937_v48 = vld [vmem:[%s6695_s27 + $0x3f0] sm:$0xf] }
  0x2a   : > { %6445 = vmatpush.bf16.msra.mxu3 %v6166_v5  ;;  %2597 = vmatpush.bf16.msra.mxu0 %v6166_v5  ;;  %v6123_v5 = vld [vmem:[%s6695_s27 + $0x7b8] sm:$0xf0]  ;;  %v5477_v36 = vld [vmem:[%s6695_s27 + $0x828] sm:$0xf]  ;;  %v6141_v37 = vld [vmem:[%s6695_s27 + $0x848] sm:$0xf0] }
  0x2b   : > { %v5406_v10 = vor.u32 %v6123_v5, %v5405_v4  ;;  %v4613_v38 = vld [vmem:[%s6695_s27 + $0x168] sm:$0xf]  ;;  %v5925_v39 = vld [vmem:[%s6695_s27 + $0x188] sm:$0xf0]  ;;  %v6006_v49 = vld [vmem:[%s6695_s27 + $0x410] sm:$0xf0] }
  0x2c   : > { %v5225_v50 = vld [vmem:[%s6695_s27 + $0x630] sm:$0xf]  ;;  %v6078_v51 = vld [vmem:[%s6695_s27 + $0x650] sm:$0xf0]  ;;  %v4973_v0 = vld [vmem:[%s6695_s27 + $0x438] sm:$0xf] }
  0x2d   : > { %6446 = vmatpush.bf16.msra.mxu1 %v6165_v6  ;;  %6447 = vmatpush.bf16.msra.mxu2 %v6165_v6  ;;  %v5513_v52 = vld [vmem:[%s6695_s27 + $0x870] sm:$0xf]  ;;  %v6150_v53 = vld [vmem:[%s6695_s27 + $0x890] sm:$0xf0]  ;;  %v6015_v1 = vld [vmem:[%s6695_s27 + $0x458] sm:$0xf0] }
  0x2e   : > { %6448 = vmatpush.bf16.msra.mxu3 %v6165_v6  ;;  %2598 = vmatpush.bf16.msra.mxu0 %v6165_v6  ;;  %v4541_v6 = vld [vmem:[%s6695_s27 + $0xd8] sm:$0xf]  ;;  %v4649_v54 = vld [vmem:[%s6695_s27 + $0x1b0] sm:$0xf]  ;;  %v5934_v55 = vld [vmem:[%s6695_s27 + $0x1d0] sm:$0xf0] }
  0x2f   : > { %v5261_v2 = vld [vmem:[%s6695_s27 + $0x678] sm:$0xf]  ;;  %v6087_v3 = vld [vmem:[%s6695_s27 + $0x698] sm:$0xf0] }
  0x30   : > { %v5549_v4 = vld [vmem:[%s6695_s27 + $0x8b8] sm:$0xf]  ;;  %v6159_v5 = vld [vmem:[%s6695_s27 + $0x8d8] sm:$0xf0] }
  0x31   : > { %6449 = vmatpush.bf16.msra.mxu1 %v6164_v7  ;;  %6450 = vmatpush.bf16.msra.mxu2 %v6164_v7 }
  0x32   : > { %6451 = vmatpush.bf16.msra.mxu3 %v6164_v7  ;;  %2599 = vmatpush.bf16.msra.mxu0 %v6164_v7  ;;  %v5907_v7 = vld [vmem:[%s6695_s27 + $0xf8] sm:$0xf0] }
  0x33   : > { %v4542_v11 = vor.u32 %v5907_v7, %v4541_v6  ;;  %v4685_v6 = vld [vmem:[%s6695_s27 + $0x1f8] sm:$0xf]  ;;  %v5943_v7 = vld [vmem:[%s6695_s27 + $0x218] sm:$0xf0] }
  0x34   : > { %2640 = vmatmul.bf16.vlgmr.msra.gmra.mxu1 %v4722_v18  ;;  %2680 = vmatmul.bf16.vlgmr.msra.gmra.mxu2 %v5010_v19  ;;  %v5153_v18 = vld [vmem:[%s6695_s27 + $0x5a0] sm:$0xf]  ;;  %v6060_v19 = vld [vmem:[%s6695_s27 + $0x5c0] sm:$0xf0] }
  0x35   : > { %2930 = vmatpush.bf16.msrb.mxu2 %v6187_v16  ;;  %2720 = vmatmul.bf16.vlgmr.msra.gmra.mxu3 %v5298_v20  ;;  %v4865_v16 = vld [vmem:[%s6695_s27 + $0x360] sm:$0xf] }
  0x36   : > { %3099 = vmatpush.bf16.msrb.mxu3 %v6195_v17  ;;  %2600 = vmatmul.bf16.vlgmr.msra.gmra.mxu0 %v4434_v21  ;;  %v5988_v17 = vld [vmem:[%s6695_s27 + $0x380] sm:$0xf0]  ;;  %v5441_v20 = vld [vmem:[%s6695_s27 + $0x7e0] sm:$0xf] }
  0x37   : > { %2761 = vmatpush.bf16.msrb.mxu1 %v6179_v22  ;;  %3268 = vmatpush.bf16.msrb.mxu0 %v6203_v23  ;;  %v6132_v21 = vld [vmem:[%s6695_s27 + $0x800] sm:$0xf0]  ;;  %v4577_v22 = vld [vmem:[%s6695_s27 + $0x120] sm:$0xf] }
  0x38   : > { %v5916_v23 = vld [vmem:[%s6695_s27 + $0x140] sm:$0xf0] }
  0x39   : > { %2931 = vmatpush.bf16.msrb.mxu2 %v6186_v24  ;;  %v4866_v24 = vor.u32 %v5988_v17, %v4865_v16  ;;  %v5877_v16 = vld [vmem:[%s6695_s27 + $0xc] sm:$0xf]  ;;  %v4443_v17 = vld [vmem:[%s6695_s27 + $0x2c] sm:$0xf0] }
  0x3a   : > { %3100 = vmatpush.bf16.msrb.mxu3 %v6194_v25  ;;  %v5154_v25 = vor.u32 %v6060_v19, %v5153_v18  ;;  %v4449_v18 = vld [vmem:[%s6695_s27 + $0x10] sm:$0xf]  ;;  %v5882_v19 = vld [vmem:[%s6695_s27 + $0x30] sm:$0xf0] }
  0x3b   : > { %2762 = vmatpush.bf16.msrb.mxu1 %v6178_v26  ;;  %3269 = vmatpush.bf16.msrb.mxu0 %v6202_v27  ;;  %v5442_v26 = vor.u32 %v6132_v21, %v5441_v20  ;;  %v4578_v27 = vor.u32 %v5916_v23, %v4577_v22  ;;  %v4446_v23 = vor.u32 %v5877_v16, %v4443_v17  ;;  %v4557_v16 = vld [vmem:[%s6695_s27 + $0xe8] sm:$0xf]  ;;  %v5909_v17 = vld [vmem:[%s6695_s27 + $0x108] sm:$0xf0] }
  0x3d   : > { %2932 = vmatpush.bf16.msrb.mxu2 %v6185_v28  ;;  %v6181_v28 = vld [vmem:[%s8008_s1 + $0x88] sm:$0xff] }
  0x3e   : > { %3101 = vmatpush.bf16.msrb.mxu3 %v6193_v29  ;;  %v6189_v29 = vld [vmem:[%s8008_s1 + $0xc8] sm:$0xff] }
  0x3f   : > { %2763 = vmatpush.bf16.msrb.mxu1 %v6177_v30  ;;  %3270 = vmatpush.bf16.msrb.mxu0 %v6201_v31  ;;  %v6173_v30 = vld [vmem:[%s8008_s1 + $0x48] sm:$0xff] }
  0x40   : > { %v6197_v31 = vld [vmem:[%s8008_s1 + $0x108] sm:$0xff] }
  0x41   : > { %2933 = vmatpush.bf16.msrb.mxu2 %v6184_v44  ;;  %v6180_v44 = vld [vmem:[%s8008_s1 + $0x80] sm:$0xff] }
  0x42   : > { %3102 = vmatpush.bf16.msrb.mxu3 %v6192_v45  ;;  %v6188_v45 = vld [vmem:[%s8008_s1 + $0xc0] sm:$0xff] }
  0x43   : > { %2764 = vmatpush.bf16.msrb.mxu1 %v6176_v46  ;;  %3271 = vmatpush.bf16.msrb.mxu0 %v6200_v47  ;;  %v6172_v46 = vld [vmem:[%s8008_s1 + $0x40] sm:$0xff] }
  0x44   : > { %2645 = vmatmul.bf16.gmra.mxu1 %v4758_v40  ;;  %2685 = vmatmul.bf16.gmra.mxu2 %v5046_v41  ;;  %v4902_v40 = vor.u32 %v5997_v33, %v4901_v32  ;;  %v5190_v41 = vor.u32 %v6069_v35, %v5189_v34  ;;  %v6196_v47 = vld [vmem:[%s8008_s1 + $0x100] sm:$0xff]  ;;  %v4477_v32 = vld [vmem:[%s6695_s27 + $0x50] sm:$0xf]  ;;  %v5890_v33 = vld [vmem:[%s6695_s27 + $0x70] sm:$0xf0] }
  0x45   : > { %2725 = vmatmul.bf16.gmra.mxu3 %v5334_v42  ;;  %2934 = vmatpush.bf16.msrb.mxu2 %v6183_v60  ;;  %v5478_v42 = vor.u32 %v6141_v37, %v5477_v36  ;;  %v6219_v60 = vld [vmem:[%s8008_s1 + $0x1b8] sm:$0xff]  ;;  %v5886_v34 = vld [vmem:[%s6695_s27 + $0x54] sm:$0xf] }
  0x46   : > { %2605 = vmatmul.bf16.gmra.mxu0 %v4470_v43  ;;  %3103 = vmatpush.bf16.msrb.mxu3 %v6191_v61  ;;  %v4614_v43 = vor.u32 %v5925_v39, %v4613_v38  ;;  %v6227_v61 = vld [vmem:[%s8008_s1 + $0x1f8] sm:$0xff] }
  0x47   : > { %2765 = vmatpush.bf16.msrb.mxu1 %v6175_v62  ;;  %3272 = vmatpush.bf16.msrb.mxu0 %v6199_v63  ;;  %v6211_v62 = vld [vmem:[%s8008_s1 + $0x178] sm:$0xff] }
  0x48   : > { %v6235_v63 = vld [vmem:[%s8008_s1 + $0x238] sm:$0xff] }
  0x49   : > { %2935 = vmatpush.bf16.msrb.mxu2 %v6182_v12  ;;  %v5876_v12 = vld [vmem:[%s6695_s27 + $0x4] sm:$0xf]  ;;  %v4479_v35 = vld [vmem:[%s6695_s27 + $0x74] sm:$0xf0]  ;;  %v5891_v37 = vld [vmem:[%s6695_s27 + $0x78] sm:$0xf0] }
  0x4a   : > { %3104 = vmatpush.bf16.msrb.mxu3 %v6190_v13  ;;  %v4435_v13 = vld [vmem:[%s6695_s27 + $0x24] sm:$0xf0]  ;;  %v4485_v36 = vld [vmem:[%s6695_s27 + $0x58] sm:$0xf] }
  0x4b   : > { %2766 = vmatpush.bf16.msrb.mxu1 %v6174_v14  ;;  %3273 = vmatpush.bf16.msrb.mxu0 %v6198_v15  ;;  %v4441_v14 = vld [vmem:[%s6695_s27 + $0x8] sm:$0xf]  ;;  %v5881_v15 = vld [vmem:[%s6695_s27 + $0x28] sm:$0xf0]  ;;  %v4438_v20 = vor.u32 %v5876_v12, %v4435_v13  ;;  %v4549_v12 = vld [vmem:[%s6695_s27 + $0xe0] sm:$0xf] }
  0x4c   : > { %v4442_v21 = vor.u32 %v5881_v15, %v4441_v14  ;;  %v5908_v13 = vld [vmem:[%s6695_s27 + $0x100] sm:$0xf0]  ;;  %v4551_v15 = vld [vmem:[%s6695_s27 + $0x104] sm:$0xf0] }
  0x4d   : > { %2936 = vmatpush.bf16.msrb.mxu2 %v6181_v28  ;;  %v5904_v14 = vld [vmem:[%s6695_s27 + $0xe4] sm:$0xf] }
  0x4e   : > { %3105 = vmatpush.bf16.msrb.mxu3 %v6189_v29 }
  0x4f   : > { %2767 = vmatpush.bf16.msrb.mxu1 %v6173_v30  ;;  %3274 = vmatpush.bf16.msrb.mxu0 %v6197_v31  ;;  %v5885_v30 = vld [vmem:[%s6695_s27 + $0x4c] sm:$0xf]  ;;  %v4471_v31 = vld [vmem:[%s6695_s27 + $0x6c] sm:$0xf0] }
  0x51   : > { %2937 = vmatpush.bf16.msrb.mxu2 %v6180_v44  ;;  %v4486_v44 = vor.u32 %v5891_v37, %v4485_v36  ;;  %v5912_v36 = vld [vmem:[%s6695_s27 + $0x124] sm:$0xf]  ;;  %v4579_v37 = vld [vmem:[%s6695_s27 + $0x144] sm:$0xf0] }
  0x52   : > { %3106 = vmatpush.bf16.msrb.mxu3 %v6188_v45 }
  0x53   : > { %2768 = vmatpush.bf16.msrb.mxu1 %v6172_v46  ;;  %3275 = vmatpush.bf16.msrb.mxu0 %v6196_v47 }
  0x54   : > { %2650 = vmatmul.bf16.gmra.mxu1 %v4794_v56  ;;  %2690 = vmatmul.bf16.gmra.mxu2 %v5082_v57  ;;  %v4938_v56 = vor.u32 %v6006_v49, %v4937_v48  ;;  %v5226_v57 = vor.u32 %v6078_v51, %v5225_v50  ;;  %v5894_v50 = vld [vmem:[%s6695_s27 + $0x94] sm:$0xf]  ;;  %v4507_v51 = vld [vmem:[%s6695_s27 + $0xb4] sm:$0xf0] }
  0x55   : > { %2730 = vmatmul.bf16.gmra.mxu3 %v5370_v58  ;;  %v5514_v58 = vor.u32 %v6150_v53, %v5513_v52  ;;  %3606 = vmatpush.bf16.msra.mxu2 %v6219_v60  ;;  %v4513_v52 = vld [vmem:[%s6695_s27 + $0x98] sm:$0xf]  ;;  %v5899_v53 = vld [vmem:[%s6695_s27 + $0xb8] sm:$0xf0]  ;;  %v4510_v60 = vor.u32 %v5894_v50, %v4507_v51  ;;  %v4593_v50 = vld [vmem:[%s6695_s27 + $0x130] sm:$0xf] }
  0x56   : > { %2610 = vmatmul.bf16.gmra.mxu0 %v4506_v59  ;;  %v4650_v59 = vor.u32 %v5934_v55, %v4649_v54  ;;  %3775 = vmatpush.bf16.msra.mxu3 %v6227_v61  ;;  %v5895_v54 = vld [vmem:[%s6695_s27 + $0x9c] sm:$0xf]  ;;  %v4515_v55 = vld [vmem:[%s6695_s27 + $0xbc] sm:$0xf0]  ;;  %v4514_v61 = vor.u32 %v5899_v53, %v4513_v52  ;;  %v5918_v51 = vld [vmem:[%s6695_s27 + $0x150] sm:$0xf0] }
  0x57   : > { %3437 = vmatpush.bf16.msra.mxu1 %v6211_v62  ;;  %3944 = vmatpush.bf16.msra.mxu0 %v6235_v63  ;;  %v4518_v63 = vor.u32 %v5895_v54, %v4515_v55  ;;  %v4582_v54 = vor.u32 %v5912_v36, %v4579_v37 }
  0x64   : > { %2655 = vmatmul.bf16.gmra.mxu1 %v4830_v8  ;;  %2695 = vmatmul.bf16.gmra.mxu2 %v5118_v9  ;;  %v4974_v8 = vor.u32 %v6015_v1, %v4973_v0  ;;  %v5262_v9 = vor.u32 %v6087_v3, %v5261_v2  ;;  %v6218_v2 = vld [vmem:[%s8008_s1 + $0x1b0] sm:$0xff] }
  0x65   : > { %2735 = vmatmul.bf16.gmra.mxu3 %v5406_v10  ;;  %v5550_v10 = vor.u32 %v6159_v5, %v5549_v4  ;;  %v6226_v3 = vld [vmem:[%s8008_s1 + $0x1f0] sm:$0xff]  ;;  %3607 = vmatpush.bf16.msra.mxu2 %v6218_v2 }
  0x66   : > { %2615 = vmatmul.bf16.gmra.mxu0 %v4542_v11  ;;  %v4686_v11 = vor.u32 %v5943_v7, %v4685_v6  ;;  %3776 = vmatpush.bf16.msra.mxu3 %v6226_v3  ;;  %v6210_v7 = vld [vmem:[%s8008_s1 + $0x170] sm:$0xff] }
  0x67   : > { %3438 = vmatpush.bf16.msra.mxu1 %v6210_v7  ;;  %v5921_v7 = vld [vmem:[%s6695_s27 + $0x16c] sm:$0xf] }
  0x74   : > { %2660 = vmatmul.bf16.gmra.mxu1 %v4866_v24  ;;  %2700 = vmatmul.bf16.gmra.mxu2 %v5154_v25  ;;  %v4450_v24 = vor.u32 %v5882_v19, %v4449_v18 }
  0x75   : > { %2740 = vmatmul.bf16.gmra.mxu3 %v5442_v26 }
  0x76   : > { %2620 = vmatmul.bf16.gmra.mxu0 %v4578_v27 }
  0x84   : > { %2665 = vmatmul.bf16.gmra.mxu1 %v4902_v40  ;;  %2705 = vmatmul.bf16.gmra.mxu2 %v5190_v41  ;;  %v4474_v40 = vor.u32 %v5885_v30, %v4471_v31  ;;  %v4478_v41 = vor.u32 %v5890_v33, %v4477_v32  ;;  %v4558_v30 = vor.u32 %v5909_v17, %v4557_v16 }
  0x85   : > { %2745 = vmatmul.bf16.gmra.mxu3 %v5478_v42 }
  0x86   : > { %2625 = vmatmul.bf16.gmra.mxu0 %v4614_v43  ;;  %v4482_v43 = vor.u32 %v5886_v34, %v4479_v35 }
  0x94   : > { %2670 = vmatmul.bf16.gmra.mxu1 %v4938_v56  ;;  %2710 = vmatmul.bf16.gmra.mxu2 %v5226_v57  ;;  %v4521_v56 = vld [vmem:[%s6695_s27 + $0xa0] sm:$0xf]  ;;  %v5900_v57 = vld [vmem:[%s6695_s27 + $0xc0] sm:$0xf0] }
  0x95   : > { %2750 = vmatmul.bf16.gmra.mxu3 %v5514_v58  ;;  %v4522_v0 = vor.u32 %v5900_v57, %v4521_v56 }
  0x96   : > { %2630 = vmatmul.bf16.gmra.mxu0 %v4650_v59 }
  0xa4   : > { %2675 = vmatmul.bf16.gmra.mxu1 %v4974_v8  ;;  %2715 = vmatmul.bf16.gmra.mxu2 %v5262_v9  ;;  %v6234_v9 = vld [vmem:[%s8008_s1 + $0x230] sm:$0xff] }
  0xa5   : > { %2755 = vmatmul.bf16.gmra.mxu3 %v5550_v10  ;;  %v5903_v10 = vld [vmem:[%s6695_s27 + $0xdc] sm:$0xf]  ;;  %3945 = vmatpush.bf16.msra.mxu0 %v6234_v9  ;;  %v4615_v9 = vld [vmem:[%s6695_s27 + $0x18c] sm:$0xf0] }
  0xa6   : > { %2635 = vmatmul.bf16.gmra.mxu0 %v4686_v11  ;;  %v4543_v11 = vld [vmem:[%s6695_s27 + $0xfc] sm:$0xf0] }
  0xb1   : > { %v6880_v22 = vpop.f32.mrf.mxu1 }
  0xb3   : > { %v6882_v25 = vpop.f32.mrf.mxu0 }
  0xb4   : > { %2769 = vmatmul.bf16.vlgmr.msrb.gmra.mxu1 %v4438_v20  ;;  %2938 = vmatmul.bf16.vlgmr.msrb.gmra.mxu2 %v4442_v21  ;;  %v4546_v20 = vor.u32 %v5903_v10, %v4543_v11  ;;  %v4550_v21 = vor.u32 %v5908_v13, %v4549_v12  ;;  %v4621_v10 = vld [vmem:[%s6695_s27 + $0x170] sm:$0xf]  ;;  %v5926_v11 = vld [vmem:[%s6695_s27 + $0x190] sm:$0xf0]  ;;  %v4623_v13 = vld [vmem:[%s6695_s27 + $0x194] sm:$0xf0] }
  0xb5   : > { %3107 = vmatmul.bf16.vlgmr.msrb.gmra.mxu3 %v4446_v23  ;;  %v5922_v12 = vld [vmem:[%s6695_s27 + $0x174] sm:$0xf] }
  0xb6   : > { %3276 = vmatmul.bf16.vlgmr.msrb.gmra.mxu0 %v4450_v24  ;;  %v4554_v24 = vor.u32 %v5904_v14, %v4551_v15  ;;  %v4629_v14 = vld [vmem:[%s6695_s27 + $0x178] sm:$0xf]  ;;  %v5927_v15 = vld [vmem:[%s6695_s27 + $0x198] sm:$0xf0] }
  0xb7   : > { %v6884_v26 = vpop.f32.mrf.mxu2  ;;  %v4630_v36 = vor.u32 %v5927_v15, %v4629_v14 }
  0xb8   : > { %v6886_v27 = vpop.f32.mrf.mxu3 }
  0xb9   : > { %8013 = vst [vmem:[#allocation5_spill] sm:$0xff] %v6886_v27  ;;  %v6888_v28 = vpop.f32.mrf.mxu1 }
  0xbb   : > { %v6890_v29 = vpop.f32.mrf.mxu0 }
  0xbf   : > { %v6900_v38 = vpop.f32.mrf.mxu2 }
  0xc0   : > { %v6902_v39 = vpop.f32.mrf.mxu3 }
  0xc1   : > { %8014 = vst [vmem:[#allocation6_spill] sm:$0xff] %v6902_v39  ;;  %v6904_v42 = vpop.f32.mrf.mxu1 }
  0xc3   : > { %v6906_v45 = vpop.f32.mrf.mxu0 }
  0xc4   : > { %2774 = vmatmul.bf16.gmra.mxu1 %v4474_v40  ;;  %2943 = vmatmul.bf16.gmra.mxu2 %v4478_v41  ;;  %v4585_v40 = vld [vmem:[%s6695_s27 + $0x128] sm:$0xf]  ;;  %v5917_v41 = vld [vmem:[%s6695_s27 + $0x148] sm:$0xf0] }
  0xc5   : > { %3112 = vmatmul.bf16.gmra.mxu3 %v4482_v43  ;;  %v5913_v43 = vld [vmem:[%s6695_s27 + $0x12c] sm:$0xf]  ;;  %v4586_v55 = vor.u32 %v5917_v41, %v4585_v40 }
  0xc6   : > { %3281 = vmatmul.bf16.gmra.mxu0 %v4486_v44  ;;  %v4587_v44 = vld [vmem:[%s6695_s27 + $0x14c] sm:$0xf0] }
  0xc7   : > { %v6908_v46 = vpop.f32.mrf.mxu2  ;;  %v4590_v57 = vor.u32 %v5913_v43, %v4587_v44 }
  0xc8   : > { %v6910_v47 = vpop.f32.mrf.mxu3 }
  0xc9   : > { %8015 = vst [vmem:[#allocation7_spill] sm:$0xff] %v6910_v47  ;;  %v6912_v48 = vpop.f32.mrf.mxu1 }
  0xcb   : > { %v6914_v49 = vpop.f32.mrf.mxu0 }
  0xcf   : > { %v6924_v58 = vpop.f32.mrf.mxu2 }
  0xd0   : > { %v6926_v59 = vpop.f32.mrf.mxu3 }
  0xd1   : > { %8016 = vst [vmem:[#allocation8_spill] sm:$0xff] %v6926_v59  ;;  %v6928_v62 = vpop.f32.mrf.mxu1 }
  0xd3   : > { %v6930_v1 = vpop.f32.mrf.mxu0 }
  0xd4   : > { %2779 = vmatmul.bf16.gmra.mxu1 %v4510_v60  ;;  %2948 = vmatmul.bf16.gmra.mxu2 %v4514_v61  ;;  %v4594_v60 = vor.u32 %v5918_v51, %v4593_v50  ;;  %v5930_v50 = vld [vmem:[%s6695_s27 + $0x1b4] sm:$0xf]  ;;  %v4651_v51 = vld [vmem:[%s6695_s27 + $0x1d4] sm:$0xf0] }
  0xd5   : > { %3117 = vmatmul.bf16.gmra.mxu3 %v4518_v63 }
  0xd6   : > { %3286 = vmatmul.bf16.gmra.mxu0 %v4522_v0 }
  0xd7   : > { %v6938_v4 = vpop.f32.mrf.mxu2 }
  0xd8   : > { %v6940_v5 = vpop.f32.mrf.mxu3 }
  0xd9   : > { %8017 = vst [vmem:[#allocation9_spill] sm:$0xff] %v6940_v5  ;;  %v6942_v6 = vpop.f32.mrf.mxu1 }
  0xdb   : > { %v6947_v8 = vpop.f32.mrf.mxu0 }
  0xdf   : > { %v6960_v18 = vpop.f32.mrf.mxu2 }
  0xe0   : > { %v6962_v19 = vpop.f32.mrf.mxu3 }
  0xe1   : > { %8018 = vst [vmem:[#allocation10_spill] sm:$0xff] %v6962_v19  ;;  %v6964_v23 = vpop.f32.mrf.mxu1 }
  0xe3   : > { %v6966_v31 = vpop.f32.mrf.mxu0 }
  0xe4   : > { %2784 = vmatmul.bf16.gmra.mxu1 %v4546_v20  ;;  %2953 = vmatmul.bf16.gmra.mxu2 %v4550_v21  ;;  %v4618_v20 = vor.u32 %v5921_v7, %v4615_v9  ;;  %v4622_v21 = vor.u32 %v5926_v11, %v4621_v10  ;;  %v4665_v7 = vld [vmem:[%s6695_s27 + $0x1c0] sm:$0xf]  ;;  %v5936_v9 = vld [vmem:[%s6695_s27 + $0x1e0] sm:$0xf0] }
  0xe5   : > { %3122 = vmatmul.bf16.gmra.mxu3 %v4554_v24 }
  0xe6   : > { %3291 = vmatmul.bf16.gmra.mxu0 %v4558_v30  ;;  %v4626_v30 = vor.u32 %v5922_v12, %v4623_v13  ;;  %v4654_v12 = vor.u32 %v5930_v50, %v4651_v51 }
  0xe7   : > { %v6968_v32 = vpop.f32.mrf.mxu2 }
  0xe8   : > { %v6970_v33 = vpop.f32.mrf.mxu3 }
  0xe9   : > { %8019 = vst [vmem:[#allocation11_spill] sm:$0xff] %v6970_v33  ;;  %v6972_v34 = vpop.f32.mrf.mxu1 }
  0xeb   : > { %v6974_v35 = vpop.f32.mrf.mxu0 }
  0xef   : > { %v6984_v52 = vpop.f32.mrf.mxu2 }
  0xf0   : > { %v6986_v53 = vpop.f32.mrf.mxu3 }
  0xf1   : > { %8020 = vst [vmem:[#allocation12_spill] sm:$0xff] %v6986_v53  ;;  %v6988_v56 = vpop.f32.mrf.mxu1 }
  0xf3   : > { %v6990_v61 = vpop.f32.mrf.mxu0 }
  0xf4   : > { %2789 = vmatmul.bf16.gmra.mxu1 %v4582_v54  ;;  %2958 = vmatmul.bf16.gmra.mxu2 %v4586_v55  ;;  %v4657_v54 = vld [vmem:[%s6695_s27 + $0x1b8] sm:$0xf]  ;;  %v5935_v55 = vld [vmem:[%s6695_s27 + $0x1d8] sm:$0xf0] }
  0xf5   : > { %3127 = vmatmul.bf16.gmra.mxu3 %v4590_v57  ;;  %v5931_v57 = vld [vmem:[%s6695_s27 + $0x1bc] sm:$0xf]  ;;  %v4658_v13 = vor.u32 %v5935_v55, %v4657_v54 }
  0xf6   : > { %3296 = vmatmul.bf16.gmra.mxu0 %v4594_v60  ;;  %v4659_v60 = vld [vmem:[%s6695_s27 + $0x1dc] sm:$0xf0] }
  0xf7   : > { %v6992_v63 = vpop.f32.mrf.mxu2  ;;  %v4662_v15 = vor.u32 %v5931_v57, %v4659_v60  ;;  %v6209_v57 = vld [vmem:[%s8008_s1 + $0x168] sm:$0xff] }
  0xf8   : > { %v6994_v0 = vpop.f32.mrf.mxu3  ;;  %v6233_v60 = vld [vmem:[%s8008_s1 + $0x228] sm:$0xff]  ;;  %3439 = vmatpush.bf16.msra.mxu1 %v6209_v57 }
  0xf9   : > { %8021 = vst [vmem:[#allocation13_spill] sm:$0xff] %v6994_v0  ;;  %v6996_v2 = vpop.f32.mrf.mxu1  ;;  %3946 = vmatpush.bf16.msra.mxu0 %v6233_v60 }
  0xfb   : > { %v6998_v3 = vpop.f32.mrf.mxu0 }
  0xff   : > { %v7008_v16 = vpop.f32.mrf.mxu2 }
 0x100   : > { %v7010_v17 = vpop.f32.mrf.mxu3 }
 0x101   : > { %8022 = vst [vmem:[#allocation14_spill] sm:$0xff] %v7010_v17  ;;  %v7012_v24 = vpop.f32.mrf.mxu1 }
 0x103   : > { %v7014_v37 = vpop.f32.mrf.mxu0 }
 0x104   : > { %2794 = vmatmul.bf16.gmra.mxu1 %v4618_v20  ;;  %2963 = vmatmul.bf16.gmra.mxu2 %v4622_v21  ;;  %v4666_v20 = vor.u32 %v5936_v9, %v4665_v7  ;;  %v5939_v7 = vld [vmem:[%s6695_s27 + $0x1fc] sm:$0xf]  ;;  %v4687_v9 = vld [vmem:[%s6695_s27 + $0x21c] sm:$0xf0] }
 0x105   : > { %3132 = vmatmul.bf16.gmra.mxu3 %v4626_v30  ;;  %v6217_v30 = vld [vmem:[%s8008_s1 + $0x1a8] sm:$0xff] }
 0x106   : > { %3301 = vmatmul.bf16.gmra.mxu0 %v4630_v36  ;;  %v6225_v36 = vld [vmem:[%s8008_s1 + $0x1e8] sm:$0xff]  ;;  %3608 = vmatpush.bf16.msra.mxu2 %v6217_v30 }
 0x107   : > { %v7016_v40 = vpop.f32.mrf.mxu2  ;;  %3777 = vmatpush.bf16.msra.mxu3 %v6225_v36  ;;  %v4701_v30 = vld [vmem:[%s6695_s27 + $0x208] sm:$0xf]  ;;  %v5945_v36 = vld [vmem:[%s6695_s27 + $0x228] sm:$0xf0] }
 0x108   : > { %8023 = vst [vmem:[#allocation15_spill] sm:$0xff] %v7016_v40  ;;  %v7018_v41 = vpop.f32.mrf.mxu3  ;;  %v4702_v60 = vor.u32 %v5945_v36, %v4701_v30  ;;  %v5953_v30 = vld [vmem:[%s6695_s27 + $0x268] sm:$0xf0]  ;;  %v4731_v36 = vld [vmem:[%s6695_s27 + $0x26c] sm:$0xf0] }
 0x109   : > { %8024 = vst [vmem:[#allocation16_spill] sm:$0xff] %v7018_v41  ;;  %v7020_v43 = vpop.f32.mrf.mxu1  ;;  %v4690_v41 = vor.u32 %v5939_v7, %v4687_v9 }
 0x10b   : > { %v7022_v44 = vpop.f32.mrf.mxu0 }
 0x10f   : > { %v7032_v10 = vpop.f32.mrf.mxu2 }
 0x110   : > { %8025 = vst [vmem:[#allocation17_spill] sm:$0xff] %v7032_v10  ;;  %v7034_v11 = vpop.f32.mrf.mxu3 }
 0x111   : > { %8026 = vst [vmem:[#allocation18_spill] sm:$0xff] %v7034_v11  ;;  %v7036_v14 = vpop.f32.mrf.mxu1 }
 0x113   : > { %v7038_v21 = vpop.f32.mrf.mxu0 }
 0x114   : > { %2799 = vmatmul.bf16.gmra.mxu1 %v4654_v12  ;;  %2968 = vmatmul.bf16.gmra.mxu2 %v4658_v13  ;;  %v4693_v12 = vld [vmem:[%s6695_s27 + $0x200] sm:$0xf]  ;;  %v5944_v13 = vld [vmem:[%s6695_s27 + $0x220] sm:$0xf0] }
 0x115   : > { %3137 = vmatmul.bf16.gmra.mxu3 %v4662_v15  ;;  %v5940_v15 = vld [vmem:[%s6695_s27 + $0x204] sm:$0xf]  ;;  %v4694_v17 = vor.u32 %v5944_v13, %v4693_v12  ;;  %v7087_v13 = vld [vmem:[%s8009_s2] ss:$0 sm:$0xff] }
 0x116   : > { %3306 = vmatmul.bf16.gmra.mxu0 %v4666_v20  ;;  %v4695_v20 = vld [vmem:[%s6695_s27 + $0x224] sm:$0xf0] }
 0x117   : > { %v7046_v50 = vpop.f32.mrf.mxu2  ;;  %v4698_v57 = vor.u32 %v5940_v15, %v4695_v20  ;;  %v5948_v15 = vld [vmem:[%s6695_s27 + $0x244] sm:$0xf]  ;;  %v4723_v20 = vld [vmem:[%s6695_s27 + $0x264] sm:$0xf0] }
 0x118   : > { %8027 = vst [vmem:[#allocation19_spill] sm:$0xff] %v7046_v50  ;;  %v7048_v51 = vpop.f32.mrf.mxu3  ;;  %v4726_v5 = vor.u32 %v5948_v15, %v4723_v20  ;;  %v2604_v15 = vadd.f32 %v7087_v13, %v6890_v29  ;;  %v2607_v29 = vadd.f32 %v7087_v13, %v6906_v45 }
 0x119   : > { %8028 = vst [vmem:[#allocation20_spill] sm:$0xff] %v7048_v51  ;;  %v7050_v54 = vpop.f32.mrf.mxu1 }
 0x11b   : > { %v7052_v55 = vpop.f32.mrf.mxu0 }
 0x11f   : > { %v7068_v51 = vpop.f32.mrf.mxu2 }
 0x120   : > { %8029 = vst [vmem:[#allocation21_spill] sm:$0xff] %v7068_v51  ;;  %v7070_v11 = vpop.f32.mrf.mxu3 }
 0x121   : > { %8030 = vst [vmem:[#allocation22_spill] sm:$0xff] %v7070_v11  ;;  %v7072_v0 = vpop.f32.mrf.mxu1 }
 0x123   : > { %v7074_v53 = vpop.f32.mrf.mxu0 }
 0x124   : > { %2804 = vmatmul.bf16.gmra.mxu1 %v4690_v41  ;;  %2973 = vmatmul.bf16.gmra.mxu2 %v4694_v17  ;;  %v4729_v41 = vld [vmem:[%s6695_s27 + $0x248] sm:$0xf]  ;;  %v5949_v17 = vld [vmem:[%s6695_s27 + $0x24c] sm:$0xf] }
 0x125   : > { %3142 = vmatmul.bf16.gmra.mxu3 %v4698_v57  ;;  %v4737_v57 = vld [vmem:[%s6695_s27 + $0x250] sm:$0xf]  ;;  %v4730_v59 = vor.u32 %v5953_v30, %v4729_v41  ;;  %v4734_v39 = vor.u32 %v5949_v17, %v4731_v36  ;;  %v5957_v36 = vld [vmem:[%s6695_s27 + $0x28c] sm:$0xf] }
 0x126   : > { %3311 = vmatmul.bf16.gmra.mxu0 %v4702_v60  ;;  %v5954_v60 = vld [vmem:[%s6695_s27 + $0x270] sm:$0xf0] }
 0x127   : > { %v7076_v11 = vpop.f32.mrf.mxu2  ;;  %v4738_v27 = vor.u32 %v5954_v60, %v4737_v57  ;;  %v5958_v60 = vld [vmem:[%s6695_s27 + $0x294] sm:$0xf] }
 0x128   : > { %8031 = vst [vmem:[#allocation23_spill] sm:$0xff] %v7076_v11  ;;  %v7078_v7 = vpop.f32.mrf.mxu3 }
 0x129   : > { %8032 = vst [vmem:[#allocation24_spill] sm:$0xff] %v7078_v7  ;;  %v7080_v9 = vpop.f32.mrf.mxu1  ;;  %v2602_v7 = vadd.f32 %v7087_v13, %v6882_v25 }
 0x12b   : > { %v7082_v12 = vpop.f32.mrf.mxu0 }
 0x12f   : > { %v7097_v33 = vpop.f32.mrf.mxu2 }
 0x130   : > { %8033 = vst [vmem:[#allocation25_spill] sm:$0xff] %v7097_v33  ;;  %v7101_v19 = vpop.f32.mrf.mxu3  ;;  %v5963_v33 = vld [vmem:[%s6695_s27 + $0x2b8] sm:$0xf0] }
 0x131   : > { %8034 = vst [vmem:[#allocation26_spill] sm:$0xff] %v7101_v19  ;;  %v2770_v47 = vpop.f32.mrf.mxu1  ;;  %v4773_v19 = vld [vmem:[%s6695_s27 + $0x298] sm:$0xf] }
 0x132   : > { %v2771_v11 = vadd.f32 %v2770_v47, %v2602_v7 }
 0x133   : > { %v3277_v51 = vpop.f32.mrf.mxu0 }
 0x134   : > { %2809 = vmatmul.bf16.gmra.mxu1 %v4726_v5  ;;  %2978 = vmatmul.bf16.gmra.mxu2 %v4730_v59  ;;  %v4759_v5 = vld [vmem:[%s6695_s27 + $0x2ac] sm:$0xf0] }
 0x135   : > { %3147 = vmatmul.bf16.gmra.mxu3 %v4734_v39  ;;  %v4765_v59 = vld [vmem:[%s6695_s27 + $0x290] sm:$0xf]  ;;  %v5962_v39 = vld [vmem:[%s6695_s27 + $0x2b0] sm:$0xf0]  ;;  %v4762_v10 = vor.u32 %v5957_v36, %v4759_v5 }
 0x136   : > { %3316 = vmatmul.bf16.gmra.mxu0 %v4738_v27  ;;  %v4767_v27 = vld [vmem:[%s6695_s27 + $0x2b4] sm:$0xf0] }
 0x137   : > { %v2939_v25 = vpop.f32.mrf.mxu2 }
 0x138   : > { %v2940_v20 = vadd.f32 %v2939_v25, %v2771_v11  ;;  %v3108_v41 = vpop.f32.mrf.mxu3 }
 0x139   : > { %v2772_v30 = vpop.f32.mrf.mxu1 }
 0x13a   : > { %v3109_v17 = vadd.f32 %v3108_v41, %v2940_v20  ;;  %v2773_v47 = vadd.f32 %v2772_v30, %v2604_v15  ;;  %v4766_v20 = vor.u32 %v5962_v39, %v4765_v59  ;;  %v4770_v41 = vor.u32 %v5958_v60, %v4767_v27  ;;  %v5966_v59 = vld [vmem:[%s6695_s27 + $0x2d4] sm:$0xf]  ;;  %v4795_v39 = vld [vmem:[%s6695_s27 + $0x2f4] sm:$0xf0]  ;;  %v5971_v60 = vld [vmem:[%s6695_s27 + $0x2f8] sm:$0xf0] }
 0x13b   : > { %v3279_v7 = vpop.f32.mrf.mxu0  ;;  %v4774_v30 = vor.u32 %v5963_v33, %v4773_v19  ;;  %v2609_v19 = vadd.f32 %v7087_v13, %v6914_v49  ;;  %v5967_v27 = vld [vmem:[%s6695_s27 + $0x2dc] sm:$0xf]  ;;  %v2612_v49 = vadd.f32 %v7087_v13, %v6930_v1  ;;  %v6216_v1 = vld [vmem:[%s8008_s1 + $0x1a0] sm:$0xff] }
 0x13c   : > { %v7107_v57 = vadd.f32 %v3277_v51, %v3109_v17  ;;  %3609 = vmatpush.bf16.msra.mxu2 %v6216_v1 }
 0x13e   : > { %8035 = vst [vmem:[#allocation27_spill] sm:$0xff] %v7107_v57 }
 0x13f   : > { %v2941_v50 = vpop.f32.mrf.mxu2 }
 0x140   : > { %v2942_v11 = vadd.f32 %v2941_v50, %v2773_v47  ;;  %v3110_v25 = vpop.f32.mrf.mxu3 }
 0x141   : > { %v2775_v15 = vpop.f32.mrf.mxu1 }
 0x142   : > { %v3111_v40 = vadd.f32 %v3110_v25, %v2942_v11  ;;  %v2776_v51 = vadd.f32 %v2775_v15, %v2607_v29  ;;  %v4803_v29 = vld [vmem:[%s6695_s27 + $0x2fc] sm:$0xf0]  ;;  %v5972_v25 = vld [vmem:[%s6695_s27 + $0x300] sm:$0xf0] }
 0x143   : > { %v3282_v17 = vpop.f32.mrf.mxu0  ;;  %v4809_v11 = vld [vmem:[%s6695_s27 + $0x2e0] sm:$0xf] }
 0x144   : > { %2814 = vmatmul.bf16.gmra.mxu1 %v4762_v10  ;;  %2983 = vmatmul.bf16.gmra.mxu2 %v4766_v20  ;;  %v7117_v57 = vadd.f32 %v3279_v7, %v3111_v40  ;;  %v4801_v7 = vld [vmem:[%s6695_s27 + $0x2d8] sm:$0xf] }
 0x145   : > { %3152 = vmatmul.bf16.gmra.mxu3 %v4770_v41 }
 0x146   : > { %3321 = vmatmul.bf16.gmra.mxu0 %v4774_v30  ;;  %v4798_v30 = vor.u32 %v5966_v59, %v4795_v39 }
 0x147   : > { %v2944_v45 = vpop.f32.mrf.mxu2 }
 0x148   : > { %v2945_v33 = vadd.f32 %v2944_v45, %v2776_v51  ;;  %v3113_v50 = vpop.f32.mrf.mxu3  ;;  %v4802_v51 = vor.u32 %v5971_v60, %v4801_v7 }
 0x149   : > { %v2777_v47 = vpop.f32.mrf.mxu1 }
 0x14a   : > { %v3114_v36 = vadd.f32 %v3113_v50, %v2945_v33  ;;  %v2778_v10 = vadd.f32 %v2777_v47, %v2609_v19  ;;  %v4806_v19 = vor.u32 %v5967_v27, %v4803_v29  ;;  %v4810_v33 = vor.u32 %v5972_v25, %v4809_v11  ;;  %v6208_v25 = vld [vmem:[%s8008_s1 + $0x160] sm:$0xff] }
 0x14b   : > { %v3284_v5 = vpop.f32.mrf.mxu0  ;;  %3440 = vmatpush.bf16.msra.mxu1 %v6208_v25 }
 0x14c   : > { %v7123_v40 = vadd.f32 %v3282_v17, %v3114_v36 }
 0x14f   : > { %v2946_v20 = vpop.f32.mrf.mxu2 }
 0x150   : > { %v2947_v15 = vadd.f32 %v2946_v20, %v2778_v10  ;;  %v3115_v41 = vpop.f32.mrf.mxu3  ;;  %v6224_v10 = vld [vmem:[%s8008_s1 + $0x1e0] sm:$0xff] }
 0x151   : > { %v2780_v45 = vpop.f32.mrf.mxu1  ;;  %3778 = vmatpush.bf16.msra.mxu3 %v6224_v10  ;;  %v6232_v20 = vld [vmem:[%s8008_s1 + $0x220] sm:$0xff] }
 0x152   : > { %v3116_v50 = vadd.f32 %v3115_v41, %v2947_v15  ;;  %v2781_v17 = vadd.f32 %v2780_v45, %v2612_v49  ;;  %v5975_v49 = vld [vmem:[%s6695_s27 + $0x31c] sm:$0xf]  ;;  %3947 = vmatpush.bf16.msra.mxu0 %v6232_v20  ;;  %v4837_v41 = vld [vmem:[%s6695_s27 + $0x320] sm:$0xf]  ;;  %v4839_v45 = vld [vmem:[%s6695_s27 + $0x344] sm:$0xf0] }
 0x153   : > { %v3287_v47 = vpop.f32.mrf.mxu0 }
 0x154   : > { %2819 = vmatmul.bf16.gmra.mxu1 %v4798_v30  ;;  %2988 = vmatmul.bf16.gmra.mxu2 %v4802_v51  ;;  %v7133_v36 = vadd.f32 %v3284_v5, %v3116_v50  ;;  %v2614_v5 = vadd.f32 %v7087_v13, %v6947_v8  ;;  %v4831_v8 = vld [vmem:[%s6695_s27 + $0x33c] sm:$0xf0]  ;;  %v5980_v30 = vld [vmem:[%s6695_s27 + $0x340] sm:$0xf0] }
 0x155   : > { %3157 = vmatmul.bf16.gmra.mxu3 %v4806_v19  ;;  %v5976_v51 = vld [vmem:[%s6695_s27 + $0x324] sm:$0xf]  ;;  %v4845_v19 = vld [vmem:[%s6695_s27 + $0x328] sm:$0xf] }
 0x156   : > { %3326 = vmatmul.bf16.gmra.mxu0 %v4810_v33  ;;  %v5981_v33 = vld [vmem:[%s6695_s27 + $0x348] sm:$0xf0] }
 0x157   : > { %v2949_v59 = vpop.f32.mrf.mxu2 }
 0x158   : > { %v2950_v39 = vadd.f32 %v2949_v59, %v2781_v17  ;;  %v3118_v7 = vpop.f32.mrf.mxu3  ;;  %v2617_v17 = vadd.f32 %v7087_v13, %v6966_v31  ;;  %v4834_v59 = vor.u32 %v5975_v49, %v4831_v8 }
 0x159   : > { %v2782_v60 = vpop.f32.mrf.mxu1 }
 0x15a   : > { %v3119_v27 = vadd.f32 %v3118_v7, %v2950_v39  ;;  %v2783_v29 = vadd.f32 %v2782_v60, %v2614_v5  ;;  %v4838_v5 = vor.u32 %v5980_v30, %v4837_v41  ;;  %v4842_v7 = vor.u32 %v5976_v51, %v4839_v45 }
 0x15b   : > { %v3289_v11 = vpop.f32.mrf.mxu0  ;;  %v4846_v60 = vor.u32 %v5981_v33, %v4845_v19  ;;  %v5984_v19 = vld [vmem:[%s6695_s27 + $0x364] sm:$0xf]  ;;  %v4867_v33 = vld [vmem:[%s6695_s27 + $0x384] sm:$0xf0] }
 0x15c   : > { %v7151_v15 = vadd.f32 %v3287_v47, %v3119_v27 }
 0x15f   : > { %v2951_v50 = vpop.f32.mrf.mxu2 }
 0x160   : > { %v2952_v1 = vadd.f32 %v2951_v50, %v2783_v29  ;;  %v3120_v10 = vpop.f32.mrf.mxu3  ;;  %v2619_v29 = vadd.f32 %v7087_v13, %v6974_v35  ;;  %v4873_v50 = vld [vmem:[%s6695_s27 + $0x368] sm:$0xf]  ;;  %v2622_v35 = vadd.f32 %v7087_v13, %v6990_v61 }
 0x161   : > { %v2785_v39 = vpop.f32.mrf.mxu1 }
 0x162   : > { %v3121_v25 = vadd.f32 %v3120_v10, %v2952_v1  ;;  %v2786_v47 = vadd.f32 %v2785_v39, %v2617_v17  ;;  %v5989_v17 = vld [vmem:[%s6695_s27 + $0x388] sm:$0xf0]  ;;  %v4875_v10 = vld [vmem:[%s6695_s27 + $0x38c] sm:$0xf0] }
 0x163   : > { %v3292_v27 = vpop.f32.mrf.mxu0  ;;  %v5985_v1 = vld [vmem:[%s6695_s27 + $0x36c] sm:$0xf] }
 0x164   : > { %2824 = vmatmul.bf16.gmra.mxu1 %v4834_v59  ;;  %2993 = vmatmul.bf16.gmra.mxu2 %v4838_v5  ;;  %v7161_v20 = vadd.f32 %v3289_v11, %v3121_v25  ;;  %v4881_v59 = vld [vmem:[%s6695_s27 + $0x370] sm:$0xf]  ;;  %v5990_v5 = vld [vmem:[%s6695_s27 + $0x390] sm:$0xf0]  ;;  %v4870_v25 = vor.u32 %v5984_v19, %v4867_v33 }
 0x165   : > { %3162 = vmatmul.bf16.gmra.mxu3 %v4842_v7 }
 0x166   : > { %3331 = vmatmul.bf16.gmra.mxu0 %v4846_v60 }
 0x167   : > { %v2954_v31 = vpop.f32.mrf.mxu2 }
 0x168   : > { %v2955_v49 = vadd.f32 %v2954_v31, %v2786_v47  ;;  %v3123_v8 = vpop.f32.mrf.mxu3  ;;  %v4874_v47 = vor.u32 %v5989_v17, %v4873_v50 }
 0x169   : > { %v2787_v41 = vpop.f32.mrf.mxu1 }
 0x16a   : > { %v3124_v30 = vadd.f32 %v3123_v8, %v2955_v49  ;;  %v2788_v51 = vadd.f32 %v2787_v41, %v2619_v29  ;;  %v4878_v29 = vor.u32 %v5985_v1, %v4875_v10  ;;  %v4882_v49 = vor.u32 %v5990_v5, %v4881_v59  ;;  %v5993_v59 = vld [vmem:[%s6695_s27 + $0x3ac] sm:$0xf]  ;;  %v4903_v5 = vld [vmem:[%s6695_s27 + $0x3cc] sm:$0xf0] }
 0x16b   : > { %v3294_v45 = vpop.f32.mrf.mxu0 }
 0x16c   : > { %v7167_v11 = vadd.f32 %v3292_v27, %v3124_v30 }
 0x16f   : > { %v2956_v39 = vpop.f32.mrf.mxu2 }
 0x170   : > { %v2957_v7 = vadd.f32 %v2956_v39, %v2788_v51  ;;  %v3125_v60 = vpop.f32.mrf.mxu3  ;;  %v2624_v51 = vadd.f32 %v7087_v13, %v6998_v3  ;;  %v4909_v39 = vld [vmem:[%s6695_s27 + $0x3b0] sm:$0xf]  ;;  %v2627_v3 = vadd.f32 %v7087_v13, %v7014_v37 }
 0x171   : > { %v2790_v31 = vpop.f32.mrf.mxu1 }
 0x172   : > { %v3126_v8 = vadd.f32 %v3125_v60, %v2957_v7  ;;  %v2791_v27 = vadd.f32 %v2790_v31, %v2622_v35  ;;  %v5998_v35 = vld [vmem:[%s6695_s27 + $0x3d0] sm:$0xf0]  ;;  %v4911_v60 = vld [vmem:[%s6695_s27 + $0x3d4] sm:$0xf0] }
 0x173   : > { %v3297_v41 = vpop.f32.mrf.mxu0  ;;  %v5994_v7 = vld [vmem:[%s6695_s27 + $0x3b4] sm:$0xf] }
 0x174   : > { %2829 = vmatmul.bf16.gmra.mxu1 %v4870_v25  ;;  %2998 = vmatmul.bf16.gmra.mxu2 %v4874_v47  ;;  %v7177_v30 = vadd.f32 %v3294_v45, %v3126_v8  ;;  %v4917_v25 = vld [vmem:[%s6695_s27 + $0x3b8] sm:$0xf]  ;;  %v5999_v47 = vld [vmem:[%s6695_s27 + $0x3d8] sm:$0xf0]  ;;  %v4906_v8 = vor.u32 %v5993_v59, %v4903_v5 }
 0x175   : > { %3167 = vmatmul.bf16.gmra.mxu3 %v4878_v29 }
 0x176   : > { %3336 = vmatmul.bf16.gmra.mxu0 %v4882_v49 }
 0x177   : > { %v2959_v61 = vpop.f32.mrf.mxu2 }
 0x178   : > { %v2960_v19 = vadd.f32 %v2959_v61, %v2791_v27  ;;  %v3128_v33 = vpop.f32.mrf.mxu3  ;;  %v4910_v27 = vor.u32 %v5998_v35, %v4909_v39 }
 0x179   : > { %v2792_v50 = vpop.f32.mrf.mxu1 }
 0x17a   : > { %v3129_v17 = vadd.f32 %v3128_v33, %v2960_v19  ;;  %v2793_v1 = vadd.f32 %v2792_v50, %v2624_v51  ;;  %v4914_v51 = vor.u32 %v5994_v7, %v4911_v60  ;;  %v4918_v19 = vor.u32 %v5999_v47, %v4917_v25  ;;  %v6002_v25 = vld [vmem:[%s6695_s27 + $0x3f4] sm:$0xf]  ;;  %v4939_v47 = vld [vmem:[%s6695_s27 + $0x414] sm:$0xf0] }
 0x17b   : > { %v3299_v10 = vpop.f32.mrf.mxu0 }
 0x17c   : > { %v7183_v45 = vadd.f32 %v3297_v41, %v3129_v17 }
 0x17f   : > { %v2961_v31 = vpop.f32.mrf.mxu2 }
 0x180   : > { %v2962_v29 = vadd.f32 %v2961_v31, %v2793_v1  ;;  %v3130_v49 = vpop.f32.mrf.mxu3  ;;  %v2629_v1 = vadd.f32 %v7087_v13, %v7022_v44  ;;  %v4945_v31 = vld [vmem:[%s6695_s27 + $0x3f8] sm:$0xf]  ;;  %v2632_v44 = vadd.f32 %v7087_v13, %v7038_v21 }
 0x181   : > { %v2795_v61 = vpop.f32.mrf.mxu1  ;;  %v6215_v21 = vld [vmem:[%s8008_s1 + $0x198] sm:$0xff] }
 0x182   : > { %v3131_v33 = vadd.f32 %v3130_v49, %v2962_v29  ;;  %v2796_v41 = vadd.f32 %v2795_v61, %v2627_v3  ;;  %v6007_v3 = vld [vmem:[%s6695_s27 + $0x418] sm:$0xf0]  ;;  %v4947_v49 = vld [vmem:[%s6695_s27 + $0x41c] sm:$0xf0]  ;;  %3610 = vmatpush.bf16.msra.mxu2 %v6215_v21 }
 0x183   : > { %v3302_v50 = vpop.f32.mrf.mxu0  ;;  %v6003_v29 = vld [vmem:[%s6695_s27 + $0x3fc] sm:$0xf] }
 0x184   : > { %2834 = vmatmul.bf16.gmra.mxu1 %v4906_v8  ;;  %3003 = vmatmul.bf16.gmra.mxu2 %v4910_v27  ;;  %v7193_v17 = vadd.f32 %v3299_v10, %v3131_v33  ;;  %v4953_v8 = vld [vmem:[%s6695_s27 + $0x400] sm:$0xf]  ;;  %v6008_v27 = vld [vmem:[%s6695_s27 + $0x420] sm:$0xf0]  ;;  %v4942_v33 = vor.u32 %v6002_v25, %v4939_v47 }
 0x185   : > { %3172 = vmatmul.bf16.gmra.mxu3 %v4914_v51 }
 0x186   : > { %3341 = vmatmul.bf16.gmra.mxu0 %v4918_v19 }
 0x187   : > { %v2964_v37 = vpop.f32.mrf.mxu2 }
 0x188   : > { %v2965_v59 = vadd.f32 %v2964_v37, %v2796_v41  ;;  %v3133_v5 = vpop.f32.mrf.mxu3  ;;  %v4946_v41 = vor.u32 %v6007_v3, %v4945_v31 }
 0x189   : > { %v2797_v39 = vpop.f32.mrf.mxu1 }
 0x18a   : > { %v3134_v35 = vadd.f32 %v3133_v5, %v2965_v59  ;;  %v2798_v7 = vadd.f32 %v2797_v39, %v2629_v1  ;;  %v4950_v1 = vor.u32 %v6003_v29, %v4947_v49  ;;  %v4954_v59 = vor.u32 %v6008_v27, %v4953_v8  ;;  %v6207_v27 = vld [vmem:[%s8008_s1 + $0x158] sm:$0xff] }
 0x18b   : > { %v3304_v60 = vpop.f32.mrf.mxu0  ;;  %3441 = vmatpush.bf16.msra.mxu1 %v6207_v27 }
 0x18c   : > { %v7199_v10 = vadd.f32 %v3302_v50, %v3134_v35 }
 0x18f   : > { %v2966_v61 = vpop.f32.mrf.mxu2 }
 0x190   : > { %v2967_v51 = vadd.f32 %v2966_v61, %v2798_v7  ;;  %v3135_v19 = vpop.f32.mrf.mxu3  ;;  %v6223_v7 = vld [vmem:[%s8008_s1 + $0x1d8] sm:$0xff] }
 0x191   : > { %v2800_v37 = vpop.f32.mrf.mxu1  ;;  %3779 = vmatpush.bf16.msra.mxu3 %v6223_v7  ;;  %v6231_v61 = vld [vmem:[%s8008_s1 + $0x218] sm:$0xff] }
 0x192   : > { %v3136_v5 = vadd.f32 %v3135_v19, %v2967_v51  ;;  %v2801_v50 = vadd.f32 %v2800_v37, %v2632_v44  ;;  %v6011_v44 = vld [vmem:[%s6695_s27 + $0x43c] sm:$0xf]  ;;  %3948 = vmatpush.bf16.msra.mxu0 %v6231_v61  ;;  %v4981_v19 = vld [vmem:[%s6695_s27 + $0x440] sm:$0xf]  ;;  %v4983_v37 = vld [vmem:[%s6695_s27 + $0x464] sm:$0xf0] }
 0x193   : > { %v3307_v39 = vpop.f32.mrf.mxu0 }
 0x194   : > { %2839 = vmatmul.bf16.gmra.mxu1 %v4942_v33  ;;  %3008 = vmatmul.bf16.gmra.mxu2 %v4946_v41  ;;  %v7209_v35 = vadd.f32 %v3304_v60, %v3136_v5  ;;  %v2634_v60 = vadd.f32 %v7087_v13, %v7052_v55  ;;  %v4975_v55 = vld [vmem:[%s6695_s27 + $0x45c] sm:$0xf0]  ;;  %v6016_v33 = vld [vmem:[%s6695_s27 + $0x460] sm:$0xf0] }
 0x195   : > { %3177 = vmatmul.bf16.gmra.mxu3 %v4950_v1  ;;  %v6012_v41 = vld [vmem:[%s6695_s27 + $0x444] sm:$0xf]  ;;  %v4989_v1 = vld [vmem:[%s6695_s27 + $0x448] sm:$0xf] }
 0x196   : > { %3346 = vmatmul.bf16.gmra.mxu0 %v4954_v59  ;;  %v6017_v59 = vld [vmem:[%s6695_s27 + $0x468] sm:$0xf0] }
 0x197   : > { %v2969_v25 = vpop.f32.mrf.mxu2 }
 0x198   : > { %v2970_v47 = vadd.f32 %v2969_v25, %v2801_v50  ;;  %v3138_v31 = vpop.f32.mrf.mxu3  ;;  %v2637_v50 = vadd.f32 %v7087_v13, %v7074_v53  ;;  %v4978_v25 = vor.u32 %v6011_v44, %v4975_v55 }
 0x199   : > { %v2802_v3 = vpop.f32.mrf.mxu1 }
 0x19a   : > { %v3139_v29 = vadd.f32 %v3138_v31, %v2970_v47  ;;  %v2803_v49 = vadd.f32 %v2802_v3, %v2634_v60  ;;  %v4982_v60 = vor.u32 %v6016_v33, %v4981_v19  ;;  %v4986_v31 = vor.u32 %v6012_v41, %v4983_v37 }
 0x19b   : > { %v3309_v8 = vpop.f32.mrf.mxu0  ;;  %v4990_v3 = vor.u32 %v6017_v59, %v4989_v1  ;;  %v6020_v1 = vld [vmem:[%s6695_s27 + $0x484] sm:$0xf]  ;;  %v5011_v59 = vld [vmem:[%s6695_s27 + $0x4a4] sm:$0xf0] }
 0x19c   : > { %v7227_v51 = vadd.f32 %v3307_v39, %v3139_v29 }
 0x19f   : > { %v2971_v5 = vpop.f32.mrf.mxu2 }
 0x1a0   : > { %v2972_v21 = vadd.f32 %v2971_v5, %v2803_v49  ;;  %v3140_v7 = vpop.f32.mrf.mxu3  ;;  %v2639_v49 = vadd.f32 %v7087_v13, %v7082_v12  ;;  %v5017_v5 = vld [vmem:[%s6695_s27 + $0x488] sm:$0xf]  ;;  %v2642_v12 = vadd.f32 %v7087_v13, %v6880_v22 }
 0x1a1   : > { %v2805_v47 = vpop.f32.mrf.mxu1 }
 0x1a2   : > { %v3141_v27 = vadd.f32 %v3140_v7, %v2972_v21  ;;  %v2806_v39 = vadd.f32 %v2805_v47, %v2637_v50  ;;  %v6025_v50 = vld [vmem:[%s6695_s27 + $0x4a8] sm:$0xf0]  ;;  %v5019_v7 = vld [vmem:[%s6695_s27 + $0x4ac] sm:$0xf0] }
 0x1a3   : > { %v3312_v29 = vpop.f32.mrf.mxu0  ;;  %v6021_v21 = vld [vmem:[%s6695_s27 + $0x48c] sm:$0xf] }
 0x1a4   : > { %2844 = vmatmul.bf16.gmra.mxu1 %v4978_v25  ;;  %3013 = vmatmul.bf16.gmra.mxu2 %v4982_v60  ;;  %v7237_v61 = vadd.f32 %v3309_v8, %v3141_v27  ;;  %v5025_v25 = vld [vmem:[%s6695_s27 + $0x490] sm:$0xf]  ;;  %v6026_v60 = vld [vmem:[%s6695_s27 + $0x4b0] sm:$0xf0]  ;;  %v5014_v27 = vor.u32 %v6020_v1, %v5011_v59 }
 0x1a5   : > { %3182 = vmatmul.bf16.gmra.mxu3 %v4986_v31 }
 0x1a6   : > { %3351 = vmatmul.bf16.gmra.mxu0 %v4990_v3 }
 0x1a7   : > { %v2974_v53 = vpop.f32.mrf.mxu2 }
 0x1a8   : > { %v2975_v44 = vadd.f32 %v2974_v53, %v2806_v39  ;;  %v3143_v55 = vpop.f32.mrf.mxu3  ;;  %v5018_v39 = vor.u32 %v6025_v50, %v5017_v5 }
 0x1a9   : > { %v2807_v19 = vpop.f32.mrf.mxu1 }
 0x1aa   : > { %v3144_v33 = vadd.f32 %v3143_v55, %v2975_v44  ;;  %v2808_v41 = vadd.f32 %v2807_v19, %v2639_v49  ;;  %v5022_v49 = vor.u32 %v6021_v21, %v5019_v7  ;;  %v5026_v44 = vor.u32 %v6026_v60, %v5025_v25  ;;  %v6029_v25 = vld [vmem:[%s6695_s27 + $0x4cc] sm:$0xf]  ;;  %v5047_v60 = vld [vmem:[%s6695_s27 + $0x4ec] sm:$0xf0] }
 0x1ab   : > { %v3314_v37 = vpop.f32.mrf.mxu0 }
 0x1ac   : > { %v7243_v8 = vadd.f32 %v3312_v29, %v3144_v33 }
 0x1af   : > { %v2976_v47 = vpop.f32.mrf.mxu2 }
 0x1b0   : > { %v2977_v31 = vadd.f32 %v2976_v47, %v2808_v41  ;;  %v3145_v3 = vpop.f32.mrf.mxu3  ;;  %v2644_v41 = vadd.f32 %v7087_v13, %v6888_v28  ;;  %v5053_v47 = vld [vmem:[%s6695_s27 + $0x4d0] sm:$0xf]  ;;  %v2647_v28 = vadd.f32 %v7087_v13, %v6904_v42 }
 0x1b1   : > { %v2810_v53 = vpop.f32.mrf.mxu1 }
 0x1b2   : > { %v3146_v55 = vadd.f32 %v3145_v3, %v2977_v31  ;;  %v2811_v29 = vadd.f32 %v2810_v53, %v2642_v12  ;;  %v6034_v12 = vld [vmem:[%s6695_s27 + $0x4f0] sm:$0xf0]  ;;  %v5055_v3 = vld [vmem:[%s6695_s27 + $0x4f4] sm:$0xf0] }
 0x1b3   : > { %v3317_v19 = vpop.f32.mrf.mxu0  ;;  %v6030_v31 = vld [vmem:[%s6695_s27 + $0x4d4] sm:$0xf] }
 0x1b4   : > { %2849 = vmatmul.bf16.gmra.mxu1 %v5014_v27  ;;  %3018 = vmatmul.bf16.gmra.mxu2 %v5018_v39  ;;  %v7253_v33 = vadd.f32 %v3314_v37, %v3146_v55  ;;  %v5061_v27 = vld [vmem:[%s6695_s27 + $0x4d8] sm:$0xf]  ;;  %v6035_v39 = vld [vmem:[%s6695_s27 + $0x4f8] sm:$0xf0]  ;;  %v5050_v55 = vor.u32 %v6029_v25, %v5047_v60 }
 0x1b5   : > { %3187 = vmatmul.bf16.gmra.mxu3 %v5022_v49 }
 0x1b6   : > { %3356 = vmatmul.bf16.gmra.mxu0 %v5026_v44 }
 0x1b7   : > { %v2979_v22 = vpop.f32.mrf.mxu2 }
 0x1b8   : > { %v2980_v1 = vadd.f32 %v2979_v22, %v2811_v29  ;;  %v3148_v59 = vpop.f32.mrf.mxu3  ;;  %v5054_v29 = vor.u32 %v6034_v12, %v5053_v47 }
 0x1b9   : > { %v2812_v5 = vpop.f32.mrf.mxu1 }
 0x1ba   : > { %v3149_v50 = vadd.f32 %v3148_v59, %v2980_v1  ;;  %v2813_v21 = vadd.f32 %v2812_v5, %v2644_v41  ;;  %v5058_v41 = vor.u32 %v6030_v31, %v5055_v3  ;;  %v5062_v1 = vor.u32 %v6035_v39, %v5061_v27  ;;  %v6038_v27 = vld [vmem:[%s6695_s27 + $0x514] sm:$0xf]  ;;  %v5083_v39 = vld [vmem:[%s6695_s27 + $0x534] sm:$0xf0] }
 0x1bb   : > { %v3319_v7 = vpop.f32.mrf.mxu0 }
 0x1bc   : > { %v7259_v37 = vadd.f32 %v3317_v19, %v3149_v50 }
 0x1bf   : > { %v2981_v53 = vpop.f32.mrf.mxu2 }
 0x1c0   : > { %v2982_v49 = vadd.f32 %v2981_v53, %v2813_v21  ;;  %v3150_v44 = vpop.f32.mrf.mxu3  ;;  %v2649_v21 = vadd.f32 %v7087_v13, %v6912_v48  ;;  %v5089_v53 = vld [vmem:[%s6695_s27 + $0x518] sm:$0xf]  ;;  %v2652_v48 = vadd.f32 %v7087_v13, %v6928_v62  ;;  %v6214_v62 = vld [vmem:[%s8008_s1 + $0x190] sm:$0xff] }
 0x1c1   : > { %v2815_v22 = vpop.f32.mrf.mxu1  ;;  %3611 = vmatpush.bf16.msra.mxu2 %v6214_v62 }
 0x1c2   : > { %v3151_v59 = vadd.f32 %v3150_v44, %v2982_v49  ;;  %v2816_v19 = vadd.f32 %v2815_v22, %v2647_v28  ;;  %v6043_v28 = vld [vmem:[%s6695_s27 + $0x538] sm:$0xf0]  ;;  %v5091_v44 = vld [vmem:[%s6695_s27 + $0x53c] sm:$0xf0] }
 0x1c3   : > { %v3322_v5 = vpop.f32.mrf.mxu0  ;;  %v6039_v49 = vld [vmem:[%s6695_s27 + $0x51c] sm:$0xf] }
 0x1c4   : > { %2854 = vmatmul.bf16.gmra.mxu1 %v5050_v55  ;;  %3023 = vmatmul.bf16.gmra.mxu2 %v5054_v29  ;;  %v7269_v50 = vadd.f32 %v3319_v7, %v3151_v59  ;;  %v5097_v55 = vld [vmem:[%s6695_s27 + $0x520] sm:$0xf]  ;;  %v6044_v29 = vld [vmem:[%s6695_s27 + $0x540] sm:$0xf0]  ;;  %v5086_v59 = vor.u32 %v6038_v27, %v5083_v39 }
 0x1c5   : > { %3192 = vmatmul.bf16.gmra.mxu3 %v5058_v41 }
 0x1c6   : > { %3361 = vmatmul.bf16.gmra.mxu0 %v5062_v1 }
 0x1c7   : > { %v2984_v42 = vpop.f32.mrf.mxu2 }
 0x1c8   : > { %v2985_v25 = vadd.f32 %v2984_v42, %v2816_v19  ;;  %v3153_v60 = vpop.f32.mrf.mxu3  ;;  %v5090_v19 = vor.u32 %v6043_v28, %v5089_v53 }
 0x1c9   : > { %v2817_v47 = vpop.f32.mrf.mxu1 }
 0x1ca   : > { %v3154_v12 = vadd.f32 %v3153_v60, %v2985_v25  ;;  %v2818_v31 = vadd.f32 %v2817_v47, %v2649_v21  ;;  %v5094_v21 = vor.u32 %v6039_v49, %v5091_v44  ;;  %v5098_v25 = vor.u32 %v6044_v29, %v5097_v55  ;;  %v6206_v29 = vld [vmem:[%s8008_s1 + $0x150] sm:$0xff] }
 0x1cb   : > { %v3324_v3 = vpop.f32.mrf.mxu0  ;;  %3442 = vmatpush.bf16.msra.mxu1 %v6206_v29 }
 0x1cc   : > { %v7275_v7 = vadd.f32 %v3322_v5, %v3154_v12 }
 0x1cf   : > { %v2986_v22 = vpop.f32.mrf.mxu2 }
 0x1d0   : > { %v2987_v41 = vadd.f32 %v2986_v22, %v2818_v31  ;;  %v3155_v1 = vpop.f32.mrf.mxu3  ;;  %v6222_v31 = vld [vmem:[%s8008_s1 + $0x1d0] sm:$0xff] }
 0x1d1   : > { %v2820_v42 = vpop.f32.mrf.mxu1  ;;  %3780 = vmatpush.bf16.msra.mxu3 %v6222_v31  ;;  %v6230_v22 = vld [vmem:[%s8008_s1 + $0x210] sm:$0xff] }
 0x1d2   : > { %v3156_v60 = vadd.f32 %v3155_v1, %v2987_v41  ;;  %v2821_v5 = vadd.f32 %v2820_v42, %v2652_v48  ;;  %v6047_v48 = vld [vmem:[%s6695_s27 + $0x55c] sm:$0xf]  ;;  %3949 = vmatpush.bf16.msra.mxu0 %v6230_v22  ;;  %v5125_v1 = vld [vmem:[%s6695_s27 + $0x560] sm:$0xf]  ;;  %v5127_v42 = vld [vmem:[%s6695_s27 + $0x584] sm:$0xf0] }
 0x1d3   : > { %v3327_v47 = vpop.f32.mrf.mxu0 }
 0x1d4   : > { %2859 = vmatmul.bf16.gmra.mxu1 %v5086_v59  ;;  %3028 = vmatmul.bf16.gmra.mxu2 %v5090_v19  ;;  %v7285_v12 = vadd.f32 %v3324_v3, %v3156_v60  ;;  %v2654_v3 = vadd.f32 %v7087_v13, %v6942_v6  ;;  %v5119_v6 = vld [vmem:[%s6695_s27 + $0x57c] sm:$0xf0]  ;;  %v6052_v59 = vld [vmem:[%s6695_s27 + $0x580] sm:$0xf0] }
 0x1d5   : > { %3197 = vmatmul.bf16.gmra.mxu3 %v5094_v21  ;;  %v6048_v19 = vld [vmem:[%s6695_s27 + $0x564] sm:$0xf]  ;;  %v5133_v21 = vld [vmem:[%s6695_s27 + $0x568] sm:$0xf] }
 0x1d6   : > { %3366 = vmatmul.bf16.gmra.mxu0 %v5098_v25  ;;  %v6053_v25 = vld [vmem:[%s6695_s27 + $0x588] sm:$0xf0] }
 0x1d7   : > { %v2989_v27 = vpop.f32.mrf.mxu2 }
 0x1d8   : > { %v2990_v39 = vadd.f32 %v2989_v27, %v2821_v5  ;;  %v3158_v53 = vpop.f32.mrf.mxu3  ;;  %v2657_v5 = vadd.f32 %v7087_v13, %v6964_v23  ;;  %v5122_v27 = vor.u32 %v6047_v48, %v5119_v6 }
 0x1d9   : > { %v2822_v28 = vpop.f32.mrf.mxu1 }
 0x1da   : > { %v3159_v49 = vadd.f32 %v3158_v53, %v2990_v39  ;;  %v2823_v44 = vadd.f32 %v2822_v28, %v2654_v3  ;;  %v5126_v3 = vor.u32 %v6052_v59, %v5125_v1  ;;  %v5130_v53 = vor.u32 %v6048_v19, %v5127_v42 }
 0x1db   : > { %v3329_v55 = vpop.f32.mrf.mxu0  ;;  %v5134_v28 = vor.u32 %v6053_v25, %v5133_v21  ;;  %v6056_v21 = vld [vmem:[%s6695_s27 + $0x5a4] sm:$0xf]  ;;  %v5155_v25 = vld [vmem:[%s6695_s27 + $0x5c4] sm:$0xf0] }
 0x1dc   : > { %v7303_v41 = vadd.f32 %v3327_v47, %v3159_v49 }
 0x1df   : > { %v2991_v60 = vpop.f32.mrf.mxu2 }
 0x1e0   : > { %v2992_v62 = vadd.f32 %v2991_v60, %v2823_v44  ;;  %v3160_v31 = vpop.f32.mrf.mxu3  ;;  %v2659_v44 = vadd.f32 %v7087_v13, %v6972_v34  ;;  %v5161_v60 = vld [vmem:[%s6695_s27 + $0x5a8] sm:$0xf]  ;;  %v2662_v34 = vadd.f32 %v7087_v13, %v6988_v56 }
 0x1e1   : > { %v2825_v39 = vpop.f32.mrf.mxu1 }
 0x1e2   : > { %v3161_v29 = vadd.f32 %v3160_v31, %v2992_v62  ;;  %v2826_v47 = vadd.f32 %v2825_v39, %v2657_v5  ;;  %v6061_v5 = vld [vmem:[%s6695_s27 + $0x5c8] sm:$0xf0]  ;;  %v5163_v31 = vld [vmem:[%s6695_s27 + $0x5cc] sm:$0xf0] }
 0x1e3   : > { %v3332_v49 = vpop.f32.mrf.mxu0  ;;  %v6057_v62 = vld [vmem:[%s6695_s27 + $0x5ac] sm:$0xf] }
 0x1e4   : > { %2864 = vmatmul.bf16.gmra.mxu1 %v5122_v27  ;;  %3033 = vmatmul.bf16.gmra.mxu2 %v5126_v3  ;;  %v7313_v22 = vadd.f32 %v3329_v55, %v3161_v29  ;;  %v5169_v27 = vld [vmem:[%s6695_s27 + $0x5b0] sm:$0xf]  ;;  %v6062_v3 = vld [vmem:[%s6695_s27 + $0x5d0] sm:$0xf0]  ;;  %v5158_v29 = vor.u32 %v6056_v21, %v5155_v25 }
 0x1e5   : > { %3202 = vmatmul.bf16.gmra.mxu3 %v5130_v53 }
 0x1e6   : > { %3371 = vmatmul.bf16.gmra.mxu0 %v5134_v28 }
 0x1e7   : > { %v2994_v23 = vpop.f32.mrf.mxu2 }
 0x1e8   : > { %v2995_v48 = vadd.f32 %v2994_v23, %v2826_v47  ;;  %v3163_v6 = vpop.f32.mrf.mxu3  ;;  %v5162_v47 = vor.u32 %v6061_v5, %v5161_v60 }
 0x1e9   : > { %v2827_v1 = vpop.f32.mrf.mxu1 }
 0x1ea   : > { %v3164_v59 = vadd.f32 %v3163_v6, %v2995_v48  ;;  %v2828_v19 = vadd.f32 %v2827_v1, %v2659_v44  ;;  %v5166_v44 = vor.u32 %v6057_v62, %v5163_v31  ;;  %v5170_v48 = vor.u32 %v6062_v3, %v5169_v27  ;;  %v6065_v27 = vld [vmem:[%s6695_s27 + $0x5ec] sm:$0xf]  ;;  %v5191_v3 = vld [vmem:[%s6695_s27 + $0x60c] sm:$0xf0] }
 0x1eb   : > { %v3334_v42 = vpop.f32.mrf.mxu0 }
 0x1ec   : > { %v7319_v55 = vadd.f32 %v3332_v49, %v3164_v59 }
 0x1ef   : > { %v2996_v39 = vpop.f32.mrf.mxu2 }
 0x1f0   : > { %v2997_v53 = vadd.f32 %v2996_v39, %v2828_v19  ;;  %v3165_v28 = vpop.f32.mrf.mxu3  ;;  %v2664_v19 = vadd.f32 %v7087_v13, %v6996_v2  ;;  %v5197_v39 = vld [vmem:[%s6695_s27 + $0x5f0] sm:$0xf]  ;;  %v2667_v2 = vadd.f32 %v7087_v13, %v7012_v24 }
 0x1f1   : > { %v2830_v23 = vpop.f32.mrf.mxu1 }
 0x1f2   : > { %v3166_v6 = vadd.f32 %v3165_v28, %v2997_v53  ;;  %v2831_v49 = vadd.f32 %v2830_v23, %v2662_v34  ;;  %v6070_v34 = vld [vmem:[%s6695_s27 + $0x610] sm:$0xf0]  ;;  %v5199_v28 = vld [vmem:[%s6695_s27 + $0x614] sm:$0xf0] }
 0x1f3   : > { %v3337_v1 = vpop.f32.mrf.mxu0  ;;  %v6066_v53 = vld [vmem:[%s6695_s27 + $0x5f4] sm:$0xf] }
 0x1f4   : > { %2869 = vmatmul.bf16.gmra.mxu1 %v5158_v29  ;;  %3038 = vmatmul.bf16.gmra.mxu2 %v5162_v47  ;;  %v7329_v59 = vadd.f32 %v3334_v42, %v3166_v6  ;;  %v5205_v29 = vld [vmem:[%s6695_s27 + $0x5f8] sm:$0xf]  ;;  %v6071_v47 = vld [vmem:[%s6695_s27 + $0x618] sm:$0xf0]  ;;  %v5194_v6 = vor.u32 %v6065_v27, %v5191_v3 }
 0x1f5   : > { %3207 = vmatmul.bf16.gmra.mxu3 %v5166_v44 }
 0x1f6   : > { %3376 = vmatmul.bf16.gmra.mxu0 %v5170_v48 }
 0x1f7   : > { %v2999_v56 = vpop.f32.mrf.mxu2 }
 0x1f8   : > { %v3000_v21 = vadd.f32 %v2999_v56, %v2831_v49  ;;  %v3168_v25 = vpop.f32.mrf.mxu3  ;;  %v5198_v49 = vor.u32 %v6070_v34, %v5197_v39 }
 0x1f9   : > { %v2832_v60 = vpop.f32.mrf.mxu1 }
 0x1fa   : > { %v3169_v5 = vadd.f32 %v3168_v25, %v3000_v21  ;;  %v2833_v62 = vadd.f32 %v2832_v60, %v2664_v19  ;;  %v5202_v19 = vor.u32 %v6066_v53, %v5199_v28  ;;  %v5206_v21 = vor.u32 %v6071_v47, %v5205_v29  ;;  %v6074_v29 = vld [vmem:[%s6695_s27 + $0x634] sm:$0xf]  ;;  %v5227_v47 = vld [vmem:[%s6695_s27 + $0x654] sm:$0xf0] }
 0x1fb   : > { %v3339_v31 = vpop.f32.mrf.mxu0 }
 0x1fc   : > { %v7335_v42 = vadd.f32 %v3337_v1, %v3169_v5 }
 0x1ff   : > { %v3001_v23 = vpop.f32.mrf.mxu2 }
 0x200   : > { %v3002_v44 = vadd.f32 %v3001_v23, %v2833_v62  ;;  %v3170_v48 = vpop.f32.mrf.mxu3  ;;  %v2669_v62 = vadd.f32 %v7087_v13, %v7020_v43  ;;  %v5233_v23 = vld [vmem:[%s6695_s27 + $0x638] sm:$0xf]  ;;  %v2672_v43 = vadd.f32 %v7087_v13, %v7036_v14  ;;  %v6213_v14 = vld [vmem:[%s8008_s1 + $0x188] sm:$0xff] }
 0x201   : > { %v2835_v56 = vpop.f32.mrf.mxu1  ;;  %v6221_v13 = vld [vmem:[%s8008_s1 + $0x1c8] sm:$0xff]  ;;  %3612 = vmatpush.bf16.msra.mxu2 %v6213_v14 }
 0x202   : > { %v3171_v25 = vadd.f32 %v3170_v48, %v3002_v44  ;;  %v2836_v1 = vadd.f32 %v2835_v56, %v2667_v2  ;;  %v6079_v2 = vld [vmem:[%s6695_s27 + $0x658] sm:$0xf0]  ;;  %v5235_v48 = vld [vmem:[%s6695_s27 + $0x65c] sm:$0xf0]  ;;  %3781 = vmatpush.bf16.msra.mxu3 %v6221_v13 }
 0x203   : > { %v3342_v60 = vpop.f32.mrf.mxu0  ;;  %v6075_v44 = vld [vmem:[%s6695_s27 + $0x63c] sm:$0xf] }
 0x204   : > { %2874 = vmatmul.bf16.gmra.mxu1 %v5194_v6  ;;  %3043 = vmatmul.bf16.gmra.mxu2 %v5198_v49  ;;  %v7345_v5 = vadd.f32 %v3339_v31, %v3171_v25  ;;  %v5241_v6 = vld [vmem:[%s6695_s27 + $0x640] sm:$0xf]  ;;  %v6080_v49 = vld [vmem:[%s6695_s27 + $0x660] sm:$0xf0]  ;;  %v5230_v25 = vor.u32 %v6074_v29, %v5227_v47 }
 0x205   : > { %3212 = vmatmul.bf16.gmra.mxu3 %v5202_v19 }
 0x206   : > { %3381 = vmatmul.bf16.gmra.mxu0 %v5206_v21 }
 0x207   : > { %v3004_v24 = vpop.f32.mrf.mxu2 }
 0x208   : > { %v3005_v27 = vadd.f32 %v3004_v24, %v2836_v1  ;;  %v3173_v3 = vpop.f32.mrf.mxu3  ;;  %v5234_v1 = vor.u32 %v6079_v2, %v5233_v23 }
 0x209   : > { %v2837_v39 = vpop.f32.mrf.mxu1 }
 0x20a   : > { %v3174_v34 = vadd.f32 %v3173_v3, %v3005_v27  ;;  %v2838_v53 = vadd.f32 %v2837_v39, %v2669_v62  ;;  %v5238_v62 = vor.u32 %v6075_v44, %v5235_v48  ;;  %v5242_v27 = vor.u32 %v6080_v49, %v5241_v6  ;;  %v6205_v49 = vld [vmem:[%s8008_s1 + $0x148] sm:$0xff] }
 0x20b   : > { %v3344_v28 = vpop.f32.mrf.mxu0  ;;  %3443 = vmatpush.bf16.msra.mxu1 %v6205_v49 }
 0x20c   : > { %v7351_v31 = vadd.f32 %v3342_v60, %v3174_v34 }
 0x20f   : > { %v3006_v56 = vpop.f32.mrf.mxu2 }
 0x210   : > { %v3007_v19 = vadd.f32 %v3006_v56, %v2838_v53  ;;  %v3175_v21 = vpop.f32.mrf.mxu3  ;;  %v6229_v56 = vld [vmem:[%s8008_s1 + $0x208] sm:$0xff] }
 0x211   : > { %v2840_v24 = vpop.f32.mrf.mxu1  ;;  %3950 = vmatpush.bf16.msra.mxu0 %v6229_v56 }
 0x212   : > { %v3176_v3 = vadd.f32 %v3175_v21, %v3007_v19  ;;  %v2841_v60 = vadd.f32 %v2840_v24, %v2672_v43  ;;  %v6083_v43 = vld [vmem:[%s6695_s27 + $0x67c] sm:$0xf]  ;;  %v5269_v21 = vld [vmem:[%s6695_s27 + $0x680] sm:$0xf]  ;;  %v5271_v24 = vld [vmem:[%s6695_s27 + $0x6a4] sm:$0xf0] }
 0x213   : > { %v3347_v39 = vpop.f32.mrf.mxu0 }
 0x214   : > { %2879 = vmatmul.bf16.gmra.mxu1 %v5230_v25  ;;  %3048 = vmatmul.bf16.gmra.mxu2 %v5234_v1  ;;  %v7361_v34 = vadd.f32 %v3344_v28, %v3176_v3  ;;  %v7372_v28 = vld [vmem:[%s8009_s2] ss:$0 sm:$0xff]  ;;  %v6088_v25 = vld [vmem:[%s6695_s27 + $0x6a0] sm:$0xf0] }
 0x215   : > { %3217 = vmatmul.bf16.gmra.mxu3 %v5238_v62  ;;  %v2674_v29 = vadd.f32 %v7372_v28, %v7050_v54  ;;  %v5263_v54 = vld [vmem:[%s6695_s27 + $0x69c] sm:$0xf0]  ;;  %v6084_v1 = vld [vmem:[%s6695_s27 + $0x684] sm:$0xf]  ;;  %v5277_v62 = vld [vmem:[%s6695_s27 + $0x688] sm:$0xf] }
 0x216   : > { %3386 = vmatmul.bf16.gmra.mxu0 %v5242_v27  ;;  %v6089_v27 = vld [vmem:[%s6695_s27 + $0x6a8] sm:$0xf0] }
 0x217   : > { %v3009_v53 = vpop.f32.mrf.mxu2 }
 0x218   : > { %v3010_v47 = vadd.f32 %v3009_v53, %v2841_v60  ;;  %v3178_v23 = vpop.f32.mrf.mxu3  ;;  %v2677_v60 = vadd.f32 %v7372_v28, %v7072_v0  ;;  %v5266_v53 = vor.u32 %v6083_v43, %v5263_v54 }
 0x219   : > { %v2842_v2 = vpop.f32.mrf.mxu1 }
 0x21a   : > { %v3179_v44 = vadd.f32 %v3178_v23, %v3010_v47  ;;  %v2843_v48 = vadd.f32 %v2842_v2, %v2674_v29  ;;  %v5270_v29 = vor.u32 %v6088_v25, %v5269_v21  ;;  %v5274_v23 = vor.u32 %v6084_v1, %v5271_v24 }
 0x21b   : > { %v3349_v6 = vpop.f32.mrf.mxu0  ;;  %v5278_v2 = vor.u32 %v6089_v27, %v5277_v62  ;;  %v6092_v62 = vld [vmem:[%s6695_s27 + $0x6c4] sm:$0xf]  ;;  %v5299_v27 = vld [vmem:[%s6695_s27 + $0x6e4] sm:$0xf0] }
 0x21c   : > { %v7384_v19 = vadd.f32 %v3347_v39, %v3179_v44 }
 0x21f   : > { %v3011_v3 = vpop.f32.mrf.mxu2 }
 0x220   : > { %v3012_v14 = vadd.f32 %v3011_v3, %v2843_v48  ;;  %v3180_v13 = vpop.f32.mrf.mxu3  ;;  %v2679_v48 = vadd.f32 %v7372_v28, %v7080_v9  ;;  %v5305_v3 = vld [vmem:[%s6695_s27 + $0x6c8] sm:$0xf]  ;;  %v2682_v9 = vadd.f32 %v7372_v28, %v6884_v26 }
 0x221   : > { %v2845_v47 = vpop.f32.mrf.mxu1 }
 0x222   : > { %v3181_v49 = vadd.f32 %v3180_v13, %v3012_v14  ;;  %v2846_v39 = vadd.f32 %v2845_v47, %v2677_v60  ;;  %v6097_v60 = vld [vmem:[%s6695_s27 + $0x6e8] sm:$0xf0]  ;;  %v5307_v13 = vld [vmem:[%s6695_s27 + $0x6ec] sm:$0xf0] }
 0x223   : > { %v3352_v44 = vpop.f32.mrf.mxu0  ;;  %v6093_v14 = vld [vmem:[%s6695_s27 + $0x6cc] sm:$0xf] }
 0x224   : > { %2884 = vmatmul.bf16.gmra.mxu1 %v5266_v53  ;;  %3053 = vmatmul.bf16.gmra.mxu2 %v5270_v29  ;;  %v7394_v56 = vadd.f32 %v3349_v6, %v3181_v49  ;;  %v5313_v53 = vld [vmem:[%s6695_s27 + $0x6d0] sm:$0xf]  ;;  %v6098_v29 = vld [vmem:[%s6695_s27 + $0x6f0] sm:$0xf0]  ;;  %v5302_v49 = vor.u32 %v6092_v62, %v5299_v27 }
 0x225   : > { %3222 = vmatmul.bf16.gmra.mxu3 %v5274_v23 }
 0x226   : > { %3391 = vmatmul.bf16.gmra.mxu0 %v5278_v2 }
 0x227   : > { %v3014_v0 = vpop.f32.mrf.mxu2 }
 0x228   : > { %v3015_v43 = vadd.f32 %v3014_v0, %v2846_v39  ;;  %v3183_v54 = vpop.f32.mrf.mxu3  ;;  %v5306_v39 = vor.u32 %v6097_v60, %v5305_v3 }
 0x229   : > { %v2847_v21 = vpop.f32.mrf.mxu1 }
 0x22a   : > { %v3184_v25 = vadd.f32 %v3183_v54, %v3015_v43  ;;  %v2848_v1 = vadd.f32 %v2847_v21, %v2679_v48  ;;  %v5310_v48 = vor.u32 %v6093_v14, %v5307_v13  ;;  %v5314_v43 = vor.u32 %v6098_v29, %v5313_v53  ;;  %v6101_v53 = vld [vmem:[%s6695_s27 + $0x70c] sm:$0xf]  ;;  %v5335_v29 = vld [vmem:[%s6695_s27 + $0x72c] sm:$0xf0] }
 0x22b   : > { %v3354_v24 = vpop.f32.mrf.mxu0 }
 0x22c   : > { %v7400_v6 = vadd.f32 %v3352_v44, %v3184_v25 }
 0x22f   : > { %v3016_v47 = vpop.f32.mrf.mxu2 }
 0x230   : > { %v3017_v23 = vadd.f32 %v3016_v47, %v2848_v1  ;;  %v3185_v2 = vpop.f32.mrf.mxu3  ;;  %v2684_v1 = vadd.f32 %v7372_v28, %v6900_v38  ;;  %v5341_v47 = vld [vmem:[%s6695_s27 + $0x710] sm:$0xf]  ;;  %v2687_v38 = vadd.f32 %v7372_v28, %v6908_v46 }
 0x231   : > { %v2850_v0 = vpop.f32.mrf.mxu1 }
 0x232   : > { %v3186_v54 = vadd.f32 %v3185_v2, %v3017_v23  ;;  %v2851_v44 = vadd.f32 %v2850_v0, %v2682_v9  ;;  %v6106_v9 = vld [vmem:[%s6695_s27 + $0x730] sm:$0xf0]  ;;  %v5343_v2 = vld [vmem:[%s6695_s27 + $0x734] sm:$0xf0] }
 0x233   : > { %v3357_v21 = vpop.f32.mrf.mxu0  ;;  %v6102_v23 = vld [vmem:[%s6695_s27 + $0x714] sm:$0xf] }
 0x234   : > { %2889 = vmatmul.bf16.gmra.mxu1 %v5302_v49  ;;  %3058 = vmatmul.bf16.gmra.mxu2 %v5306_v39  ;;  %v7410_v25 = vadd.f32 %v3354_v24, %v3186_v54  ;;  %v5349_v49 = vld [vmem:[%s6695_s27 + $0x718] sm:$0xf]  ;;  %v6107_v39 = vld [vmem:[%s6695_s27 + $0x738] sm:$0xf0]  ;;  %v5338_v54 = vor.u32 %v6101_v53, %v5335_v29 }
 0x235   : > { %3227 = vmatmul.bf16.gmra.mxu3 %v5310_v48 }
 0x236   : > { %3396 = vmatmul.bf16.gmra.mxu0 %v5314_v43 }
 0x237   : > { %v3019_v26 = vpop.f32.mrf.mxu2 }
 0x238   : > { %v3020_v62 = vadd.f32 %v3019_v26, %v2851_v44  ;;  %v3188_v27 = vpop.f32.mrf.mxu3  ;;  %v5342_v44 = vor.u32 %v6106_v9, %v5341_v47 }
 0x239   : > { %v2852_v3 = vpop.f32.mrf.mxu1 }
 0x23a   : > { %v3189_v60 = vadd.f32 %v3188_v27, %v3020_v62  ;;  %v2853_v14 = vadd.f32 %v2852_v3, %v2684_v1  ;;  %v5346_v1 = vor.u32 %v6102_v23, %v5343_v2  ;;  %v5350_v62 = vor.u32 %v6107_v39, %v5349_v49  ;;  %v6110_v49 = vld [vmem:[%s6695_s27 + $0x754] sm:$0xf]  ;;  %v5371_v39 = vld [vmem:[%s6695_s27 + $0x774] sm:$0xf0] }
 0x23b   : > { %v3359_v13 = vpop.f32.mrf.mxu0 }
 0x23c   : > { %v7416_v24 = vadd.f32 %v3357_v21, %v3189_v60 }
 0x23f   : > { %v3021_v0 = vpop.f32.mrf.mxu2 }
 0x240   : > { %v3022_v48 = vadd.f32 %v3021_v0, %v2853_v14  ;;  %v3190_v43 = vpop.f32.mrf.mxu3  ;;  %v2689_v14 = vadd.f32 %v7372_v28, %v6924_v58  ;;  %v5377_v0 = vld [vmem:[%s6695_s27 + $0x758] sm:$0xf]  ;;  %v2692_v58 = vadd.f32 %v7372_v28, %v6938_v4  ;;  %v6212_v4 = vld [vmem:[%s8008_s1 + $0x180] sm:$0xff] }
 0x241   : > { %v2855_v26 = vpop.f32.mrf.mxu1  ;;  %3613 = vmatpush.bf16.msra.mxu2 %v6212_v4 }
 0x242   : > { %v3191_v27 = vadd.f32 %v3190_v43, %v3022_v48  ;;  %v2856_v21 = vadd.f32 %v2855_v26, %v2687_v38  ;;  %v6115_v38 = vld [vmem:[%s6695_s27 + $0x778] sm:$0xf0]  ;;  %v5379_v43 = vld [vmem:[%s6695_s27 + $0x77c] sm:$0xf0] }
 0x243   : > { %v3362_v3 = vpop.f32.mrf.mxu0  ;;  %v6111_v48 = vld [vmem:[%s6695_s27 + $0x75c] sm:$0xf] }
 0x244   : > { %2894 = vmatmul.bf16.gmra.mxu1 %v5338_v54  ;;  %3063 = vmatmul.bf16.gmra.mxu2 %v5342_v44  ;;  %v7426_v60 = vadd.f32 %v3359_v13, %v3191_v27  ;;  %v5385_v54 = vld [vmem:[%s6695_s27 + $0x760] sm:$0xf]  ;;  %v6116_v44 = vld [vmem:[%s6695_s27 + $0x780] sm:$0xf0]  ;;  %v5374_v27 = vor.u32 %v6110_v49, %v5371_v39 }
 0x245   : > { %3232 = vmatmul.bf16.gmra.mxu3 %v5346_v1 }
 0x246   : > { %3401 = vmatmul.bf16.gmra.mxu0 %v5350_v62 }
 0x247   : > { %v3024_v46 = vpop.f32.mrf.mxu2 }
 0x248   : > { %v3025_v53 = vadd.f32 %v3024_v46, %v2856_v21  ;;  %v3193_v29 = vpop.f32.mrf.mxu3  ;;  %v5378_v21 = vor.u32 %v6115_v38, %v5377_v0 }
 0x249   : > { %v2857_v47 = vpop.f32.mrf.mxu1 }
 0x24a   : > { %v3194_v9 = vadd.f32 %v3193_v29, %v3025_v53  ;;  %v2858_v23 = vadd.f32 %v2857_v47, %v2689_v14  ;;  %v5382_v14 = vor.u32 %v6111_v48, %v5379_v43  ;;  %v5386_v53 = vor.u32 %v6116_v44, %v5385_v54  ;;  %v6204_v44 = vld [vmem:[%s8008_s1 + $0x140] sm:$0xff] }
 0x24b   : > { %v3364_v2 = vpop.f32.mrf.mxu0  ;;  %3444 = vmatpush.bf16.msra.mxu1 %v6204_v44 }
 0x24c   : > { %v7432_v13 = vadd.f32 %v3362_v3, %v3194_v9 }
 0x24f   : > { %v3026_v26 = vpop.f32.mrf.mxu2 }
 0x250   : > { %v3027_v1 = vadd.f32 %v3026_v26, %v2858_v23  ;;  %v3195_v62 = vpop.f32.mrf.mxu3  ;;  %v6220_v23 = vld [vmem:[%s8008_s1 + $0x1c0] sm:$0xff] }
 0x251   : > { %v2860_v46 = vpop.f32.mrf.mxu1  ;;  %3782 = vmatpush.bf16.msra.mxu3 %v6220_v23  ;;  %v6228_v26 = vld [vmem:[%s8008_s1 + $0x200] sm:$0xff] }
 0x252   : > { %v3196_v29 = vadd.f32 %v3195_v62, %v3027_v1  ;;  %v2861_v3 = vadd.f32 %v2860_v46, %v2692_v58  ;;  %v6119_v58 = vld [vmem:[%s6695_s27 + $0x79c] sm:$0xf]  ;;  %3951 = vmatpush.bf16.msra.mxu0 %v6228_v26  ;;  %v5413_v62 = vld [vmem:[%s6695_s27 + $0x7a0] sm:$0xf]  ;;  %v5415_v46 = vld [vmem:[%s6695_s27 + $0x7c4] sm:$0xf0] }
 0x253   : > { %v3367_v47 = vpop.f32.mrf.mxu0 }
 0x254   : > { %2899 = vmatmul.bf16.gmra.mxu1 %v5374_v27  ;;  %3068 = vmatmul.bf16.gmra.mxu2 %v5378_v21  ;;  %v7442_v9 = vadd.f32 %v3364_v2, %v3196_v29  ;;  %v2694_v2 = vadd.f32 %v7372_v28, %v6960_v18  ;;  %v5407_v18 = vld [vmem:[%s6695_s27 + $0x7bc] sm:$0xf0]  ;;  %v6124_v27 = vld [vmem:[%s6695_s27 + $0x7c0] sm:$0xf0] }
 0x255   : > { %3237 = vmatmul.bf16.gmra.mxu3 %v5382_v14  ;;  %v6120_v21 = vld [vmem:[%s6695_s27 + $0x7a4] sm:$0xf]  ;;  %v5421_v14 = vld [vmem:[%s6695_s27 + $0x7a8] sm:$0xf] }
 0x256   : > { %3406 = vmatmul.bf16.gmra.mxu0 %v5386_v53  ;;  %v6125_v53 = vld [vmem:[%s6695_s27 + $0x7c8] sm:$0xf0] }
 0x257   : > { %v3029_v49 = vpop.f32.mrf.mxu2 }
 0x258   : > { %v3030_v39 = vadd.f32 %v3029_v49, %v2861_v3  ;;  %v3198_v0 = vpop.f32.mrf.mxu3  ;;  %v2697_v3 = vadd.f32 %v7372_v28, %v6968_v32  ;;  %v5410_v49 = vor.u32 %v6119_v58, %v5407_v18 }
 0x259   : > { %v2862_v38 = vpop.f32.mrf.mxu1 }
 0x25a   : > { %v3199_v48 = vadd.f32 %v3198_v0, %v3030_v39  ;;  %v2863_v43 = vadd.f32 %v2862_v38, %v2694_v2  ;;  %v5414_v2 = vor.u32 %v6124_v27, %v5413_v62  ;;  %v5418_v0 = vor.u32 %v6120_v21, %v5415_v46 }
 0x25b   : > { %v3369_v54 = vpop.f32.mrf.mxu0  ;;  %v5422_v38 = vor.u32 %v6125_v53, %v5421_v14  ;;  %v6128_v14 = vld [vmem:[%s6695_s27 + $0x7e4] sm:$0xf]  ;;  %v5443_v53 = vld [vmem:[%s6695_s27 + $0x804] sm:$0xf0] }
 0x25c   : > { %v7460_v1 = vadd.f32 %v3367_v47, %v3199_v48 }
 0x25f   : > { %v3031_v29 = vpop.f32.mrf.mxu2 }
 0x260   : > { %v3032_v4 = vadd.f32 %v3031_v29, %v2863_v43  ;;  %v3200_v23 = vpop.f32.mrf.mxu3  ;;  %v2699_v43 = vadd.f32 %v7372_v28, %v6984_v52  ;;  %v5449_v29 = vld [vmem:[%s6695_s27 + $0x7e8] sm:$0xf]  ;;  %v2702_v52 = vadd.f32 %v7372_v28, %v6992_v63 }
 0x261   : > { %v2865_v39 = vpop.f32.mrf.mxu1 }
 0x262   : > { %v3201_v44 = vadd.f32 %v3200_v23, %v3032_v4  ;;  %v2866_v47 = vadd.f32 %v2865_v39, %v2697_v3  ;;  %v6133_v3 = vld [vmem:[%s6695_s27 + $0x808] sm:$0xf0]  ;;  %v5451_v23 = vld [vmem:[%s6695_s27 + $0x80c] sm:$0xf0] }
 0x263   : > { %v3372_v48 = vpop.f32.mrf.mxu0  ;;  %v6129_v4 = vld [vmem:[%s6695_s27 + $0x7ec] sm:$0xf] }
 0x264   : > { %2904 = vmatmul.bf16.gmra.mxu1 %v5410_v49  ;;  %3073 = vmatmul.bf16.gmra.mxu2 %v5414_v2  ;;  %v7470_v26 = vadd.f32 %v3369_v54, %v3201_v44  ;;  %v5457_v49 = vld [vmem:[%s6695_s27 + $0x7f0] sm:$0xf]  ;;  %v6134_v2 = vld [vmem:[%s6695_s27 + $0x810] sm:$0xf0]  ;;  %v5446_v44 = vor.u32 %v6128_v14, %v5443_v53 }
 0x265   : > { %3242 = vmatmul.bf16.gmra.mxu3 %v5418_v0 }
 0x266   : > { %3411 = vmatmul.bf16.gmra.mxu0 %v5422_v38 }
 0x267   : > { %v3034_v32 = vpop.f32.mrf.mxu2 }
 0x268   : > { %v3035_v58 = vadd.f32 %v3034_v32, %v2866_v47  ;;  %v3203_v18 = vpop.f32.mrf.mxu3  ;;  %v5450_v47 = vor.u32 %v6133_v3, %v5449_v29 }
 0x269   : > { %v2867_v62 = vpop.f32.mrf.mxu1 }
 0x26a   : > { %v3204_v27 = vadd.f32 %v3203_v18, %v3035_v58  ;;  %v2868_v21 = vadd.f32 %v2867_v62, %v2699_v43  ;;  %v5454_v43 = vor.u32 %v6129_v4, %v5451_v23  ;;  %v5458_v58 = vor.u32 %v6134_v2, %v5457_v49  ;;  %v6137_v49 = vld [vmem:[%s6695_s27 + $0x82c] sm:$0xf]  ;;  %v5479_v2 = vld [vmem:[%s6695_s27 + $0x84c] sm:$0xf0] }
 0x26b   : > { %v3374_v46 = vpop.f32.mrf.mxu0 }
 0x26c   : > { %v7476_v54 = vadd.f32 %v3372_v48, %v3204_v27 }
 0x26f   : > { %v3036_v39 = vpop.f32.mrf.mxu2 }
 0x270   : > { %v3037_v0 = vadd.f32 %v3036_v39, %v2868_v21  ;;  %v3205_v38 = vpop.f32.mrf.mxu3  ;;  %v2704_v21 = vadd.f32 %v7372_v28, %v7008_v16  ;;  %v5485_v39 = vld [vmem:[%s6695_s27 + $0x830] sm:$0xf] }
 0x271   : > { %v2870_v32 = vpop.f32.mrf.mxu1 }
 0x272   : > { %v3206_v18 = vadd.f32 %v3205_v38, %v3037_v0  ;;  %v2871_v48 = vadd.f32 %v2870_v32, %v2702_v52  ;;  %v6142_v52 = vld [vmem:[%s6695_s27 + $0x850] sm:$0xf0]  ;;  %v5487_v38 = vld [vmem:[%s6695_s27 + $0x854] sm:$0xf0] }
 0x273   : > { %v3377_v62 = vpop.f32.mrf.mxu0  ;;  %v6138_v0 = vld [vmem:[%s6695_s27 + $0x834] sm:$0xf] }
 0x274   : > { %2909 = vmatmul.bf16.gmra.mxu1 %v5446_v44  ;;  %3078 = vmatmul.bf16.gmra.mxu2 %v5450_v47  ;;  %v7486_v27 = vadd.f32 %v3374_v46, %v3206_v18  ;;  %v5493_v44 = vld [vmem:[%s6695_s27 + $0x838] sm:$0xf]  ;;  %v6143_v47 = vld [vmem:[%s6695_s27 + $0x858] sm:$0xf0] }
 0x275   : > { %3247 = vmatmul.bf16.gmra.mxu3 %v5454_v43  ;;  %v8038_v43 = vld [vmem:[#allocation15_spill] sm:$0xff] }
 0x276   : > { %8036 = vst [vmem:[#allocation28_spill] sm:$0xff] %v7486_v27  ;;  %3416 = vmatmul.bf16.gmra.mxu0 %v5458_v58  ;;  %v2707_v16 = vadd.f32 %v7372_v28, %v8038_v43  ;;  %v5515_v43 = vld [vmem:[%s6695_s27 + $0x894] sm:$0xf0] }
 0x277   : > { %v3039_v63 = vpop.f32.mrf.mxu2 }
 0x278   : > { %v3040_v14 = vadd.f32 %v3039_v63, %v2871_v48  ;;  %v3208_v53 = vpop.f32.mrf.mxu3  ;;  %v5482_v48 = vor.u32 %v6137_v49, %v5479_v2  ;;  %v5486_v63 = vor.u32 %v6142_v52, %v5485_v39  ;;  %v8040_v49 = vld [vmem:[#allocation17_spill] sm:$0xff] }
 0x279   : > { %v2872_v29 = vpop.f32.mrf.mxu1  ;;  %v2709_v2 = vadd.f32 %v7372_v28, %v8040_v49 }
 0x27a   : > { %v3209_v3 = vadd.f32 %v3208_v53, %v3040_v14  ;;  %v2873_v4 = vadd.f32 %v2872_v29, %v2704_v21  ;;  %v5490_v14 = vor.u32 %v6138_v0, %v5487_v38  ;;  %v5494_v53 = vor.u32 %v6143_v47, %v5493_v44 }
 0x27b   : > { %v3379_v23 = vpop.f32.mrf.mxu0 }
 0x27c   : > { %v7492_v46 = vadd.f32 %v3377_v62, %v3209_v3 }
 0x27e   : > { %8037 = vst [vmem:[#allocation29_spill] sm:$0xff] %v7492_v46 }
 0x27f   : > { %v3041_v32 = vpop.f32.mrf.mxu2 }
 0x280   : > { %v3042_v58 = vadd.f32 %v3041_v32, %v2873_v4  ;;  %v3210_v18 = vpop.f32.mrf.mxu3  ;;  %v6146_v32 = vld [vmem:[%s6695_s27 + $0x874] sm:$0xf] }
 0x281   : > { %v2875_v21 = vpop.f32.mrf.mxu1  ;;  %v5518_v49 = vor.u32 %v6146_v32, %v5515_v43  ;;  %v8044_v32 = vld [vmem:[#allocation21_spill] sm:$0xff] }
 0x282   : > { %v3211_v29 = vadd.f32 %v3210_v18, %v3042_v58  ;;  %v2876_v62 = vadd.f32 %v2875_v21, %v2707_v16  ;;  %v5521_v16 = vld [vmem:[%s6695_s27 + $0x878] sm:$0xf]  ;;  %v6151_v58 = vld [vmem:[%s6695_s27 + $0x898] sm:$0xf0]  ;;  %v6152_v21 = vld [vmem:[%s6695_s27 + $0x8a0] sm:$0xf0]  ;;  %v2714_v43 = vadd.f32 %v7372_v28, %v8044_v32 }
 0x283   : > { %v3382_v3 = vpop.f32.mrf.mxu0  ;;  %v6147_v18 = vld [vmem:[%s6695_s27 + $0x87c] sm:$0xf] }
 0x284   : > { %2914 = vmatmul.bf16.gmra.mxu1 %v5482_v48  ;;  %3083 = vmatmul.bf16.gmra.mxu2 %v5486_v63  ;;  %v7502_v46 = vadd.f32 %v3379_v23, %v3211_v29  ;;  %v5523_v48 = vld [vmem:[%s6695_s27 + $0x89c] sm:$0xf0] }
 0x285   : > { %3252 = vmatmul.bf16.gmra.mxu3 %v5490_v14  ;;  %v5529_v63 = vld [vmem:[%s6695_s27 + $0x880] sm:$0xf] }
 0x286   : > { %8039 = vst [vmem:[#allocation15_spill] sm:$0xff] %v7502_v46  ;;  %3421 = vmatmul.bf16.gmra.mxu0 %v5494_v53  ;;  %v8042_v53 = vld [vmem:[#allocation19_spill] sm:$0xff] }
 0x287   : > { %v3044_v4 = vpop.f32.mrf.mxu2  ;;  %v2712_v29 = vadd.f32 %v7372_v28, %v8042_v53  ;;  %v5551_v53 = vld [vmem:[%s6695_s27 + $0x8dc] sm:$0xf0] }
 0x288   : > { %v3045_v39 = vadd.f32 %v3044_v4, %v2876_v62  ;;  %v3213_v52 = vpop.f32.mrf.mxu3 }
 0x289   : > { %v2877_v0 = vpop.f32.mrf.mxu1 }
 0x28a   : > { %v3214_v38 = vadd.f32 %v3213_v52, %v3045_v39  ;;  %v2878_v44 = vadd.f32 %v2877_v0, %v2709_v2  ;;  %v5522_v39 = vor.u32 %v6151_v58, %v5521_v16  ;;  %v5526_v52 = vor.u32 %v6147_v18, %v5523_v48 }
 0x28b   : > { %v3384_v47 = vpop.f32.mrf.mxu0  ;;  %v5530_v0 = vor.u32 %v6152_v21, %v5529_v63 }
 0x28c   : > { %v7508_v23 = vadd.f32 %v3382_v3, %v3214_v38 }
 0x28e   : > { %8041 = vst [vmem:[#allocation17_spill] sm:$0xff] %v7508_v23 }
 0x28f   : > { %v3046_v14 = vpop.f32.mrf.mxu2 }
 0x290   : > { %v3047_v62 = vadd.f32 %v3046_v14, %v2878_v44  ;;  %v3215_v4 = vpop.f32.mrf.mxu3  ;;  %v6155_v14 = vld [vmem:[%s6695_s27 + $0x8bc] sm:$0xf] }
 0x291   : > { %v2880_v2 = vpop.f32.mrf.mxu1  ;;  %v5554_v32 = vor.u32 %v6155_v14, %v5551_v53  ;;  %v8048_v14 = vld [vmem:[#allocation25_spill] sm:$0xff] }
 0x292   : > { %v3216_v46 = vadd.f32 %v3215_v4, %v3047_v62  ;;  %v2881_v3 = vadd.f32 %v2880_v2, %v2712_v29  ;;  %v6160_v29 = vld [vmem:[%s6695_s27 + $0x8e0] sm:$0xf0]  ;;  %v5559_v4 = vld [vmem:[%s6695_s27 + $0x8e4] sm:$0xf0]  ;;  %v2719_v53 = vadd.f32 %v7372_v28, %v8048_v14 }
 0x293   : > { %v3387_v38 = vpop.f32.mrf.mxu0  ;;  %v6156_v62 = vld [vmem:[%s6695_s27 + $0x8c4] sm:$0xf] }
 0x294   : > { %2919 = vmatmul.bf16.gmra.mxu1 %v5518_v49  ;;  %3088 = vmatmul.bf16.gmra.mxu2 %v5522_v39  ;;  %v7518_v23 = vadd.f32 %v3384_v47, %v3216_v46  ;;  %v5557_v47 = vld [vmem:[%s6695_s27 + $0x8c0] sm:$0xf]  ;;  %v5565_v49 = vld [vmem:[%s6695_s27 + $0x8c8] sm:$0xf]  ;;  %v6161_v39 = vld [vmem:[%s6695_s27 + $0x8e8] sm:$0xf0] }
 0x295   : > { %3257 = vmatmul.bf16.gmra.mxu3 %v5526_v52  ;;  %v8046_v52 = vld [vmem:[#allocation23_spill] sm:$0xff] }
 0x296   : > { %8043 = vst [vmem:[#allocation19_spill] sm:$0xff] %v7518_v23  ;;  %3426 = vmatmul.bf16.gmra.mxu0 %v5530_v0  ;;  %v2717_v0 = vadd.f32 %v7372_v28, %v8046_v52  ;;  %v4451_v52 = vld [vmem:[%s6695_s27 + $0x34] sm:$0xf0] }
 0x297   : > { %v3049_v44 = vpop.f32.mrf.mxu2 }
 0x298   : > { %v3050_v16 = vadd.f32 %v3049_v44, %v2881_v3  ;;  %v3218_v58 = vpop.f32.mrf.mxu3 }
 0x299   : > { %v2882_v18 = vpop.f32.mrf.mxu1 }
 0x29a   : > { %v3219_v48 = vadd.f32 %v3218_v58, %v3050_v16  ;;  %v2883_v63 = vadd.f32 %v2882_v18, %v2714_v43  ;;  %v5558_v16 = vor.u32 %v6160_v29, %v5557_v47  ;;  %v5562_v58 = vor.u32 %v6156_v62, %v5559_v4 }
 0x29b   : > { %v3389_v21 = vpop.f32.mrf.mxu0  ;;  %v5566_v18 = vor.u32 %v6161_v39, %v5565_v49 }
 0x29c   : > { %v7524_v46 = vadd.f32 %v3387_v38, %v3219_v48 }
 0x29e   : > { %8045 = vst [vmem:[#allocation21_spill] sm:$0xff] %v7524_v46 }
 0x29f   : > { %v3051_v2 = vpop.f32.mrf.mxu2 }
 0x2a0   : > { %v3052_v3 = vadd.f32 %v3051_v2, %v2883_v63  ;;  %v3220_v44 = vpop.f32.mrf.mxu3  ;;  %v5878_v2 = vld [vmem:[%s6695_s27 + $0x14] sm:$0xf] }
 0x2a1   : > { %v2885_v43 = vpop.f32.mrf.mxu1  ;;  %v4454_v14 = vor.u32 %v5878_v2, %v4451_v52  ;;  %v8052_v2 = vld [vmem:[#allocation6_spill] sm:$0xff] }
 0x2a2   : > { %v3221_v23 = vadd.f32 %v3220_v44, %v3052_v3  ;;  %v2886_v38 = vadd.f32 %v2885_v43, %v2717_v0  ;;  %v5883_v0 = vld [vmem:[%s6695_s27 + $0x38] sm:$0xf0]  ;;  %v4459_v44 = vld [vmem:[%s6695_s27 + $0x3c] sm:$0xf0]  ;;  %v2724_v52 = vadd.f32 %v7372_v28, %v8052_v2 }
 0x2a3   : > { %v3392_v48 = vpop.f32.mrf.mxu0  ;;  %v5879_v3 = vld [vmem:[%s6695_s27 + $0x1c] sm:$0xf] }
 0x2a4   : > { %2924 = vmatmul.bf16.gmra.mxu1 %v5554_v32  ;;  %3093 = vmatmul.bf16.gmra.mxu2 %v5558_v16  ;;  %v7534_v46 = vadd.f32 %v3389_v21, %v3221_v23  ;;  %v4457_v21 = vld [vmem:[%s6695_s27 + $0x18] sm:$0xf]  ;;  %v4465_v32 = vld [vmem:[%s6695_s27 + $0x20] sm:$0xf]  ;;  %v5884_v16 = vld [vmem:[%s6695_s27 + $0x40] sm:$0xf0] }
 0x2a5   : > { %3262 = vmatmul.bf16.gmra.mxu3 %v5562_v58  ;;  %v8050_v58 = vld [vmem:[#allocation5_spill] sm:$0xff] }
 0x2a6   : > { %8047 = vst [vmem:[#allocation23_spill] sm:$0xff] %v7534_v46  ;;  %3431 = vmatmul.bf16.gmra.mxu0 %v5566_v18  ;;  %v2722_v18 = vadd.f32 %v7372_v28, %v8050_v58  ;;  %v4487_v58 = vld [vmem:[%s6695_s27 + $0x7c] sm:$0xf0] }
 0x2a7   : > { %v3054_v63 = vpop.f32.mrf.mxu2 }
 0x2a8   : > { %v3055_v47 = vadd.f32 %v3054_v63, %v2886_v38  ;;  %v3223_v29 = vpop.f32.mrf.mxu3 }
 0x2a9   : > { %v2887_v62 = vpop.f32.mrf.mxu1 }
 0x2aa   : > { %v3224_v4 = vadd.f32 %v3223_v29, %v3055_v47  ;;  %v2888_v49 = vadd.f32 %v2887_v62, %v2719_v53  ;;  %v4458_v47 = vor.u32 %v5883_v0, %v4457_v21  ;;  %v4462_v29 = vor.u32 %v5879_v3, %v4459_v44 }
 0x2ab   : > { %v3394_v39 = vpop.f32.mrf.mxu0  ;;  %v4466_v62 = vor.u32 %v5884_v16, %v4465_v32 }
 0x2ac   : > { %v7540_v23 = vadd.f32 %v3392_v48, %v3224_v4 }
 0x2ae   : > { %8049 = vst [vmem:[#allocation25_spill] sm:$0xff] %v7540_v23 }
 0x2af   : > { %v3056_v43 = vpop.f32.mrf.mxu2 }
 0x2b0   : > { %v3057_v38 = vadd.f32 %v3056_v43, %v2888_v49  ;;  %v3225_v63 = vpop.f32.mrf.mxu3  ;;  %v5887_v43 = vld [vmem:[%s6695_s27 + $0x5c] sm:$0xf] }
 0x2b1   : > { %v2890_v53 = vpop.f32.mrf.mxu1  ;;  %v4490_v2 = vor.u32 %v5887_v43, %v4487_v58  ;;  %v8056_v43 = vld [vmem:[#allocation8_spill] sm:$0xff] }
 0x2b2   : > { %v3226_v46 = vadd.f32 %v3225_v63, %v3057_v38  ;;  %v2891_v48 = vadd.f32 %v2890_v53, %v2722_v18  ;;  %v5892_v18 = vld [vmem:[%s6695_s27 + $0x80] sm:$0xf0]  ;;  %v4495_v63 = vld [vmem:[%s6695_s27 + $0x84] sm:$0xf0]  ;;  %v2729_v58 = vadd.f32 %v7372_v28, %v8056_v43 }
 0x2b3   : > { %v3397_v4 = vpop.f32.mrf.mxu0  ;;  %v5888_v38 = vld [vmem:[%s6695_s27 + $0x64] sm:$0xf] }
 0x2b4   : > { %3445 = vmatmul.bf16.vlgmr.msra.gmra.mxu1 %v4454_v14  ;;  %3614 = vmatmul.bf16.vlgmr.msra.gmra.mxu2 %v4458_v47  ;;  %v7550_v23 = vadd.f32 %v3394_v39, %v3226_v46  ;;  %v4493_v39 = vld [vmem:[%s6695_s27 + $0x60] sm:$0xf]  ;;  %v4501_v14 = vld [vmem:[%s6695_s27 + $0x68] sm:$0xf]  ;;  %v5893_v47 = vld [vmem:[%s6695_s27 + $0x88] sm:$0xf0] }
 0x2b5   : > { %3783 = vmatmul.bf16.vlgmr.msra.gmra.mxu3 %v4462_v29  ;;  %v8054_v29 = vld [vmem:[#allocation7_spill] sm:$0xff] }
 0x2b6   : > { %8051 = vst [vmem:[#allocation5_spill] sm:$0xff] %v7550_v23  ;;  %3952 = vmatmul.bf16.vlgmr.msra.gmra.mxu0 %v4466_v62  ;;  %v2727_v62 = vadd.f32 %v7372_v28, %v8054_v29  ;;  %v4523_v29 = vld [vmem:[%s6695_s27 + $0xc4] sm:$0xf0] }
 0x2b7   : > { %v3059_v49 = vpop.f32.mrf.mxu2 }
 0x2b8   : > { %v3060_v21 = vadd.f32 %v3059_v49, %v2891_v48  ;;  %v3228_v0 = vpop.f32.mrf.mxu3 }
 0x2b9   : > { %v2892_v3 = vpop.f32.mrf.mxu1 }
 0x2ba   : > { %v3229_v44 = vadd.f32 %v3228_v0, %v3060_v21  ;;  %v2893_v32 = vadd.f32 %v2892_v3, %v2724_v52  ;;  %v4494_v21 = vor.u32 %v5892_v18, %v4493_v39  ;;  %v4498_v0 = vor.u32 %v5888_v38, %v4495_v63 }
 0x2bb   : > { %v3399_v16 = vpop.f32.mrf.mxu0  ;;  %v4502_v3 = vor.u32 %v5893_v47, %v4501_v14 }
 0x2bc   : > { %v7556_v46 = vadd.f32 %v3397_v4, %v3229_v44 }
 0x2be   : > { %8053 = vst [vmem:[#allocation6_spill] sm:$0xff] %v7556_v46 }
 0x2bf   : > { %v3061_v53 = vpop.f32.mrf.mxu2 }
 0x2c0   : > { %v3062_v48 = vadd.f32 %v3061_v53, %v2893_v32  ;;  %v3230_v49 = vpop.f32.mrf.mxu3  ;;  %v5896_v53 = vld [vmem:[%s6695_s27 + $0xa4] sm:$0xf] }
 0x2c1   : > { %v2895_v52 = vpop.f32.mrf.mxu1  ;;  %v4526_v43 = vor.u32 %v5896_v53, %v4523_v29  ;;  %v8060_v53 = vld [vmem:[#allocation10_spill] sm:$0xff] }
 0x2c2   : > { %v3231_v23 = vadd.f32 %v3230_v49, %v3062_v48  ;;  %v2896_v4 = vadd.f32 %v2895_v52, %v2727_v62  ;;  %v5901_v62 = vld [vmem:[%s6695_s27 + $0xc8] sm:$0xf0]  ;;  %v4531_v49 = vld [vmem:[%s6695_s27 + $0xcc] sm:$0xf0]  ;;  %v2734_v29 = vadd.f32 %v7372_v28, %v8060_v53 }
 0x2c3   : > { %v3402_v44 = vpop.f32.mrf.mxu0  ;;  %v5897_v48 = vld [vmem:[%s6695_s27 + $0xac] sm:$0xf] }
 0x2c4   : > { %3450 = vmatmul.bf16.gmra.mxu1 %v4490_v2  ;;  %3619 = vmatmul.bf16.gmra.mxu2 %v4494_v21  ;;  %v7566_v46 = vadd.f32 %v3399_v16, %v3231_v23  ;;  %v4529_v16 = vld [vmem:[%s6695_s27 + $0xa8] sm:$0xf]  ;;  %v4537_v2 = vld [vmem:[%s6695_s27 + $0xb0] sm:$0xf]  ;;  %v5902_v21 = vld [vmem:[%s6695_s27 + $0xd0] sm:$0xf0] }
 0x2c5   : > { %3788 = vmatmul.bf16.gmra.mxu3 %v4498_v0  ;;  %v8058_v0 = vld [vmem:[#allocation9_spill] sm:$0xff] }
 0x2c6   : > { %8055 = vst [vmem:[#allocation7_spill] sm:$0xff] %v7566_v46  ;;  %3957 = vmatmul.bf16.gmra.mxu0 %v4502_v3  ;;  %v2732_v3 = vadd.f32 %v7372_v28, %v8058_v0  ;;  %v4559_v0 = vld [vmem:[%s6695_s27 + $0x10c] sm:$0xf0] }
 0x2c7   : > { %v3064_v32 = vpop.f32.mrf.mxu2 }
 0x2c8   : > { %v3065_v39 = vadd.f32 %v3064_v32, %v2896_v4  ;;  %v3233_v18 = vpop.f32.mrf.mxu3 }
 0x2c9   : > { %v2897_v38 = vpop.f32.mrf.mxu1 }
 0x2ca   : > { %v3234_v63 = vadd.f32 %v3233_v18, %v3065_v39  ;;  %v2898_v14 = vadd.f32 %v2897_v38, %v2729_v58  ;;  %v4530_v39 = vor.u32 %v5901_v62, %v4529_v16  ;;  %v4534_v18 = vor.u32 %v5897_v48, %v4531_v49 }
 0x2cb   : > { %v3404_v47 = vpop.f32.mrf.mxu0  ;;  %v4538_v38 = vor.u32 %v5902_v21, %v4537_v2 }
 0x2cc   : > { %v7572_v23 = vadd.f32 %v3402_v44, %v3234_v63 }
 0x2ce   : > { %8057 = vst [vmem:[#allocation8_spill] sm:$0xff] %v7572_v23 }
 0x2cf   : > { %v3066_v52 = vpop.f32.mrf.mxu2 }
 0x2d0   : > { %v3067_v4 = vadd.f32 %v3066_v52, %v2898_v14  ;;  %v3235_v32 = vpop.f32.mrf.mxu3  ;;  %v5905_v52 = vld [vmem:[%s6695_s27 + $0xec] sm:$0xf] }
 0x2d1   : > { %v2900_v58 = vpop.f32.mrf.mxu1  ;;  %v4562_v53 = vor.u32 %v5905_v52, %v4559_v0  ;;  %v8064_v52 = vld [vmem:[#allocation12_spill] sm:$0xff] }
 0x2d2   : > { %v3236_v46 = vadd.f32 %v3235_v32, %v3067_v4  ;;  %v2901_v44 = vadd.f32 %v2900_v58, %v2732_v3  ;;  %v5910_v3 = vld [vmem:[%s6695_s27 + $0x110] sm:$0xf0]  ;;  %v4567_v32 = vld [vmem:[%s6695_s27 + $0x114] sm:$0xf0]  ;;  %v2739_v0 = vadd.f32 %v7372_v28, %v8064_v52 }
 0x2d3   : > { %v3407_v63 = vpop.f32.mrf.mxu0  ;;  %v5906_v4 = vld [vmem:[%s6695_s27 + $0xf4] sm:$0xf] }
 0x2d4   : > { %3455 = vmatmul.bf16.gmra.mxu1 %v4526_v43  ;;  %3624 = vmatmul.bf16.gmra.mxu2 %v4530_v39  ;;  %v7582_v23 = vadd.f32 %v3404_v47, %v3236_v46  ;;  %v4565_v47 = vld [vmem:[%s6695_s27 + $0xf0] sm:$0xf]  ;;  %v4573_v43 = vld [vmem:[%s6695_s27 + $0xf8] sm:$0xf]  ;;  %v5911_v39 = vld [vmem:[%s6695_s27 + $0x118] sm:$0xf0] }
 0x2d5   : > { %3793 = vmatmul.bf16.gmra.mxu3 %v4534_v18  ;;  %v8062_v18 = vld [vmem:[#allocation11_spill] sm:$0xff] }
 0x2d6   : > { %8059 = vst [vmem:[#allocation9_spill] sm:$0xff] %v7582_v23  ;;  %3962 = vmatmul.bf16.gmra.mxu0 %v4538_v38  ;;  %v2737_v38 = vadd.f32 %v7372_v28, %v8062_v18  ;;  %v4595_v18 = vld [vmem:[%s6695_s27 + $0x154] sm:$0xf0] }
 0x2d7   : > { %v3069_v14 = vpop.f32.mrf.mxu2 }
 0x2d8   : > { %v3070_v16 = vadd.f32 %v3069_v14, %v2901_v44  ;;  %v3238_v62 = vpop.f32.mrf.mxu3 }
 0x2d9   : > { %v2902_v48 = vpop.f32.mrf.mxu1 }
 0x2da   : > { %v3239_v49 = vadd.f32 %v3238_v62, %v3070_v16  ;;  %v2903_v2 = vadd.f32 %v2902_v48, %v2734_v29  ;;  %v4566_v16 = vor.u32 %v5910_v3, %v4565_v47  ;;  %v4570_v62 = vor.u32 %v5906_v4, %v4567_v32 }
 0x2db   : > { %v3409_v21 = vpop.f32.mrf.mxu0  ;;  %v4574_v48 = vor.u32 %v5911_v39, %v4573_v43 }
 0x2dc   : > { %v7588_v46 = vadd.f32 %v3407_v63, %v3239_v49 }
 0x2de   : > { %8061 = vst [vmem:[#allocation10_spill] sm:$0xff] %v7588_v46 }
 0x2df   : > { %v3071_v58 = vpop.f32.mrf.mxu2 }
 0x2e0   : > { %v3072_v44 = vadd.f32 %v3071_v58, %v2903_v2  ;;  %v3240_v14 = vpop.f32.mrf.mxu3  ;;  %v5914_v58 = vld [vmem:[%s6695_s27 + $0x134] sm:$0xf] }
 0x2e1   : > { %v2905_v29 = vpop.f32.mrf.mxu1  ;;  %v4598_v52 = vor.u32 %v5914_v58, %v4595_v18  ;;  %v8068_v58 = vld [vmem:[#allocation14_spill] sm:$0xff] }
 0x2e2   : > { %v3241_v23 = vadd.f32 %v3240_v14, %v3072_v44  ;;  %v2906_v63 = vadd.f32 %v2905_v29, %v2737_v38  ;;  %v5919_v38 = vld [vmem:[%s6695_s27 + $0x158] sm:$0xf0]  ;;  %v4603_v14 = vld [vmem:[%s6695_s27 + $0x15c] sm:$0xf0]  ;;  %v2744_v18 = vadd.f32 %v7372_v28, %v8068_v58 }
 0x2e3   : > { %v3412_v49 = vpop.f32.mrf.mxu0  ;;  %v5915_v44 = vld [vmem:[%s6695_s27 + $0x13c] sm:$0xf] }
 0x2e4   : > { %3460 = vmatmul.bf16.gmra.mxu1 %v4562_v53  ;;  %3629 = vmatmul.bf16.gmra.mxu2 %v4566_v16  ;;  %v7598_v46 = vadd.f32 %v3409_v21, %v3241_v23  ;;  %v4601_v21 = vld [vmem:[%s6695_s27 + $0x138] sm:$0xf]  ;;  %v4609_v53 = vld [vmem:[%s6695_s27 + $0x140] sm:$0xf]  ;;  %v5920_v16 = vld [vmem:[%s6695_s27 + $0x160] sm:$0xf0] }
 0x2e5   : > { %3798 = vmatmul.bf16.gmra.mxu3 %v4570_v62  ;;  %v8066_v62 = vld [vmem:[#allocation13_spill] sm:$0xff] }
 0x2e6   : > { %8063 = vst [vmem:[#allocation11_spill] sm:$0xff] %v7598_v46  ;;  %3967 = vmatmul.bf16.gmra.mxu0 %v4574_v48  ;;  %v2742_v48 = vadd.f32 %v7372_v28, %v8066_v62  ;;  %v4631_v62 = vld [vmem:[%s6695_s27 + $0x19c] sm:$0xf0] }
 0x2e7   : > { %v3074_v2 = vpop.f32.mrf.mxu2 }
 0x2e8   : > { %v3075_v47 = vadd.f32 %v3074_v2, %v2906_v63  ;;  %v3243_v3 = vpop.f32.mrf.mxu3 }
 0x2e9   : > { %v2907_v4 = vpop.f32.mrf.mxu1 }
 0x2ea   : > { %v3244_v32 = vadd.f32 %v3243_v3, %v3075_v47  ;;  %v2908_v43 = vadd.f32 %v2907_v4, %v2739_v0  ;;  %v4602_v47 = vor.u32 %v5919_v38, %v4601_v21  ;;  %v4606_v3 = vor.u32 %v5915_v44, %v4603_v14 }
 0x2eb   : > { %v3414_v39 = vpop.f32.mrf.mxu0  ;;  %v4610_v4 = vor.u32 %v5920_v16, %v4609_v53 }
 0x2ec   : > { %v7604_v23 = vadd.f32 %v3412_v49, %v3244_v32 }
 0x2ee   : > { %8065 = vst [vmem:[#allocation12_spill] sm:$0xff] %v7604_v23 }
 0x2ef   : > { %v3076_v29 = vpop.f32.mrf.mxu2 }
 0x2f0   : > { %v3077_v63 = vadd.f32 %v3076_v29, %v2908_v43  ;;  %v3245_v2 = vpop.f32.mrf.mxu3  ;;  %v5923_v29 = vld [vmem:[%s6695_s27 + $0x17c] sm:$0xf] }
 0x2f1   : > { %v2910_v0 = vpop.f32.mrf.mxu1  ;;  %v4634_v58 = vor.u32 %v5923_v29, %v4631_v62  ;;  %v8072_v29 = vld [vmem:[#allocation18_spill] sm:$0xff] }
 0x2f2   : > { %v3246_v46 = vadd.f32 %v3245_v2, %v3077_v63  ;;  %v2911_v49 = vadd.f32 %v2910_v0, %v2742_v48  ;;  %v5928_v48 = vld [vmem:[%s6695_s27 + $0x1a0] sm:$0xf0]  ;;  %v4639_v2 = vld [vmem:[%s6695_s27 + $0x1a4] sm:$0xf0] }
 0x2f3   : > { %v3417_v32 = vpop.f32.mrf.mxu0  ;;  %v5924_v63 = vld [vmem:[%s6695_s27 + $0x184] sm:$0xf] }
 0x2f4   : > { %3465 = vmatmul.bf16.gmra.mxu1 %v4598_v52  ;;  %3634 = vmatmul.bf16.gmra.mxu2 %v4602_v47  ;;  %v7614_v23 = vadd.f32 %v3414_v39, %v3246_v46  ;;  %v4637_v39 = vld [vmem:[%s6695_s27 + $0x180] sm:$0xf]  ;;  %v4645_v52 = vld [vmem:[%s6695_s27 + $0x188] sm:$0xf]  ;;  %v5929_v47 = vld [vmem:[%s6695_s27 + $0x1a8] sm:$0xf0] }
 0x2f5   : > { %3803 = vmatmul.bf16.gmra.mxu3 %v4606_v3  ;;  %v8070_v3 = vld [vmem:[#allocation16_spill] sm:$0xff] }
 0x2f6   : > { %8067 = vst [vmem:[#allocation13_spill] sm:$0xff] %v7614_v23  ;;  %3972 = vmatmul.bf16.gmra.mxu0 %v4610_v4  ;;  %v2747_v4 = vadd.f32 %v7372_v28, %v8070_v3  ;;  %v4673_v3 = vld [vmem:[%s6695_s27 + $0x1c8] sm:$0xf] }
 0x2f7   : > { %v3079_v43 = vpop.f32.mrf.mxu2 }
 0x2f8   : > { %v3080_v21 = vadd.f32 %v3079_v43, %v2911_v49  ;;  %v3248_v38 = vpop.f32.mrf.mxu3 }
 0x2f9   : > { %v2912_v44 = vpop.f32.mrf.mxu1 }
 0x2fa   : > { %v3249_v14 = vadd.f32 %v3248_v38, %v3080_v21  ;;  %v2913_v53 = vadd.f32 %v2912_v44, %v2744_v18  ;;  %v4638_v21 = vor.u32 %v5928_v48, %v4637_v39  ;;  %v4642_v38 = vor.u32 %v5924_v63, %v4639_v2 }
 0x2fb   : > { %v3419_v16 = vpop.f32.mrf.mxu0  ;;  %v4646_v44 = vor.u32 %v5929_v47, %v4645_v52  ;;  %v5932_v52 = vld [vmem:[%s6695_s27 + $0x1c4] sm:$0xf]  ;;  %v4667_v47 = vld [vmem:[%s6695_s27 + $0x1e4] sm:$0xf0] }
 0x2fc   : > { %v7620_v46 = vadd.f32 %v3417_v32, %v3249_v14 }
 0x2fe   : > { %8069 = vst [vmem:[#allocation14_spill] sm:$0xff] %v7620_v46 }
 0x2ff   : > { %v3081_v0 = vpop.f32.mrf.mxu2 }
 0x300   : > { %v3082_v49 = vadd.f32 %v3081_v0, %v2913_v53  ;;  %v3250_v43 = vpop.f32.mrf.mxu3  ;;  %v7635_v53 = vld [vmem:[%s8009_s2] ss:$0 sm:$0xff] }
 0x301   : > { %v2915_v18 = vpop.f32.mrf.mxu1  ;;  %v2749_v62 = vadd.f32 %v7635_v53, %v8072_v29  ;;  %v4670_v29 = vor.u32 %v5932_v52, %v4667_v47  ;;  %v8076_v52 = vld [vmem:[#allocation22_spill] sm:$0xff] }
 0x302   : > { %v3251_v23 = vadd.f32 %v3250_v43, %v3082_v49  ;;  %v2916_v32 = vadd.f32 %v2915_v18, %v2747_v4  ;;  %v5937_v4 = vld [vmem:[%s6695_s27 + $0x1e8] sm:$0xf0]  ;;  %v4675_v43 = vld [vmem:[%s6695_s27 + $0x1ec] sm:$0xf0]  ;;  %v2754_v47 = vadd.f32 %v7635_v53, %v8076_v52 }
 0x303   : > { %v3422_v14 = vpop.f32.mrf.mxu0  ;;  %v5933_v49 = vld [vmem:[%s6695_s27 + $0x1cc] sm:$0xf] }
 0x304   : > { %3470 = vmatmul.bf16.gmra.mxu1 %v4634_v58  ;;  %3639 = vmatmul.bf16.gmra.mxu2 %v4638_v21  ;;  %v7630_v46 = vadd.f32 %v3419_v16, %v3251_v23  ;;  %v4681_v58 = vld [vmem:[%s6695_s27 + $0x1d0] sm:$0xf]  ;;  %v5938_v21 = vld [vmem:[%s6695_s27 + $0x1f0] sm:$0xf0] }
 0x305   : > { %3808 = vmatmul.bf16.gmra.mxu3 %v4642_v38  ;;  %v8074_v38 = vld [vmem:[#allocation20_spill] sm:$0xff] }
 0x306   : > { %8071 = vst [vmem:[#allocation16_spill] sm:$0xff] %v7630_v46  ;;  %3977 = vmatmul.bf16.gmra.mxu0 %v4646_v44  ;;  %v2752_v44 = vadd.f32 %v7635_v53, %v8074_v38  ;;  %v4703_v38 = vld [vmem:[%s6695_s27 + $0x22c] sm:$0xf0] }
 0x307   : > { %v3084_v28 = vpop.f32.mrf.mxu2 }
 0x308   : > { %v3085_v39 = vadd.f32 %v3084_v28, %v2916_v32  ;;  %v3253_v48 = vpop.f32.mrf.mxu3 }
 0x309   : > { %v2917_v23 = vpop.f32.mrf.mxu1 }
 0x30a   : > { %v3254_v16 = vadd.f32 %v3253_v48, %v3085_v39  ;;  %v2918_v63 = vadd.f32 %v2917_v23, %v2749_v62  ;;  %v4674_v39 = vor.u32 %v5937_v4, %v4673_v3  ;;  %v4678_v48 = vor.u32 %v5933_v49, %v4675_v43 }
 0x30b   : > { %v3424_v2 = vpop.f32.mrf.mxu0  ;;  %v4682_v23 = vor.u32 %v5938_v21, %v4681_v58 }
 0x30c   : > { %v7641_v0 = vadd.f32 %v3422_v14, %v3254_v16 }
 0x30e   : > { %8073 = vst [vmem:[#allocation18_spill] sm:$0xff] %v7641_v0 }
 0x30f   : > { %v3086_v18 = vpop.f32.mrf.mxu2 }
 0x310   : > { %v3087_v32 = vadd.f32 %v3086_v18, %v2918_v63  ;;  %v3255_v28 = vpop.f32.mrf.mxu3  ;;  %v5941_v18 = vld [vmem:[%s6695_s27 + $0x20c] sm:$0xf] }
 0x311   : > { %v2920_v62 = vpop.f32.mrf.mxu1  ;;  %v4706_v52 = vor.u32 %v5941_v18, %v4703_v38  ;;  %v8080_v18 = vld [vmem:[#allocation26_spill] sm:$0xff] }
 0x312   : > { %v3256_v46 = vadd.f32 %v3255_v28, %v3087_v32  ;;  %v2921_v14 = vadd.f32 %v2920_v62, %v2752_v44  ;;  %v5946_v44 = vld [vmem:[%s6695_s27 + $0x230] sm:$0xf0]  ;;  %v4711_v28 = vld [vmem:[%s6695_s27 + $0x234] sm:$0xf0]  ;;  %v2759_v38 = vadd.f32 %v7635_v53, %v8080_v18 }
 0x313   : > { %v3427_v16 = vpop.f32.mrf.mxu0  ;;  %v5942_v32 = vld [vmem:[%s6695_s27 + $0x214] sm:$0xf] }
 0x314   : > { %3475 = vmatmul.bf16.gmra.mxu1 %v4670_v29  ;;  %3644 = vmatmul.bf16.gmra.mxu2 %v4674_v39  ;;  %v7651_v0 = vadd.f32 %v3424_v2, %v3256_v46  ;;  %v4709_v2 = vld [vmem:[%s6695_s27 + $0x210] sm:$0xf]  ;;  %v4717_v29 = vld [vmem:[%s6695_s27 + $0x218] sm:$0xf]  ;;  %v5947_v39 = vld [vmem:[%s6695_s27 + $0x238] sm:$0xf0] }
 0x315   : > { %3813 = vmatmul.bf16.gmra.mxu3 %v4678_v48  ;;  %v8078_v48 = vld [vmem:[#allocation24_spill] sm:$0xff] }
 0x316   : > { %8075 = vst [vmem:[#allocation20_spill] sm:$0xff] %v7651_v0  ;;  %3982 = vmatmul.bf16.gmra.mxu0 %v4682_v23  ;;  %v2757_v23 = vadd.f32 %v7635_v53, %v8078_v48  ;;  %v4739_v48 = vld [vmem:[%s6695_s27 + $0x274] sm:$0xf0] }
 0x317   : > { %v3089_v63 = vpop.f32.mrf.mxu2 }
 0x318   : > { %v3090_v3 = vadd.f32 %v3089_v63, %v2921_v14  ;;  %v3258_v4 = vpop.f32.mrf.mxu3 }
 0x319   : > { %v2922_v49 = vpop.f32.mrf.mxu1 }
 0x31a   : > { %v3259_v43 = vadd.f32 %v3258_v4, %v3090_v3  ;;  %v2923_v58 = vadd.f32 %v2922_v49, %v2754_v47  ;;  %v4710_v3 = vor.u32 %v5946_v44, %v4709_v2  ;;  %v4714_v4 = vor.u32 %v5942_v32, %v4711_v28 }
 0x31b   : > { %v3429_v21 = vpop.f32.mrf.mxu0  ;;  %v4718_v49 = vor.u32 %v5947_v39, %v4717_v29 }
 0x31c   : > { %v7657_v46 = vadd.f32 %v3427_v16, %v3259_v43 }
 0x31e   : > { %8077 = vst [vmem:[#allocation22_spill] sm:$0xff] %v7657_v46 }
 0x31f   : > { %v3091_v62 = vpop.f32.mrf.mxu2 }
 0x320   : > { %v3092_v14 = vadd.f32 %v3091_v62, %v2923_v58  ;;  %v3260_v63 = vpop.f32.mrf.mxu3  ;;  %v5950_v62 = vld [vmem:[%s6695_s27 + $0x254] sm:$0xf] }
 0x321   : > { %v2925_v47 = vpop.f32.mrf.mxu1  ;;  %v4742_v53 = vor.u32 %v5950_v62, %v4739_v48 }
 0x322   : > { %v3261_v0 = vadd.f32 %v3260_v63, %v3092_v14  ;;  %v2926_v16 = vadd.f32 %v2925_v47, %v2757_v23  ;;  %v5955_v23 = vld [vmem:[%s6695_s27 + $0x278] sm:$0xf0]  ;;  %v4747_v63 = vld [vmem:[%s6695_s27 + $0x27c] sm:$0xf0] }
 0x323   : > { %v3432_v43 = vpop.f32.mrf.mxu0  ;;  %v5951_v14 = vld [vmem:[%s6695_s27 + $0x25c] sm:$0xf] }
 0x324   : > { %3480 = vmatmul.bf16.gmra.mxu1 %v4706_v52  ;;  %3649 = vmatmul.bf16.gmra.mxu2 %v4710_v3  ;;  %v7667_v46 = vadd.f32 %v3429_v21, %v3261_v0  ;;  %v4745_v21 = vld [vmem:[%s6695_s27 + $0x258] sm:$0xf]  ;;  %v4753_v52 = vld [vmem:[%s6695_s27 + $0x260] sm:$0xf]  ;;  %v5956_v3 = vld [vmem:[%s6695_s27 + $0x280] sm:$0xf0]  ;;  %v4750_v18 = vor.u32 %v5951_v14, %v4747_v63 }
 0x325   : > { %3818 = vmatmul.bf16.gmra.mxu3 %v4714_v4  ;;  %v5959_v14 = vld [vmem:[%s6695_s27 + $0x29c] sm:$0xf]  ;;  %v4775_v63 = vld [vmem:[%s6695_s27 + $0x2bc] sm:$0xf0] }
 0x326   : > { %8079 = vst [vmem:[#allocation24_spill] sm:$0xff] %v7667_v46  ;;  %3987 = vmatmul.bf16.gmra.mxu0 %v4718_v49 }
 0x327   : > { %v3094_v58 = vpop.f32.mrf.mxu2 }
 0x328   : > { %v3095_v2 = vadd.f32 %v3094_v58, %v2926_v16  ;;  %v3263_v44 = vpop.f32.mrf.mxu3  ;;  %v4746_v16 = vor.u32 %v5955_v23, %v4745_v21 }
 0x329   : > { %v2927_v32 = vpop.f32.mrf.mxu1 }
 0x32a   : > { %v3264_v28 = vadd.f32 %v3263_v44, %v3095_v2  ;;  %v2928_v29 = vadd.f32 %v2927_v32, %v2759_v38  ;;  %v4754_v38 = vor.u32 %v5956_v3, %v4753_v52  ;;  %v4781_v52 = vld [vmem:[%s6695_s27 + $0x2a0] sm:$0xf]  ;;  %v5964_v3 = vld [vmem:[%s6695_s27 + $0x2c0] sm:$0xf0] }
 0x32b   : > { %v3434_v39 = vpop.f32.mrf.mxu0 }
 0x32c   : > { %v7673_v0 = vadd.f32 %v3432_v43, %v3264_v28  ;;  %v8083_v28 = vld [vmem:[#allocation27_spill] sm:$0xff] }
 0x32e   : > { %8081 = vst [vmem:[#allocation26_spill] sm:$0xff] %v7673_v0 }
 0x32f   : > { %v3096_v47 = vpop.f32.mrf.mxu2 }
 0x330   : > { %v3097_v4 = vadd.f32 %v3096_v47, %v2928_v29  ;;  %v3265_v49 = vpop.f32.mrf.mxu3  ;;  %v5960_v47 = vld [vmem:[%s6695_s27 + $0x2a4] sm:$0xf] }
 0x331   : > { %v3446_v58 = vpop.f32.mrf.mxu1 }
 0x332   : > { %v3266_v2 = vadd.f32 %v3265_v49, %v3097_v4  ;;  %v3447_v29 = vadd.f32 %v3446_v58, %v8083_v28  ;;  %v4783_v49 = vld [vmem:[%s6695_s27 + $0x2c4] sm:$0xf0]  ;;  %v4782_v28 = vor.u32 %v5964_v3, %v4781_v52  ;;  %v5968_v3 = vld [vmem:[%s6695_s27 + $0x2e4] sm:$0xf] }
 0x333   : > { %v3953_v43 = vpop.f32.mrf.mxu0 }
 0x334   : > { %3485 = vmatmul.bf16.gmra.mxu1 %v4742_v53  ;;  %3654 = vmatmul.bf16.gmra.mxu2 %v4746_v16  ;;  %v7681_v44 = vadd.f32 %v3434_v39, %v3266_v2  ;;  %v4789_v53 = vld [vmem:[%s6695_s27 + $0x2a8] sm:$0xf]  ;;  %v5965_v16 = vld [vmem:[%s6695_s27 + $0x2c8] sm:$0xf0]  ;;  %v4778_v2 = vor.u32 %v5959_v14, %v4775_v63 }
 0x335   : > { %3823 = vmatmul.bf16.gmra.mxu3 %v4750_v18 }
 0x336   : > { %8082 = vst [vmem:[#allocation30_spill] sm:$0xff] %v7681_v44  ;;  %3992 = vmatmul.bf16.gmra.mxu0 %v4754_v38  ;;  %v4790_v44 = vor.u32 %v5965_v16, %v4789_v53  ;;  %v4819_v53 = vld [vmem:[%s6695_s27 + $0x30c] sm:$0xf0] }
 0x337   : > { %v3615_v32 = vpop.f32.mrf.mxu2  ;;  %v4825_v16 = vld [vmem:[%s6695_s27 + $0x2f0] sm:$0xf] }
 0x338   : > { %v3784_v62 = vpop.f32.mrf.mxu3  ;;  %v3616_v21 = vadd.f32 %v3615_v32, %v3447_v29  ;;  %v4786_v29 = vor.u32 %v5960_v47, %v4783_v49  ;;  %v4817_v47 = vld [vmem:[%s6695_s27 + $0x2e8] sm:$0xf] }
 0x339   : > { %v3448_v48 = vpop.f32.mrf.mxu1 }
 0x33a   : > { %v3785_v39 = vadd.f32 %v3784_v62, %v3616_v21  ;;  %v3449_v4 = vadd.f32 %v3448_v48, %v7117_v57 }
 0x33b   : > { %v3955_v23 = vpop.f32.mrf.mxu0 }
 0x33c   : > { %v3954_v0 = vadd.f32 %v3953_v43, %v3785_v39  ;;  %v5969_v39 = vld [vmem:[%s6695_s27 + $0x2ec] sm:$0xf] }
 0x33e   : > { %v4113_v57 = vmax.f32 %v3954_v0, 0.0  ;;  %v5973_v0 = vld [vmem:[%s6695_s27 + $0x308] sm:$0xf0] }
 0x33f   : > { %v3617_v18 = vpop.f32.mrf.mxu2 }
 0x340   : > { %v3618_v38 = vadd.f32 %v3617_v18, %v3449_v4  ;;  %v3786_v58 = vpop.f32.mrf.mxu3 }
 0x341   : > { %v3451_v32 = vpop.f32.mrf.mxu1 }
 0x342   : > { %v3787_v46 = vadd.f32 %v3786_v58, %v3618_v38  ;;  %v3452_v43 = vadd.f32 %v3451_v32, %v7123_v40  ;;  %v5974_v40 = vld [vmem:[%s6695_s27 + $0x310] sm:$0xf0] }
 0x343   : > { %v3958_v27 = vpop.f32.mrf.mxu0 }
 0x344   : > { %v3956_v62 = vadd.f32 %v3955_v23, %v3787_v46  ;;  %3490 = vmatmul.bf16.gmra.mxu1 %v4778_v2  ;;  %3659 = vmatmul.bf16.gmra.mxu2 %v4782_v28  ;;  %v4818_v28 = vor.u32 %v5973_v0, %v4817_v47  ;;  %v5977_v47 = vld [vmem:[%s6695_s27 + $0x32c] sm:$0xf]  ;;  %v4847_v0 = vld [vmem:[%s6695_s27 + $0x34c] sm:$0xf0] }
 0x345   : > { %3828 = vmatmul.bf16.gmra.mxu3 %v4786_v29  ;;  %v4822_v29 = vor.u32 %v5969_v39, %v4819_v53  ;;  %v4853_v39 = vld [vmem:[%s6695_s27 + $0x330] sm:$0xf] }
 0x346   : > { %3997 = vmatmul.bf16.gmra.mxu0 %v4790_v44  ;;  %v4114_v48 = vmax.f32 %v3956_v62, 0.0  ;;  %v4811_v44 = vld [vmem:[%s6695_s27 + $0x304] sm:$0xf0]  ;;  %v4826_v62 = vor.u32 %v5974_v40, %v4825_v16  ;;  %v4855_v40 = vld [vmem:[%s6695_s27 + $0x354] sm:$0xf0] }
 0x347   : > { %v3620_v21 = vpop.f32.mrf.mxu2  ;;  %v4814_v2 = vor.u32 %v5968_v3, %v4811_v44 }
 0x348   : > { %v6240_v14 = vpack.c.bf16 %v4114_v48, %v4113_v57  ;;  %v3789_v63 = vpop.f32.mrf.mxu3  ;;  %v3621_v23 = vadd.f32 %v3620_v21, %v3452_v43 }
 0x349   : > { %v3453_v46 = vpop.f32.mrf.mxu1 }
 0x34a   : > { %6241 = vst [vmem:[%s7697_s11] sm:$0xff] %v6240_v14   ;;  %v3790_v4 = vadd.f32 %v3789_v63, %v3621_v23  ;;  %v3454_v49 = vadd.f32 %v3453_v46, %v7133_v36 }
 0x34b   : > { %v3960_v52 = vpop.f32.mrf.mxu0 }
 0x34c   : > { %v3959_v57 = vadd.f32 %v3958_v27, %v3790_v4  ;;  %v5982_v4 = vld [vmem:[%s6695_s27 + $0x350] sm:$0xf0] }
 0x34e   : > { %v4115_v36 = vmax.f32 %v3959_v57, 0.0 }
 0x34f   : > { %v3622_v18 = vpop.f32.mrf.mxu2 }
 0x350   : > { %v3623_v38 = vadd.f32 %v3622_v18, %v3454_v49  ;;  %v3791_v58 = vpop.f32.mrf.mxu3  ;;  %v5978_v49 = vld [vmem:[%s6695_s27 + $0x334] sm:$0xf]  ;;  %v4861_v18 = vld [vmem:[%s6695_s27 + $0x338] sm:$0xf] }
 0x351   : > { %v3456_v32 = vpop.f32.mrf.mxu1 }
 0x352   : > { %v3792_v48 = vadd.f32 %v3791_v58, %v3623_v38  ;;  %v3457_v27 = vadd.f32 %v3456_v32, %v7151_v15  ;;  %v5983_v38 = vld [vmem:[%s6695_s27 + $0x358] sm:$0xf0]  ;;  %v4850_v15 = vor.u32 %v5977_v47, %v4847_v0  ;;  %v4854_v32 = vor.u32 %v5982_v4, %v4853_v39  ;;  %v5986_v47 = vld [vmem:[%s6695_s27 + $0x374] sm:$0xf]  ;;  %v4883_v0 = vld [vmem:[%s6695_s27 + $0x394] sm:$0xf0] }
 0x353   : > { %v3963_v21 = vpop.f32.mrf.mxu0  ;;  %v4862_v57 = vor.u32 %v5983_v38, %v4861_v18  ;;  %v4889_v39 = vld [vmem:[%s6695_s27 + $0x378] sm:$0xf]  ;;  %v5991_v4 = vld [vmem:[%s6695_s27 + $0x398] sm:$0xf0]  ;;  %v4897_v18 = vld [vmem:[%s6695_s27 + $0x380] sm:$0xf] }
 0x354   : > { %v3961_v14 = vadd.f32 %v3960_v52, %v3792_v48  ;;  %3495 = vmatmul.bf16.gmra.mxu1 %v4814_v2  ;;  %3664 = vmatmul.bf16.gmra.mxu2 %v4818_v28  ;;  %v5992_v38 = vld [vmem:[%s6695_s27 + $0x3a0] sm:$0xf0] }
 0x355   : > { %3833 = vmatmul.bf16.gmra.mxu3 %v4822_v29 }
 0x356   : > { %4002 = vmatmul.bf16.gmra.mxu0 %v4826_v62  ;;  %v4116_v43 = vmax.f32 %v3961_v14, 0.0  ;;  %v4858_v62 = vor.u32 %v5978_v49, %v4855_v40  ;;  %v5987_v49 = vld [vmem:[%s6695_s27 + $0x37c] sm:$0xf]  ;;  %v4891_v40 = vld [vmem:[%s6695_s27 + $0x39c] sm:$0xf0] }
 0x357   : > { %v3625_v63 = vpop.f32.mrf.mxu2 }
 0x358   : > { %v6245_v46 = vpack.c.bf16 %v4116_v43, %v4115_v36  ;;  %v3794_v23 = vpop.f32.mrf.mxu3  ;;  %v3626_v52 = vadd.f32 %v3625_v63, %v3457_v27 }
 0x359   : > { %v3458_v3 = vpop.f32.mrf.mxu1 }
 0x35a   : > { %6397 = vst [vmem:[%s7697_s11 + $0x8] sm:$0xff] %v6245_v46   ;;  %v3795_v53 = vadd.f32 %v3794_v23, %v3626_v52  ;;  %v3459_v16 = vadd.f32 %v3458_v3, %v7161_v20 }
 0x35b   : > { %v3965_v44 = vpop.f32.mrf.mxu0 }
 0x35c   : > { %v3964_v48 = vadd.f32 %v3963_v21, %v3795_v53 }
 0x35e   : > { %v4117_v20 = vmax.f32 %v3964_v48, 0.0 }
 0x35f   : > { %v3627_v58 = vpop.f32.mrf.mxu2 }
 0x360   : > { %v3628_v2 = vadd.f32 %v3627_v58, %v3459_v16  ;;  %v3796_v28 = vpop.f32.mrf.mxu3 }
 0x361   : > { %v3461_v29 = vpop.f32.mrf.mxu1 }
 0x362   : > { %v3797_v14 = vadd.f32 %v3796_v28, %v3628_v2  ;;  %v3462_v21 = vadd.f32 %v3461_v29, %v7167_v11  ;;  %v4886_v11 = vor.u32 %v5986_v47, %v4883_v0  ;;  %v4894_v29 = vor.u32 %v5987_v49, %v4891_v40  ;;  %v4925_v47 = vld [vmem:[%s6695_s27 + $0x3c0] sm:$0xf]  ;;  %v6000_v0 = vld [vmem:[%s6695_s27 + $0x3e0] sm:$0xf0]  ;;  %v6001_v40 = vld [vmem:[%s6695_s27 + $0x3e8] sm:$0xf0] }
 0x363   : > { %v3968_v36 = vpop.f32.mrf.mxu0 }
 0x364   : > { %v3966_v43 = vadd.f32 %v3965_v44, %v3797_v14  ;;  %3500 = vmatmul.bf16.gmra.mxu1 %v4850_v15  ;;  %3669 = vmatmul.bf16.gmra.mxu2 %v4854_v32  ;;  %v4890_v15 = vor.u32 %v5991_v4, %v4889_v39  ;;  %v5996_v39 = vld [vmem:[%s6695_s27 + $0x3c4] sm:$0xf] }
 0x365   : > { %3838 = vmatmul.bf16.gmra.mxu3 %v4858_v62  ;;  %v4898_v62 = vor.u32 %v5992_v38, %v4897_v18 }
 0x366   : > { %4007 = vmatmul.bf16.gmra.mxu0 %v4862_v57  ;;  %v4118_v63 = vmax.f32 %v3966_v43, 0.0 }
 0x367   : > { %v3630_v46 = vpop.f32.mrf.mxu2 }
 0x368   : > { %v6250_v27 = vpack.c.bf16 %v4118_v63, %v4117_v20  ;;  %v3799_v23 = vpop.f32.mrf.mxu3  ;;  %v3631_v52 = vadd.f32 %v3630_v46, %v3462_v21 }
 0x369   : > { %v3463_v3 = vpop.f32.mrf.mxu1 }
 0x36a   : > { %6398 = vst [vmem:[%s7697_s11 + $0x10] sm:$0xff] %v6250_v27   ;;  %v3800_v53 = vadd.f32 %v3799_v23, %v3631_v52  ;;  %v3464_v16 = vadd.f32 %v3463_v3, %v7177_v30  ;;  %v5995_v52 = vld [vmem:[%s6695_s27 + $0x3bc] sm:$0xf] }
 0x36b   : > { %v3970_v44 = vpop.f32.mrf.mxu0 }
 0x36c   : > { %v3969_v57 = vadd.f32 %v3968_v36, %v3800_v53  ;;  %v4927_v53 = vld [vmem:[%s6695_s27 + $0x3e4] sm:$0xf0] }
 0x36e   : > { %v4119_v30 = vmax.f32 %v3969_v57, 0.0 }
 0x36f   : > { %v3632_v58 = vpop.f32.mrf.mxu2 }
 0x370   : > { %v3633_v2 = vadd.f32 %v3632_v58, %v3464_v16  ;;  %v3801_v28 = vpop.f32.mrf.mxu3  ;;  %v4933_v16 = vld [vmem:[%s6695_s27 + $0x3c8] sm:$0xf] }
 0x371   : > { %v3466_v32 = vpop.f32.mrf.mxu1 }
 0x372   : > { %v3802_v48 = vadd.f32 %v3801_v28, %v3633_v2  ;;  %v3467_v36 = vadd.f32 %v3466_v32, %v7183_v45  ;;  %v4926_v2 = vor.u32 %v6000_v0, %v4925_v47  ;;  %v4963_v0 = vld [vmem:[%s6695_s27 + $0x42c] sm:$0xf0] }
 0x373   : > { %v3973_v14 = vpop.f32.mrf.mxu0 }
 0x374   : > { %v3971_v43 = vadd.f32 %v3970_v44, %v3802_v48  ;;  %3505 = vmatmul.bf16.gmra.mxu1 %v4886_v11  ;;  %3674 = vmatmul.bf16.gmra.mxu2 %v4890_v15  ;;  %v4919_v44 = vld [vmem:[%s6695_s27 + $0x3dc] sm:$0xf0]  ;;  %v4930_v11 = vor.u32 %v5996_v39, %v4927_v53  ;;  %v4934_v15 = vor.u32 %v6001_v40, %v4933_v16  ;;  %v4969_v39 = vld [vmem:[%s6695_s27 + $0x410] sm:$0xf] }
 0x375   : > { %3843 = vmatmul.bf16.gmra.mxu3 %v4894_v29  ;;  %v4922_v45 = vor.u32 %v5995_v52, %v4919_v44  ;;  %v6005_v52 = vld [vmem:[%s6695_s27 + $0x40c] sm:$0xf] }
 0x376   : > { %4012 = vmatmul.bf16.gmra.mxu0 %v4898_v62  ;;  %v4120_v20 = vmax.f32 %v3971_v43, 0.0 }
 0x377   : > { %v3635_v63 = vpop.f32.mrf.mxu2 }
 0x378   : > { %v6255_v46 = vpack.c.bf16 %v4120_v20, %v4119_v30  ;;  %v3804_v27 = vpop.f32.mrf.mxu3  ;;  %v3636_v23 = vadd.f32 %v3635_v63, %v3467_v36 }
 0x379   : > { %v3468_v21 = vpop.f32.mrf.mxu1 }
 0x37a   : > { %6399 = vst [vmem:[%s7697_s11 + $0x18] sm:$0xff] %v6255_v46   ;;  %v3805_v4 = vadd.f32 %v3804_v27, %v3636_v23  ;;  %v3469_v49 = vadd.f32 %v3468_v21, %v7193_v17  ;;  %v6004_v27 = vld [vmem:[%s6695_s27 + $0x404] sm:$0xf]  ;;  %v4955_v21 = vld [vmem:[%s6695_s27 + $0x424] sm:$0xf0] }
 0x37b   : > { %v3975_v3 = vpop.f32.mrf.mxu0  ;;  %v4961_v23 = vld [vmem:[%s6695_s27 + $0x408] sm:$0xf] }
 0x37c   : > { %v3974_v32 = vadd.f32 %v3973_v14, %v3805_v4  ;;  %v6010_v4 = vld [vmem:[%s6695_s27 + $0x430] sm:$0xf0] }
 0x37e   : > { %v4121_v17 = vmax.f32 %v3974_v32, 0.0 }
 0x37f   : > { %v3637_v18 = vpop.f32.mrf.mxu2 }
 0x380   : > { %v3638_v38 = vadd.f32 %v3637_v18, %v3469_v49  ;;  %v3806_v58 = vpop.f32.mrf.mxu3 }
 0x381   : > { %v3471_v28 = vpop.f32.mrf.mxu1 }
 0x382   : > { %v3807_v29 = vadd.f32 %v3806_v58, %v3638_v38  ;;  %v3472_v14 = vadd.f32 %v3471_v28, %v7199_v10  ;;  %v4958_v10 = vor.u32 %v6004_v27, %v4955_v21  ;;  %v4966_v38 = vor.u32 %v6005_v52, %v4963_v0  ;;  %v4999_v21 = vld [vmem:[%s6695_s27 + $0x474] sm:$0xf0] }
 0x383   : > { %v3978_v62 = vpop.f32.mrf.mxu0  ;;  %v4970_v58 = vor.u32 %v6010_v4, %v4969_v39 }
 0x384   : > { %v3976_v57 = vadd.f32 %v3975_v3, %v3807_v29  ;;  %3510 = vmatmul.bf16.gmra.mxu1 %v4922_v45  ;;  %3679 = vmatmul.bf16.gmra.mxu2 %v4926_v2  ;;  %v6009_v3 = vld [vmem:[%s6695_s27 + $0x428] sm:$0xf0] }
 0x385   : > { %3848 = vmatmul.bf16.gmra.mxu3 %v4930_v11  ;;  %v4962_v40 = vor.u32 %v6009_v3, %v4961_v23  ;;  %v5005_v23 = vld [vmem:[%s6695_s27 + $0x458] sm:$0xf]  ;;  %v6019_v3 = vld [vmem:[%s6695_s27 + $0x478] sm:$0xf0] }
 0x386   : > { %4017 = vmatmul.bf16.gmra.mxu0 %v4934_v15  ;;  %v4122_v48 = vmax.f32 %v3976_v57, 0.0 }
 0x387   : > { %v3640_v43 = vpop.f32.mrf.mxu2 }
 0x388   : > { %v6260_v30 = vpack.c.bf16 %v4122_v48, %v4121_v17  ;;  %v3809_v20 = vpop.f32.mrf.mxu3  ;;  %v3641_v46 = vadd.f32 %v3640_v43, %v3472_v14  ;;  %v4991_v14 = vld [vmem:[%s6695_s27 + $0x46c] sm:$0xf0] }
 0x389   : > { %v3473_v63 = vpop.f32.mrf.mxu1 }
 0x38a   : > { %6400 = vst [vmem:[%s7697_s11 + $0x20] sm:$0xff] %v6260_v30   ;;  %v3810_v44 = vadd.f32 %v3809_v20, %v3641_v46  ;;  %v3474_v47 = vadd.f32 %v3473_v63, %v7209_v35  ;;  %v6013_v30 = vld [vmem:[%s6695_s27 + $0x44c] sm:$0xf]  ;;  %v4997_v20 = vld [vmem:[%s6695_s27 + $0x450] sm:$0xf] }
 0x38b   : > { %v3980_v36 = vpop.f32.mrf.mxu0  ;;  %v6018_v63 = vld [vmem:[%s6695_s27 + $0x470] sm:$0xf0] }
 0x38c   : > { %v3979_v45 = vadd.f32 %v3978_v62, %v3810_v44  ;;  %v6014_v46 = vld [vmem:[%s6695_s27 + $0x454] sm:$0xf]  ;;  %v4998_v0 = vor.u32 %v6018_v63, %v4997_v20 }
 0x38d   : > { %v5002_v4 = vor.u32 %v6014_v46, %v4999_v21 }
 0x38e   : > { %v4123_v35 = vmax.f32 %v3979_v45, 0.0 }
 0x38f   : > { %v3642_v49 = vpop.f32.mrf.mxu2 }
 0x390   : > { %v3643_v53 = vadd.f32 %v3642_v49, %v3474_v47  ;;  %v3811_v16 = vpop.f32.mrf.mxu3  ;;  %v5006_v49 = vor.u32 %v6019_v3, %v5005_v23 }
 0x391   : > { %v3476_v18 = vpop.f32.mrf.mxu1 }
 0x392   : > { %v3812_v2 = vadd.f32 %v3811_v16, %v3643_v53  ;;  %v3477_v62 = vadd.f32 %v3476_v18, %v7227_v51  ;;  %v4994_v51 = vor.u32 %v6013_v30, %v4991_v14  ;;  %v5041_v30 = vld [vmem:[%s6695_s27 + $0x4a0] sm:$0xf]  ;;  %v6028_v14 = vld [vmem:[%s6695_s27 + $0x4c0] sm:$0xf0] }
 0x393   : > { %v3983_v28 = vpop.f32.mrf.mxu0  ;;  %v5042_v23 = vor.u32 %v6028_v14, %v5041_v30 }
 0x394   : > { %v3981_v11 = vadd.f32 %v3980_v36, %v3812_v2  ;;  %3515 = vmatmul.bf16.gmra.mxu1 %v4958_v10  ;;  %3684 = vmatmul.bf16.gmra.mxu2 %v4962_v40 }
 0x395   : > { %3853 = vmatmul.bf16.gmra.mxu3 %v4966_v38 }
 0x396   : > { %4022 = vmatmul.bf16.gmra.mxu0 %v4970_v58  ;;  %v4124_v15 = vmax.f32 %v3981_v11, 0.0 }
 0x397   : > { %v3645_v32 = vpop.f32.mrf.mxu2 }
 0x398   : > { %v6265_v29 = vpack.c.bf16 %v4124_v15, %v4123_v35  ;;  %v3814_v57 = vpop.f32.mrf.mxu3  ;;  %v3646_v48 = vadd.f32 %v3645_v32, %v3477_v62  ;;  %v6022_v15 = vld [vmem:[%s6695_s27 + $0x494] sm:$0xf]  ;;  %v5027_v32 = vld [vmem:[%s6695_s27 + $0x4b4] sm:$0xf0]  ;;  %v6027_v62 = vld [vmem:[%s6695_s27 + $0x4b8] sm:$0xf0] }
 0x399   : > { %v3478_v17 = vpop.f32.mrf.mxu1 }
 0x39a   : > { %6401 = vst [vmem:[%s7697_s11 + $0x28] sm:$0xff] %v6265_v29   ;;  %v3815_v36 = vadd.f32 %v3814_v57, %v3646_v48  ;;  %v3479_v27 = vadd.f32 %v3478_v17, %v7237_v61  ;;  %v5033_v29 = vld [vmem:[%s6695_s27 + $0x498] sm:$0xf]  ;;  %v6023_v57 = vld [vmem:[%s6695_s27 + $0x49c] sm:$0xf] }
 0x39b   : > { %v3985_v43 = vpop.f32.mrf.mxu0 }
 0x39c   : > { %v3984_v53 = vadd.f32 %v3983_v28, %v3815_v36  ;;  %v5034_v36 = vor.u32 %v6027_v62, %v5033_v29 }
 0x39e   : > { %v4125_v61 = vmax.f32 %v3984_v53, 0.0 }
 0x39f   : > { %v3647_v52 = vpop.f32.mrf.mxu2 }
 0x3a0   : > { %v3648_v44 = vadd.f32 %v3647_v52, %v3479_v27  ;;  %v3816_v47 = vpop.f32.mrf.mxu3 }
 0x3a1   : > { %v3481_v39 = vpop.f32.mrf.mxu1 }
 0x3a2   : > { %v3817_v16 = vadd.f32 %v3816_v47, %v3648_v44  ;;  %v3482_v45 = vadd.f32 %v3481_v39, %v7243_v8  ;;  %v5030_v8 = vor.u32 %v6022_v15, %v5027_v32 }
 0x3a3   : > { %v3988_v10 = vpop.f32.mrf.mxu0 }
 0x3a4   : > { %v3986_v40 = vadd.f32 %v3985_v43, %v3817_v16  ;;  %3520 = vmatmul.bf16.gmra.mxu1 %v4994_v51  ;;  %3689 = vmatmul.bf16.gmra.mxu2 %v4998_v0  ;;  %v5035_v43 = vld [vmem:[%s6695_s27 + $0x4bc] sm:$0xf0] }
 0x3a5   : > { %3858 = vmatmul.bf16.gmra.mxu3 %v5002_v4  ;;  %v5038_v21 = vor.u32 %v6023_v57, %v5035_v43 }
 0x3a6   : > { %4027 = vmatmul.bf16.gmra.mxu0 %v5006_v49  ;;  %v4126_v18 = vmax.f32 %v3986_v40, 0.0  ;;  %v6031_v40 = vld [vmem:[%s6695_s27 + $0x4dc] sm:$0xf] }
 0x3a7   : > { %v3650_v38 = vpop.f32.mrf.mxu2 }
 0x3a8   : > { %v6270_v58 = vpack.c.bf16 %v4126_v18, %v4125_v61  ;;  %v3819_v2 = vpop.f32.mrf.mxu3  ;;  %v3651_v11 = vadd.f32 %v3650_v38, %v3482_v45  ;;  %v5063_v61 = vld [vmem:[%s6695_s27 + $0x4fc] sm:$0xf0]  ;;  %v6036_v38 = vld [vmem:[%s6695_s27 + $0x500] sm:$0xf0] }
 0x3a9   : > { %v3483_v28 = vpop.f32.mrf.mxu1  ;;  %v5069_v18 = vld [vmem:[%s6695_s27 + $0x4e0] sm:$0xf] }
 0x3aa   : > { %6402 = vst [vmem:[%s7697_s11 + $0x30] sm:$0xff] %v6270_v58   ;;  %v3820_v17 = vadd.f32 %v3819_v2, %v3651_v11  ;;  %v3484_v48 = vadd.f32 %v3483_v28, %v7253_v33  ;;  %v6032_v58 = vld [vmem:[%s6695_s27 + $0x4e4] sm:$0xf]  ;;  %v5071_v28 = vld [vmem:[%s6695_s27 + $0x504] sm:$0xf0]  ;;  %v5070_v62 = vor.u32 %v6036_v38, %v5069_v18 }
 0x3ab   : > { %v3990_v35 = vpop.f32.mrf.mxu0  ;;  %v5077_v11 = vld [vmem:[%s6695_s27 + $0x4e8] sm:$0xf] }
 0x3ac   : > { %v3989_v3 = vadd.f32 %v3988_v10, %v3820_v17  ;;  %v5074_v17 = vor.u32 %v6032_v58, %v5071_v28 }
 0x3ae   : > { %v4127_v33 = vmax.f32 %v3989_v3, 0.0 }
 0x3af   : > { %v3652_v20 = vpop.f32.mrf.mxu2 }
 0x3b0   : > { %v3653_v63 = vadd.f32 %v3652_v20, %v3484_v48  ;;  %v3821_v46 = vpop.f32.mrf.mxu3 }
 0x3b1   : > { %v3486_v27 = vpop.f32.mrf.mxu1 }
 0x3b2   : > { %v3822_v52 = vadd.f32 %v3821_v46, %v3653_v63  ;;  %v3487_v4 = vadd.f32 %v3486_v27, %v7259_v37  ;;  %v5066_v37 = vor.u32 %v6031_v40, %v5063_v61 }
 0x3b3   : > { %v3993_v44 = vpop.f32.mrf.mxu0 }
 0x3b4   : > { %v3991_v47 = vadd.f32 %v3990_v35, %v3822_v52  ;;  %3525 = vmatmul.bf16.gmra.mxu1 %v5030_v8  ;;  %3694 = vmatmul.bf16.gmra.mxu2 %v5034_v36  ;;  %v6037_v35 = vld [vmem:[%s6695_s27 + $0x508] sm:$0xf0]  ;;  %v6040_v52 = vld [vmem:[%s6695_s27 + $0x524] sm:$0xf] }
 0x3b5   : > { %3863 = vmatmul.bf16.gmra.mxu3 %v5038_v21  ;;  %v5078_v48 = vor.u32 %v6037_v35, %v5077_v11 }
 0x3b6   : > { %4032 = vmatmul.bf16.gmra.mxu0 %v5042_v23  ;;  %v4128_v51 = vmax.f32 %v3991_v47, 0.0  ;;  %v5105_v47 = vld [vmem:[%s6695_s27 + $0x528] sm:$0xf] }
 0x3b7   : > { %v3655_v0 = vpop.f32.mrf.mxu2 }
 0x3b8   : > { %v6275_v39 = vpack.c.bf16 %v4128_v51, %v4127_v33  ;;  %v3824_v49 = vpop.f32.mrf.mxu3  ;;  %v3656_v16 = vadd.f32 %v3655_v0, %v3487_v4  ;;  %v6045_v33 = vld [vmem:[%s6695_s27 + $0x548] sm:$0xf0]  ;;  %v5107_v4 = vld [vmem:[%s6695_s27 + $0x54c] sm:$0xf0] }
 0x3b9   : > { %v3488_v53 = vpop.f32.mrf.mxu1  ;;  %v6041_v51 = vld [vmem:[%s6695_s27 + $0x52c] sm:$0xf]  ;;  %v5106_v61 = vor.u32 %v6045_v33, %v5105_v47 }
 0x3ba   : > { %6403 = vst [vmem:[%s7697_s11 + $0x38] sm:$0xff] %v6275_v39   ;;  %v3825_v45 = vadd.f32 %v3824_v49, %v3656_v16  ;;  %v3489_v2 = vadd.f32 %v3488_v53, %v7269_v50  ;;  %v5113_v49 = vld [vmem:[%s6695_s27 + $0x530] sm:$0xf]  ;;  %v6046_v53 = vld [vmem:[%s6695_s27 + $0x550] sm:$0xf0]  ;;  %v5110_v38 = vor.u32 %v6041_v51, %v5107_v4 }
 0x3bb   : > { %v3995_v10 = vpop.f32.mrf.mxu0  ;;  %v5114_v58 = vor.u32 %v6046_v53, %v5113_v49 }
 0x3bc   : > { %v3994_v43 = vadd.f32 %v3993_v44, %v3825_v45  ;;  %v5099_v44 = vld [vmem:[%s6695_s27 + $0x544] sm:$0xf0] }
 0x3be   : > { %v4129_v50 = vmax.f32 %v3994_v43, 0.0  ;;  %v5135_v43 = vld [vmem:[%s6695_s27 + $0x58c] sm:$0xf0] }
 0x3bf   : > { %v3657_v15 = vpop.f32.mrf.mxu2 }
 0x3c0   : > { %v3658_v32 = vadd.f32 %v3657_v15, %v3489_v2  ;;  %v3826_v29 = vpop.f32.mrf.mxu3 }
 0x3c1   : > { %v3491_v57 = vpop.f32.mrf.mxu1 }
 0x3c2   : > { %v3827_v30 = vadd.f32 %v3826_v29, %v3658_v32  ;;  %v3492_v36 = vadd.f32 %v3491_v57, %v7275_v7  ;;  %v5102_v7 = vor.u32 %v6040_v52, %v5099_v44 }
 0x3c3   : > { %v3998_v14 = vpop.f32.mrf.mxu0 }
 0x3c4   : > { %v3996_v20 = vadd.f32 %v3995_v10, %v3827_v30  ;;  %3530 = vmatmul.bf16.gmra.mxu1 %v5066_v37  ;;  %3699 = vmatmul.bf16.gmra.mxu2 %v5070_v62  ;;  %v5141_v30 = vld [vmem:[%s6695_s27 + $0x570] sm:$0xf] }
 0x3c5   : > { %3868 = vmatmul.bf16.gmra.mxu3 %v5074_v17 }
 0x3c6   : > { %4037 = vmatmul.bf16.gmra.mxu0 %v5078_v48  ;;  %v4130_v63 = vmax.f32 %v3996_v20, 0.0  ;;  %v6049_v48 = vld [vmem:[%s6695_s27 + $0x56c] sm:$0xf]  ;;  %v6050_v20 = vld [vmem:[%s6695_s27 + $0x574] sm:$0xf] }
 0x3c7   : > { %v3660_v46 = vpop.f32.mrf.mxu2 }
 0x3c8   : > { %v6280_v8 = vpack.c.bf16 %v4130_v63, %v4129_v50  ;;  %v3829_v27 = vpop.f32.mrf.mxu3  ;;  %v3661_v23 = vadd.f32 %v3660_v46, %v3492_v36  ;;  %v5143_v46 = vld [vmem:[%s6695_s27 + $0x594] sm:$0xf0]  ;;  %v6055_v36 = vld [vmem:[%s6695_s27 + $0x598] sm:$0xf0] }
 0x3c9   : > { %v3493_v21 = vpop.f32.mrf.mxu1  ;;  %v5146_v44 = vor.u32 %v6050_v20, %v5143_v46 }
 0x3ca   : > { %6404 = vst [vmem:[%s7697_s11 + $0x40] sm:$0xff] %v6280_v8   ;;  %v3830_v0 = vadd.f32 %v3829_v27, %v3661_v23  ;;  %v3494_v39 = vadd.f32 %v3493_v21, %v7285_v12  ;;  %v5149_v8 = vld [vmem:[%s6695_s27 + $0x578] sm:$0xf] }
 0x3cb   : > { %v4000_v3 = vpop.f32.mrf.mxu0  ;;  %v5150_v47 = vor.u32 %v6055_v36, %v5149_v8 }
 0x3cc   : > { %v3999_v45 = vadd.f32 %v3998_v14, %v3830_v0  ;;  %v6054_v14 = vld [vmem:[%s6695_s27 + $0x590] sm:$0xf0] }
 0x3ce   : > { %v4131_v12 = vmax.f32 %v3999_v45, 0.0  ;;  %v6063_v45 = vld [vmem:[%s6695_s27 + $0x5d8] sm:$0xf0] }
 0x3cf   : > { %v3662_v16 = vpop.f32.mrf.mxu2 }
 0x3d0   : > { %v3663_v10 = vadd.f32 %v3662_v16, %v3494_v39  ;;  %v3831_v40 = vpop.f32.mrf.mxu3 }
 0x3d1   : > { %v3496_v18 = vpop.f32.mrf.mxu1 }
 0x3d2   : > { %v3832_v2 = vadd.f32 %v3831_v40, %v3663_v10  ;;  %v3497_v29 = vadd.f32 %v3496_v18, %v7303_v41  ;;  %v5138_v41 = vor.u32 %v6049_v48, %v5135_v43  ;;  %v6058_v18 = vld [vmem:[%s6695_s27 + $0x5b4] sm:$0xf] }
 0x3d3   : > { %v4003_v28 = vpop.f32.mrf.mxu0 }
 0x3d4   : > { %v4001_v11 = vadd.f32 %v4000_v3, %v3832_v2  ;;  %3535 = vmatmul.bf16.gmra.mxu1 %v5102_v7  ;;  %3704 = vmatmul.bf16.gmra.mxu2 %v5106_v61  ;;  %v5142_v3 = vor.u32 %v6054_v14, %v5141_v30  ;;  %v6059_v2 = vld [vmem:[%s6695_s27 + $0x5bc] sm:$0xf] }
 0x3d5   : > { %3873 = vmatmul.bf16.gmra.mxu3 %v5110_v38  ;;  %v5171_v38 = vld [vmem:[%s6695_s27 + $0x5d4] sm:$0xf0] }
 0x3d6   : > { %4042 = vmatmul.bf16.gmra.mxu0 %v5114_v58  ;;  %v4132_v35 = vmax.f32 %v4001_v11, 0.0  ;;  %v5177_v58 = vld [vmem:[%s6695_s27 + $0x5b8] sm:$0xf] }
 0x3d7   : > { %v3665_v15 = vpop.f32.mrf.mxu2 }
 0x3d8   : > { %v6285_v32 = vpack.c.bf16 %v4132_v35, %v4131_v12  ;;  %v3834_v37 = vpop.f32.mrf.mxu3  ;;  %v3666_v57 = vadd.f32 %v3665_v15, %v3497_v29  ;;  %v5179_v12 = vld [vmem:[%s6695_s27 + $0x5dc] sm:$0xf0]  ;;  %v6064_v15 = vld [vmem:[%s6695_s27 + $0x5e0] sm:$0xf0] }
 0x3d9   : > { %v3498_v62 = vpop.f32.mrf.mxu1  ;;  %v5185_v35 = vld [vmem:[%s6695_s27 + $0x5c0] sm:$0xf] }
 0x3da   : > { %6405 = vst [vmem:[%s7697_s11 + $0x48] sm:$0xff] %v6285_v32   ;;  %v3835_v50 = vadd.f32 %v3834_v37, %v3666_v57  ;;  %v3499_v63 = vadd.f32 %v3498_v62, %v7313_v22  ;;  %v5178_v62 = vor.u32 %v6063_v45, %v5177_v58  ;;  %v5186_v48 = vor.u32 %v6064_v15, %v5185_v35 }
 0x3db   : > { %v4005_v17 = vpop.f32.mrf.mxu0 }
 0x3dc   : > { %v4004_v33 = vadd.f32 %v4003_v28, %v3835_v50 }
 0x3de   : > { %v4133_v22 = vmax.f32 %v4004_v33, 0.0 }
 0x3df   : > { %v3667_v27 = vpop.f32.mrf.mxu2 }
 0x3e0   : > { %v3668_v21 = vadd.f32 %v3667_v27, %v3499_v63  ;;  %v3836_v23 = vpop.f32.mrf.mxu3 }
 0x3e1   : > { %v3501_v52 = vpop.f32.mrf.mxu1 }
 0x3e2   : > { %v3837_v51 = vadd.f32 %v3836_v23, %v3668_v21  ;;  %v3502_v16 = vadd.f32 %v3501_v52, %v7319_v55  ;;  %v5174_v55 = vor.u32 %v6058_v18, %v5171_v38  ;;  %v5213_v52 = vld [vmem:[%s6695_s27 + $0x600] sm:$0xf] }
 0x3e3   : > { %v4008_v0 = vpop.f32.mrf.mxu0 }
 0x3e4   : > { %v4006_v39 = vadd.f32 %v4005_v17, %v3837_v51  ;;  %3540 = vmatmul.bf16.gmra.mxu1 %v5138_v41  ;;  %3709 = vmatmul.bf16.gmra.mxu2 %v5142_v3  ;;  %v5182_v17 = vor.u32 %v6059_v2, %v5179_v12  ;;  %v6067_v41 = vld [vmem:[%s6695_s27 + $0x5fc] sm:$0xf]  ;;  %v5207_v3 = vld [vmem:[%s6695_s27 + $0x61c] sm:$0xf0] }
 0x3e5   : > { %3878 = vmatmul.bf16.gmra.mxu3 %v5146_v44  ;;  %v6072_v44 = vld [vmem:[%s6695_s27 + $0x620] sm:$0xf0] }
 0x3e6   : > { %4047 = vmatmul.bf16.gmra.mxu0 %v5150_v47  ;;  %v4134_v4 = vmax.f32 %v4006_v39, 0.0  ;;  %v6068_v47 = vld [vmem:[%s6695_s27 + $0x604] sm:$0xf]  ;;  %v5221_v39 = vld [vmem:[%s6695_s27 + $0x608] sm:$0xf] }
 0x3e7   : > { %v3670_v49 = vpop.f32.mrf.mxu2 }
 0x3e8   : > { %v6290_v53 = vpack.c.bf16 %v4134_v4, %v4133_v22  ;;  %v3839_v10 = vpop.f32.mrf.mxu3  ;;  %v3671_v7 = vadd.f32 %v3670_v49, %v3502_v16  ;;  %v6073_v22 = vld [vmem:[%s6695_s27 + $0x628] sm:$0xf0]  ;;  %v5214_v16 = vor.u32 %v6072_v44, %v5213_v52 }
 0x3e9   : > { %v3503_v40 = vpop.f32.mrf.mxu1 }
 0x3ea   : > { %6406 = vst [vmem:[%s7697_s11 + $0x50] sm:$0xff] %v6290_v53   ;;  %v3840_v28 = vadd.f32 %v3839_v10, %v3671_v7  ;;  %v3504_v11 = vadd.f32 %v3503_v40, %v7329_v59  ;;  %v5222_v7 = vor.u32 %v6073_v22, %v5221_v39  ;;  %v6085_v22 = vld [vmem:[%s6695_s27 + $0x68c] sm:$0xf] }
 0x3eb   : > { %v4010_v61 = vpop.f32.mrf.mxu0 }
 0x3ec   : > { %v4009_v43 = vadd.f32 %v4008_v0, %v3840_v28  ;;  %v5215_v0 = vld [vmem:[%s6695_s27 + $0x624] sm:$0xf0] }
 0x3ed   : > { %v5218_v40 = vor.u32 %v6068_v47, %v5215_v0 }
 0x3ee   : > { %v4135_v59 = vmax.f32 %v4009_v43, 0.0  ;;  %v5251_v43 = vld [vmem:[%s6695_s27 + $0x66c] sm:$0xf0] }
 0x3ef   : > { %v3672_v32 = vpop.f32.mrf.mxu2 }
 0x3f0   : > { %v3673_v29 = vadd.f32 %v3672_v32, %v3504_v11  ;;  %v3841_v37 = vpop.f32.mrf.mxu3 }
 0x3f1   : > { %v3506_v57 = vpop.f32.mrf.mxu1 }
 0x3f2   : > { %v3842_v30 = vadd.f32 %v3841_v37, %v3673_v29  ;;  %v3507_v8 = vadd.f32 %v3506_v57, %v7335_v42  ;;  %v5210_v42 = vor.u32 %v6067_v41, %v5207_v3  ;;  %v6076_v29 = vld [vmem:[%s6695_s27 + $0x644] sm:$0xf]  ;;  %v5243_v37 = vld [vmem:[%s6695_s27 + $0x664] sm:$0xf0]  ;;  %v6077_v57 = vld [vmem:[%s6695_s27 + $0x64c] sm:$0xf] }
 0x3f3   : > { %v4013_v14 = vpop.f32.mrf.mxu0 }
 0x3f4   : > { %v4011_v20 = vadd.f32 %v4010_v61, %v3842_v30  ;;  %3545 = vmatmul.bf16.gmra.mxu1 %v5174_v55  ;;  %3714 = vmatmul.bf16.gmra.mxu2 %v5178_v62  ;;  %v5249_v55 = vld [vmem:[%s6695_s27 + $0x648] sm:$0xf]  ;;  %v6081_v62 = vld [vmem:[%s6695_s27 + $0x668] sm:$0xf0]  ;;  %v5257_v30 = vld [vmem:[%s6695_s27 + $0x650] sm:$0xf] }
 0x3f5   : > { %3883 = vmatmul.bf16.gmra.mxu3 %v5182_v17 }
 0x3f6   : > { %4052 = vmatmul.bf16.gmra.mxu0 %v5186_v48  ;;  %v4136_v50 = vmax.f32 %v4011_v20, 0.0 }
 0x3f7   : > { %v3675_v63 = vpop.f32.mrf.mxu2 }
 0x3f8   : > { %v6295_v46 = vpack.c.bf16 %v4136_v50, %v4135_v59  ;;  %v3844_v36 = vpop.f32.mrf.mxu3  ;;  %v3676_v21 = vadd.f32 %v3675_v63, %v3507_v8  ;;  %v5250_v63 = vor.u32 %v6081_v62, %v5249_v55  ;;  %v5254_v8 = vor.u32 %v6077_v57, %v5251_v43  ;;  %v6094_v43 = vld [vmem:[%s6695_s27 + $0x6d4] sm:$0xf] }
 0x3f9   : > { %v3508_v27 = vpop.f32.mrf.mxu1 }
 0x3fa   : > { %6407 = vst [vmem:[%s7697_s11 + $0x58] sm:$0xff] %v6295_v46   ;;  %v3845_v33 = vadd.f32 %v3844_v36, %v3676_v21  ;;  %v3509_v51 = vadd.f32 %v3508_v27, %v7345_v5 }
 0x3fb   : > { %v4015_v23 = vpop.f32.mrf.mxu0 }
 0x3fc   : > { %v4014_v61 = vadd.f32 %v4013_v14, %v3845_v33  ;;  %v6082_v14 = vld [vmem:[%s6695_s27 + $0x670] sm:$0xf0] }
 0x3fd   : > { %v5258_v36 = vor.u32 %v6082_v14, %v5257_v30  ;;  %v5315_v30 = vld [vmem:[%s6695_s27 + $0x6f4] sm:$0xf0] }
 0x3fe   : > { %v4137_v5 = vmax.f32 %v4014_v61, 0.0  ;;  %v6091_v61 = vld [vmem:[%s6695_s27 + $0x6b8] sm:$0xf0]  ;;  %v5321_v14 = vld [vmem:[%s6695_s27 + $0x6d8] sm:$0xf] }
 0x3ff   : > { %v3677_v4 = vpop.f32.mrf.mxu2 }
 0x400   : > { %v3678_v49 = vadd.f32 %v3677_v4, %v3509_v51  ;;  %v3846_v53 = vpop.f32.mrf.mxu3  ;;  %v5279_v4 = vld [vmem:[%s6695_s27 + $0x6ac] sm:$0xf0] }
 0x401   : > { %v3511_v10 = vpop.f32.mrf.mxu1 }
 0x402   : > { %v3847_v18 = vadd.f32 %v3846_v53, %v3678_v49  ;;  %v3512_v11 = vadd.f32 %v3511_v10, %v7351_v31  ;;  %v5246_v31 = vor.u32 %v6076_v29, %v5243_v37  ;;  %v5285_v49 = vld [vmem:[%s6695_s27 + $0x690] sm:$0xf]  ;;  %v6090_v53 = vld [vmem:[%s6695_s27 + $0x6b0] sm:$0xf0] }
 0x403   : > { %v4018_v38 = vpop.f32.mrf.mxu0 }
 0x404   : > { %v4016_v58 = vadd.f32 %v4015_v23, %v3847_v18  ;;  %3550 = vmatmul.bf16.gmra.mxu1 %v5210_v42  ;;  %3719 = vmatmul.bf16.gmra.mxu2 %v5214_v16  ;;  %v6086_v42 = vld [vmem:[%s6695_s27 + $0x694] sm:$0xf] }
 0x405   : > { %3888 = vmatmul.bf16.gmra.mxu3 %v5218_v40  ;;  %v5287_v40 = vld [vmem:[%s6695_s27 + $0x6b4] sm:$0xf0] }
 0x406   : > { %4057 = vmatmul.bf16.gmra.mxu0 %v5222_v7  ;;  %v4138_v45 = vmax.f32 %v4016_v58, 0.0  ;;  %v5293_v7 = vld [vmem:[%s6695_s27 + $0x698] sm:$0xf] }
 0x407   : > { %v3680_v2 = vpop.f32.mrf.mxu2 }
 0x408   : > { %v6300_v28 = vpack.c.bf16 %v4138_v45, %v4137_v5  ;;  %v3849_v12 = vpop.f32.mrf.mxu3  ;;  %v3681_v15 = vadd.f32 %v3680_v2, %v3512_v11  ;;  %v5286_v5 = vor.u32 %v6090_v53, %v5285_v49  ;;  %v5290_v2 = vor.u32 %v6086_v42, %v5287_v40  ;;  %v5357_v40 = vld [vmem:[%s6695_s27 + $0x720] sm:$0xf] }
 0x409   : > { %v3513_v35 = vpop.f32.mrf.mxu1 }
 0x40a   : > { %6408 = vst [vmem:[%s7697_s11 + $0x60] sm:$0xff] %v6300_v28   ;;  %v3850_v17 = vadd.f32 %v3849_v12, %v3681_v15  ;;  %v3514_v48 = vadd.f32 %v3513_v35, %v7361_v34  ;;  %v5294_v28 = vor.u32 %v6091_v61, %v5293_v7  ;;  %v6108_v7 = vld [vmem:[%s6695_s27 + $0x740] sm:$0xf0] }
 0x40b   : > { %v4020_v32 = vpop.f32.mrf.mxu0  ;;  %v6104_v61 = vld [vmem:[%s6695_s27 + $0x724] sm:$0xf] }
 0x40c   : > { %v4019_v27 = vadd.f32 %v4018_v38, %v3850_v17 }
 0x40e   : > { %v4139_v34 = vmax.f32 %v4019_v27, 0.0 }
 0x40f   : > { %v3682_v20 = vpop.f32.mrf.mxu2 }
 0x410   : > { %v3683_v59 = vadd.f32 %v3682_v20, %v3514_v48  ;;  %v3851_v50 = vpop.f32.mrf.mxu3  ;;  %v6099_v20 = vld [vmem:[%s6695_s27 + $0x6f8] sm:$0xf0] }
 0x411   : > { %v3516_v46 = vpop.f32.mrf.mxu1 }
 0x412   : > { %v3852_v21 = vadd.f32 %v3851_v50, %v3683_v59  ;;  %v3517_v47 = vadd.f32 %v3516_v46, %v7384_v19  ;;  %v5282_v19 = vor.u32 %v6085_v22, %v5279_v4  ;;  %v6095_v59 = vld [vmem:[%s6695_s27 + $0x6dc] sm:$0xf]  ;;  %v5329_v46 = vld [vmem:[%s6695_s27 + $0x6e0] sm:$0xf] }
 0x413   : > { %v4023_v23 = vpop.f32.mrf.mxu0 }
 0x414   : > { %v4021_v41 = vadd.f32 %v4020_v32, %v3852_v21  ;;  %3555 = vmatmul.bf16.gmra.mxu1 %v5246_v31  ;;  %3724 = vmatmul.bf16.gmra.mxu2 %v5250_v63  ;;  %v5323_v63 = vld [vmem:[%s6695_s27 + $0x6fc] sm:$0xf0] }
 0x415   : > { %3893 = vmatmul.bf16.gmra.mxu3 %v5254_v8  ;;  %v6100_v8 = vld [vmem:[%s6695_s27 + $0x700] sm:$0xf0] }
 0x416   : > { %4062 = vmatmul.bf16.gmra.mxu0 %v5258_v36  ;;  %v4140_v3 = vmax.f32 %v4021_v41, 0.0 }
 0x417   : > { %v3685_v52 = vpop.f32.mrf.mxu2 }
 0x418   : > { %v6305_v44 = vpack.c.bf16 %v4140_v3, %v4139_v34  ;;  %v3854_v33 = vpop.f32.mrf.mxu3  ;;  %v3686_v0 = vadd.f32 %v3685_v52, %v3517_v47  ;;  %v5326_v34 = vor.u32 %v6095_v59, %v5323_v63  ;;  %v5330_v3 = vor.u32 %v6100_v8, %v5329_v46  ;;  %v5387_v59 = vld [vmem:[%s6695_s27 + $0x784] sm:$0xf0]  ;;  %v6113_v63 = vld [vmem:[%s6695_s27 + $0x76c] sm:$0xf] }
 0x419   : > { %v3518_v51 = vpop.f32.mrf.mxu1 }
 0x41a   : > { %6409 = vst [vmem:[%s7697_s11 + $0x68] sm:$0xff] %v6305_v44   ;;  %v3855_v16 = vadd.f32 %v3854_v33, %v3686_v0  ;;  %v3519_v10 = vadd.f32 %v3518_v51, %v7394_v56 }
 0x41b   : > { %v4025_v39 = vpop.f32.mrf.mxu0 }
 0x41c   : > { %v4024_v11 = vadd.f32 %v4023_v23, %v3855_v16  ;;  %v5322_v23 = vor.u32 %v6099_v20, %v5321_v14  ;;  %v6103_v16 = vld [vmem:[%s6695_s27 + $0x71c] sm:$0xf]  ;;  %v6112_v20 = vld [vmem:[%s6695_s27 + $0x764] sm:$0xf] }
 0x41e   : > { %v4141_v56 = vmax.f32 %v4024_v11, 0.0  ;;  %v5358_v11 = vor.u32 %v6108_v7, %v5357_v40  ;;  %v5423_v40 = vld [vmem:[%s6695_s27 + $0x7cc] sm:$0xf0] }
 0x41f   : > { %v3687_v18 = vpop.f32.mrf.mxu2  ;;  %v5429_v7 = vld [vmem:[%s6695_s27 + $0x7b0] sm:$0xf] }
 0x420   : > { %v3688_v38 = vadd.f32 %v3687_v18, %v3519_v10  ;;  %v3856_v58 = vpop.f32.mrf.mxu3  ;;  %v5351_v10 = vld [vmem:[%s6695_s27 + $0x73c] sm:$0xf0] }
 0x421   : > { %v3521_v45 = vpop.f32.mrf.mxu1 }
 0x422   : > { %v3857_v12 = vadd.f32 %v3856_v58, %v3688_v38  ;;  %v3522_v55 = vadd.f32 %v3521_v45, %v7400_v6  ;;  %v5318_v6 = vor.u32 %v6094_v43, %v5315_v30  ;;  %v5359_v58 = vld [vmem:[%s6695_s27 + $0x744] sm:$0xf0] }
 0x423   : > { %v4028_v35 = vpop.f32.mrf.mxu0 }
 0x424   : > { %v4026_v15 = vadd.f32 %v4025_v39, %v3857_v12  ;;  %3560 = vmatmul.bf16.gmra.mxu1 %v5282_v19  ;;  %3729 = vmatmul.bf16.gmra.mxu2 %v5286_v5  ;;  %v5365_v19 = vld [vmem:[%s6695_s27 + $0x728] sm:$0xf]  ;;  %v6109_v5 = vld [vmem:[%s6695_s27 + $0x748] sm:$0xf0] }
 0x425   : > { %3898 = vmatmul.bf16.gmra.mxu3 %v5290_v2 }
 0x426   : > { %4067 = vmatmul.bf16.gmra.mxu0 %v5294_v28  ;;  %v4142_v32 = vmax.f32 %v4026_v15, 0.0  ;;  %v5366_v15 = vor.u32 %v6109_v5, %v5365_v19  ;;  %v5431_v19 = vld [vmem:[%s6695_s27 + $0x7d4] sm:$0xf0] }
 0x427   : > { %v3690_v29 = vpop.f32.mrf.mxu2  ;;  %v5437_v5 = vld [vmem:[%s6695_s27 + $0x7b8] sm:$0xf] }
 0x428   : > { %v6310_v37 = vpack.c.bf16 %v4142_v32, %v4141_v56  ;;  %v3859_v62 = vpop.f32.mrf.mxu3  ;;  %v3691_v17 = vadd.f32 %v3690_v29, %v3522_v55 }
 0x429   : > { %v3523_v57 = vpop.f32.mrf.mxu1 }
 0x42a   : > { %6410 = vst [vmem:[%s7697_s11 + $0x70] sm:$0xff] %v6310_v37   ;;  %v3860_v50 = vadd.f32 %v3859_v62, %v3691_v17  ;;  %v3524_v31 = vadd.f32 %v3523_v57, %v7410_v25 }
 0x42b   : > { %v4030_v48 = vpop.f32.mrf.mxu0 }
 0x42c   : > { %v4029_v52 = vadd.f32 %v4028_v35, %v3860_v50  ;;  %v5362_v35 = vor.u32 %v6104_v61, %v5359_v58  ;;  %v5393_v50 = vld [vmem:[%s6695_s27 + $0x768] sm:$0xf]  ;;  %v6126_v61 = vld [vmem:[%s6695_s27 + $0x7d0] sm:$0xf0] }
 0x42e   : > { %v4143_v25 = vmax.f32 %v4029_v52, 0.0 }
 0x42f   : > { %v3692_v36 = vpop.f32.mrf.mxu2 }
 0x430   : > { %v3693_v27 = vadd.f32 %v3692_v36, %v3524_v31  ;;  %v3861_v21 = vpop.f32.mrf.mxu3  ;;  %v6117_v31 = vld [vmem:[%s6695_s27 + $0x788] sm:$0xf0]  ;;  %v5395_v36 = vld [vmem:[%s6695_s27 + $0x78c] sm:$0xf0] }
 0x431   : > { %v3526_v41 = vpop.f32.mrf.mxu1  ;;  %v5398_v52 = vor.u32 %v6113_v63, %v5395_v36  ;;  %v5467_v36 = vld [vmem:[%s6695_s27 + $0x81c] sm:$0xf0] }
 0x432   : > { %v3862_v44 = vadd.f32 %v3861_v21, %v3693_v27  ;;  %v3527_v22 = vadd.f32 %v3526_v41, %v7416_v24  ;;  %v5354_v24 = vor.u32 %v6103_v16, %v5351_v10  ;;  %v5401_v27 = vld [vmem:[%s6695_s27 + $0x770] sm:$0xf]  ;;  %v6118_v21 = vld [vmem:[%s6695_s27 + $0x790] sm:$0xf0]  ;;  %v6121_v10 = vld [vmem:[%s6695_s27 + $0x7ac] sm:$0xf] }
 0x433   : > { %v4033_v47 = vpop.f32.mrf.mxu0 }
 0x434   : > { %v4031_v33 = vadd.f32 %v4030_v48, %v3862_v44  ;;  %3565 = vmatmul.bf16.gmra.mxu1 %v5318_v6  ;;  %3734 = vmatmul.bf16.gmra.mxu2 %v5322_v23  ;;  %v5402_v44 = vor.u32 %v6118_v21, %v5401_v27  ;;  %v5473_v27 = vld [vmem:[%s6695_s27 + $0x800] sm:$0xf]  ;;  %v6136_v21 = vld [vmem:[%s6695_s27 + $0x820] sm:$0xf0] }
 0x435   : > { %3903 = vmatmul.bf16.gmra.mxu3 %v5326_v34  ;;  %v5394_v34 = vor.u32 %v6117_v31, %v5393_v50  ;;  %v6135_v50 = vld [vmem:[%s6695_s27 + $0x818] sm:$0xf0] }
 0x436   : > { %4072 = vmatmul.bf16.gmra.mxu0 %v5330_v3  ;;  %v4144_v51 = vmax.f32 %v4031_v33, 0.0  ;;  %v6131_v31 = vld [vmem:[%s6695_s27 + $0x7fc] sm:$0xf] }
 0x437   : > { %v3695_v0 = vpop.f32.mrf.mxu2 }
 0x438   : > { %v6315_v39 = vpack.c.bf16 %v4144_v51, %v4143_v25  ;;  %v3864_v4 = vpop.f32.mrf.mxu3  ;;  %v3696_v53 = vadd.f32 %v3695_v0, %v3527_v22 }
 0x439   : > { %v3528_v49 = vpop.f32.mrf.mxu1 }
 0x43a   : > { %6411 = vst [vmem:[%s7697_s11 + $0x78] sm:$0xff] %v6315_v39   ;;  %v3865_v18 = vadd.f32 %v3864_v4, %v3696_v53  ;;  %v3529_v38 = vadd.f32 %v3528_v49, %v7426_v60 }
 0x43b   : > { %v4035_v42 = vpop.f32.mrf.mxu0 }
 0x43c   : > { %v4034_v56 = vadd.f32 %v4033_v47, %v3865_v18  ;;  %v6122_v18 = vld [vmem:[%s6695_s27 + $0x7b4] sm:$0xf] }
 0x43e   : > { %v4145_v60 = vmax.f32 %v4034_v56, 0.0 }
 0x43f   : > { %v3697_v45 = vpop.f32.mrf.mxu2 }
 0x440   : > { %v3698_v2 = vadd.f32 %v3697_v45, %v3529_v38  ;;  %v3866_v28 = vpop.f32.mrf.mxu3  ;;  %v6127_v45 = vld [vmem:[%s6695_s27 + $0x7d8] sm:$0xf0] }
 0x441   : > { %v3531_v12 = vpop.f32.mrf.mxu1 }
 0x442   : > { %v3867_v32 = vadd.f32 %v3866_v28, %v3698_v2  ;;  %v3532_v17 = vadd.f32 %v3531_v12, %v7432_v13  ;;  %v5390_v13 = vor.u32 %v6112_v20, %v5387_v59  ;;  %v5459_v20 = vld [vmem:[%s6695_s27 + $0x814] sm:$0xf0] }
 0x443   : > { %v4038_v29 = vpop.f32.mrf.mxu0  ;;  %v5465_v59 = vld [vmem:[%s6695_s27 + $0x7f8] sm:$0xf] }
 0x444   : > { %v4036_v37 = vadd.f32 %v4035_v42, %v3867_v32  ;;  %3570 = vmatmul.bf16.gmra.mxu1 %v5354_v24  ;;  %3739 = vmatmul.bf16.gmra.mxu2 %v5358_v11  ;;  %v5430_v11 = vor.u32 %v6126_v61, %v5429_v7  ;;  %v5501_v7 = vld [vmem:[%s6695_s27 + $0x840] sm:$0xf]  ;;  %v6144_v61 = vld [vmem:[%s6695_s27 + $0x860] sm:$0xf0] }
 0x445   : > { %3908 = vmatmul.bf16.gmra.mxu3 %v5362_v35  ;;  %v5434_v35 = vor.u32 %v6122_v18, %v5431_v19  ;;  %v6140_v18 = vld [vmem:[%s6695_s27 + $0x844] sm:$0xf] }
 0x446   : > { %4077 = vmatmul.bf16.gmra.mxu0 %v5366_v15  ;;  %v4146_v55 = vmax.f32 %v4036_v37, 0.0  ;;  %v5438_v15 = vor.u32 %v6127_v45, %v5437_v5  ;;  %v5503_v5 = vld [vmem:[%s6695_s27 + $0x864] sm:$0xf0] }
 0x447   : > { %v3700_v62 = vpop.f32.mrf.mxu2  ;;  %v5509_v45 = vld [vmem:[%s6695_s27 + $0x848] sm:$0xf] }
 0x448   : > { %v6320_v57 = vpack.c.bf16 %v4146_v55, %v4145_v60  ;;  %v3869_v48 = vpop.f32.mrf.mxu3  ;;  %v3701_v30 = vadd.f32 %v3700_v62, %v3532_v17 }
 0x449   : > { %v3533_v43 = vpop.f32.mrf.mxu1 }
 0x44a   : > { %6412 = vst [vmem:[%s7697_s11 + $0x80] sm:$0xff] %v6320_v57   ;;  %v3870_v46 = vadd.f32 %v3869_v48, %v3701_v30  ;;  %v3534_v8 = vadd.f32 %v3533_v43, %v7442_v9 }
 0x44b   : > { %v4040_v14 = vpop.f32.mrf.mxu0 }
 0x44c   : > { %v4039_v47 = vadd.f32 %v4038_v29, %v3870_v46  ;;  %v8084_v46 = vld [vmem:[#allocation28_spill] sm:$0xff] }
 0x44e   : > { %v4147_v9 = vmax.f32 %v4039_v47, 0.0 }
 0x44f   : > { %v3702_v6 = vpop.f32.mrf.mxu2 }
 0x450   : > { %v3703_v23 = vadd.f32 %v3702_v6, %v3534_v8  ;;  %v3871_v41 = vpop.f32.mrf.mxu3 }
 0x451   : > { %v3536_v3 = vpop.f32.mrf.mxu1 }
 0x452   : > { %v3872_v33 = vadd.f32 %v3871_v41, %v3703_v23  ;;  %v3537_v4 = vadd.f32 %v3536_v3, %v7460_v1  ;;  %v5426_v1 = vor.u32 %v6121_v10, %v5423_v40  ;;  %v5470_v3 = vor.u32 %v6131_v31, %v5467_v36  ;;  %v6139_v10 = vld [vmem:[%s6695_s27 + $0x83c] sm:$0xf]  ;;  %v5495_v40 = vld [vmem:[%s6695_s27 + $0x85c] sm:$0xf0]  ;;  %v5537_v31 = vld [vmem:[%s6695_s27 + $0x888] sm:$0xf] }
 0x453   : > { %v4043_v25 = vpop.f32.mrf.mxu0  ;;  %v8088_v36 = vld [vmem:[#allocation19_spill] sm:$0xff] }
 0x454   : > { %v4041_v51 = vadd.f32 %v4040_v14, %v3872_v33  ;;  %3575 = vmatmul.bf16.gmra.mxu1 %v5390_v13  ;;  %3744 = vmatmul.bf16.gmra.mxu2 %v5394_v34  ;;  %v6130_v14 = vld [vmem:[%s6695_s27 + $0x7f4] sm:$0xf]  ;;  %v5466_v13 = vor.u32 %v6135_v50, %v5465_v59  ;;  %v6148_v59 = vld [vmem:[%s6695_s27 + $0x884] sm:$0xf]  ;;  %v5531_v50 = vld [vmem:[%s6695_s27 + $0x8a4] sm:$0xf0] }
 0x455   : > { %3913 = vmatmul.bf16.gmra.mxu3 %v5398_v52  ;;  %v5474_v52 = vor.u32 %v6136_v21, %v5473_v27  ;;  %v5539_v21 = vld [vmem:[%s6695_s27 + $0x8ac] sm:$0xf0] }
 0x456   : > { %4082 = vmatmul.bf16.gmra.mxu0 %v5402_v44  ;;  %v4148_v0 = vmax.f32 %v4041_v51, 0.0 }
 0x457   : > { %v3705_v39 = vpop.f32.mrf.mxu2 }
 0x458   : > { %v6325_v22 = vpack.c.bf16 %v4148_v0, %v4147_v9  ;;  %v3874_v49 = vpop.f32.mrf.mxu3  ;;  %v3706_v42 = vadd.f32 %v3705_v39, %v3537_v4 }
 0x459   : > { %v3538_v53 = vpop.f32.mrf.mxu1 }
 0x45a   : > { %6413 = vst [vmem:[%s7697_s11 + $0x88] sm:$0xff] %v6325_v22   ;;  %v3875_v38 = vadd.f32 %v3874_v49, %v3706_v42  ;;  %v3539_v58 = vadd.f32 %v3538_v53, %v7470_v26  ;;  %v8085_v22 = vld [vmem:[#allocation29_spill] sm:$0xff] }
 0x45b   : > { %v4045_v16 = vpop.f32.mrf.mxu0 }
 0x45c   : > { %v4044_v56 = vadd.f32 %v4043_v25, %v3875_v38 }
 0x45e   : > { %v4149_v26 = vmax.f32 %v4044_v56, 0.0 }
 0x45f   : > { %v3707_v2 = vpop.f32.mrf.mxu2 }
 0x460   : > { %v3708_v28 = vadd.f32 %v3707_v2, %v3539_v58  ;;  %v3876_v24 = vpop.f32.mrf.mxu3  ;;  %v8086_v58 = vld [vmem:[#allocation15_spill] sm:$0xff]  ;;  %v6145_v2 = vld [vmem:[%s6695_s27 + $0x868] sm:$0xf0] }
 0x461   : > { %v3541_v12 = vpop.f32.mrf.mxu1  ;;  %v5510_v56 = vor.u32 %v6145_v2, %v5509_v45  ;;  %v5575_v2 = vld [vmem:[%s6695_s27 + $0x8f4] sm:$0xf0] }
 0x462   : > { %v3877_v32 = vadd.f32 %v3876_v24, %v3708_v28  ;;  %v3542_v57 = vadd.f32 %v3541_v12, %v7476_v54  ;;  %v5462_v54 = vor.u32 %v6130_v14, %v5459_v20  ;;  %v5502_v12 = vor.u32 %v6144_v61, %v5501_v7  ;;  %v6157_v7 = vld [vmem:[%s6695_s27 + $0x8cc] sm:$0xf]  ;;  %v5567_v61 = vld [vmem:[%s6695_s27 + $0x8ec] sm:$0xf0] }
 0x463   : > { %v4048_v29 = vpop.f32.mrf.mxu0 }
 0x464   : > { %v4046_v37 = vadd.f32 %v4045_v16, %v3877_v32  ;;  %3580 = vmatmul.bf16.gmra.mxu1 %v5426_v1  ;;  %3749 = vmatmul.bf16.gmra.mxu2 %v5430_v11  ;;  %v5498_v11 = vor.u32 %v6139_v10, %v5495_v40 }
 0x465   : > { %3918 = vmatmul.bf16.gmra.mxu3 %v5434_v35 }
 0x466   : > { %4087 = vmatmul.bf16.gmra.mxu0 %v5438_v15  ;;  %v4150_v60 = vmax.f32 %v4046_v37, 0.0  ;;  %v5506_v15 = vor.u32 %v6140_v18, %v5503_v5  ;;  %v5573_v18 = vld [vmem:[%s6695_s27 + $0x8d0] sm:$0xf] }
 0x467   : > { %v3710_v55 = vpop.f32.mrf.mxu2  ;;  %v8090_v5 = vld [vmem:[#allocation23_spill] sm:$0xff] }
 0x468   : > { %v6330_v62 = vpack.c.bf16 %v4150_v60, %v4149_v26  ;;  %v3879_v17 = vpop.f32.mrf.mxu3  ;;  %v3711_v43 = vadd.f32 %v3710_v55, %v3542_v57 }
 0x469   : > { %v3543_v48 = vpop.f32.mrf.mxu1 }
 0x46a   : > { %6414 = vst [vmem:[%s7697_s11 + $0x90] sm:$0xff] %v6330_v62   ;;  %v3880_v63 = vadd.f32 %v3879_v17, %v3711_v43  ;;  %v3544_v8 = vadd.f32 %v3543_v48, %v8084_v46  ;;  %v8087_v17 = vld [vmem:[#allocation17_spill] sm:$0xff]  ;;  %v6149_v46 = vld [vmem:[%s6695_s27 + $0x88c] sm:$0xf] }
 0x46b   : > { %v4050_v30 = vpop.f32.mrf.mxu0 }
 0x46c   : > { %v4049_v44 = vadd.f32 %v4048_v29, %v3880_v63  ;;  %v6153_v63 = vld [vmem:[%s6695_s27 + $0x8a8] sm:$0xf0] }
 0x46e   : > { %v4151_v51 = vmax.f32 %v4049_v44, 0.0  ;;  %v5542_v44 = vor.u32 %v6149_v46, %v5539_v21 }
 0x46f   : > { %v3712_v6 = vpop.f32.mrf.mxu2 }
 0x470   : > { %v3713_v23 = vadd.f32 %v3712_v6, %v3544_v8  ;;  %v3881_v41 = vpop.f32.mrf.mxu3  ;;  %v5545_v6 = vld [vmem:[%s6695_s27 + $0x890] sm:$0xf] }
 0x471   : > { %v3546_v34 = vpop.f32.mrf.mxu1 }
 0x472   : > { %v3882_v47 = vadd.f32 %v3881_v41, %v3713_v23  ;;  %v3547_v4 = vadd.f32 %v3546_v34, %v8085_v22  ;;  %v6154_v23 = vld [vmem:[%s6695_s27 + $0x8b0] sm:$0xf0]  ;;  %v5534_v34 = vor.u32 %v6148_v59, %v5531_v50 }
 0x473   : > { %v4053_v33 = vpop.f32.mrf.mxu0 }
 0x474   : > { %v4051_v25 = vadd.f32 %v4050_v30, %v3882_v47  ;;  %3585 = vmatmul.bf16.gmra.mxu1 %v5462_v54  ;;  %3754 = vmatmul.bf16.gmra.mxu2 %v5466_v13  ;;  %v5546_v47 = vor.u32 %v6154_v23, %v5545_v6 }
 0x475   : > { %3923 = vmatmul.bf16.gmra.mxu3 %v5470_v3  ;;  %v5538_v3 = vor.u32 %v6153_v63, %v5537_v31  ;;  %v8092_v63 = vld [vmem:[#allocation5_spill] sm:$0xff] }
 0x476   : > { %4092 = vmatmul.bf16.gmra.mxu0 %v5474_v52  ;;  %v4152_v9 = vmax.f32 %v4051_v25, 0.0 }
 0x477   : > { %v3715_v0 = vpop.f32.mrf.mxu2 }
 0x478   : > { %v6335_v39 = vpack.c.bf16 %v4152_v9, %v4151_v51  ;;  %v3884_v49 = vpop.f32.mrf.mxu3  ;;  %v3716_v42 = vadd.f32 %v3715_v0, %v3547_v4 }
 0x479   : > { %v3548_v53 = vpop.f32.mrf.mxu1 }
 0x47a   : > { %6415 = vst [vmem:[%s7697_s11 + $0x98] sm:$0xff] %v6335_v39   ;;  %v3885_v38 = vadd.f32 %v3884_v49, %v3716_v42  ;;  %v3549_v19 = vadd.f32 %v3548_v53, %v8086_v58  ;;  %v8089_v49 = vld [vmem:[#allocation21_spill] sm:$0xff]  ;;  %v6158_v58 = vld [vmem:[%s6695_s27 + $0x8d4] sm:$0xf] }
 0x47b   : > { %v4055_v16 = vpop.f32.mrf.mxu0 }
 0x47c   : > { %v4054_v32 = vadd.f32 %v4053_v33, %v3885_v38  ;;  %v6162_v38 = vld [vmem:[%s6695_s27 + $0x8f0] sm:$0xf0] }
 0x47e   : > { %v4153_v60 = vmax.f32 %v4054_v32, 0.0  ;;  %v5578_v32 = vor.u32 %v6158_v58, %v5575_v2 }
 0x47f   : > { %v3717_v28 = vpop.f32.mrf.mxu2 }
 0x480   : > { %v3718_v24 = vadd.f32 %v3717_v28, %v3549_v19  ;;  %v3886_v1 = vpop.f32.mrf.mxu3  ;;  %v5581_v28 = vld [vmem:[%s6695_s27 + $0x8d8] sm:$0xf] }
 0x481   : > { %v3551_v35 = vpop.f32.mrf.mxu1 }
 0x482   : > { %v3887_v29 = vadd.f32 %v3886_v1, %v3718_v24  ;;  %v3552_v48 = vadd.f32 %v3551_v35, %v8087_v17  ;;  %v6163_v24 = vld [vmem:[%s6695_s27 + $0x8f8] sm:$0xf0]  ;;  %v5570_v35 = vor.u32 %v6157_v7, %v5567_v61  ;;  %s6236_s27 = sshll.u32 %s6583_s15, 8  ;;  %s4306_s15 = scalar_lea.sflag [#allocation3], %s202_s9 }
 0x483   : > { %v4058_v37 = vpop.f32.mrf.mxu0  ;;  %s4318_s21 = scalar_lea.hbm %s8010_s3, %s6236_s27 }
 0x484   : > { %v4056_v26 = vadd.f32 %v4055_v16, %v3887_v29  ;;  %3590 = vmatmul.bf16.gmra.mxu1 %v5498_v11  ;;  %3759 = vmatmul.bf16.gmra.mxu2 %v5502_v12  ;;  %v5582_v29 = vor.u32 %v6163_v24, %v5581_v28  ;;  %s4321_s26 = sshll.u32 %s4318_s21, 4  ;;  %s4322_s26 = int_to_ptr.hbm [resolvable:$true] %s4321_s26 }
 0x485   : > { %3928 = vmatmul.bf16.gmra.mxu3 %v5506_v15  ;;  %v5574_v15 = vor.u32 %v6162_v38, %v5573_v18  ;;  %s6527_s28 = sshra.s32 %s4322_s26, 4  ;;  %s6528_s28 = int_to_ptr.hbm [resolvable:$true] %s6527_s28 }
 0x486   : > { %4097 = vmatmul.bf16.gmra.mxu0 %v5510_v56  ;;  %v4154_v55 = vmax.f32 %v4056_v26, 0.0  ;;  %s6529_s29 = scalar_lea.hbm %s6528_s28, 256  ;;  %p6534_p1 = scmp.lt.s32.totalorder %s6528_s28, %s8010_s3 }
 0x487   : > { %v3720_v62 = vpop.f32.mrf.mxu2  ;;  %p6530_p12 = scmp.ne.s32.totalorder %s6528_s28, %s6529_s29  ;;  %p6535_p2 = scmp.lt.s32.totalorder %s6533_s5, %s6529_s29 }
 0x488   : > { %v6340_v57 = vpack.c.bf16 %v4154_v55, %v4153_v60  ;;  %v3889_v43 = vpop.f32.mrf.mxu3  ;;  %v3721_v14 = vadd.f32 %v3720_v62, %v3552_v48 }
 0x489   : > { %v3553_v30 = vpop.f32.mrf.mxu1  ;;  %p6531_p13 = pnand %p6530_p12, %p6655_p4  ;;  %p6536_p3 = por %p6535_p2, %p6534_p1 }
 0x48a   : > { %6416 = vst [vmem:[%s7697_s11 + $0xa0] sm:$0xff] %v6340_v57   ;;  %v3890_v8 = vadd.f32 %v3889_v43, %v3721_v14  ;;  %v3554_v27 = vadd.f32 %v3553_v30, %v8088_v36  ;;  %v8091_v43 = vld [vmem:[#allocation25_spill] sm:$0xff] }
 0x48b   : > { %v4060_v20 = vpop.f32.mrf.mxu0  ;;  %p6532_p0 = pneg %p6531_p13 }
 0x48c   : > { %v4059_v33 = vadd.f32 %v4058_v37, %v3890_v8 }
 0x48d   : > { %p6537_p5 = pnand %p6536_p3, %p6532_p0 }
 0x48e   : > { %v4155_v0 = vmax.f32 %v4059_v33, 0.0 }
 0x48f   : > { %v3722_v41 = vpop.f32.mrf.mxu2 }
 0x490   : > { %v3723_v54 = vadd.f32 %v3722_v41, %v3554_v27  ;;  %v3891_v13 = vpop.f32.mrf.mxu3 }
 0x491   : > { %v3556_v52 = vpop.f32.mrf.mxu1 }
 0x492   : > { %v3892_v25 = vadd.f32 %v3891_v13, %v3723_v54  ;;  %v3557_v53 = vadd.f32 %v3556_v52, %v8089_v49 }
 0x493   : > { %v4063_v51 = vpop.f32.mrf.mxu0 }
 0x494   : > { %v4061_v9 = vadd.f32 %v4060_v20, %v3892_v25  ;;  %3595 = vmatmul.bf16.gmra.mxu1 %v5534_v34  ;;  %3764 = vmatmul.bf16.gmra.mxu2 %v5538_v3 }
 0x495   : > { %3933 = vmatmul.bf16.gmra.mxu3 %v5542_v44  ;;  %v8093_v44 = vld [vmem:[#allocation6_spill] sm:$0xff] }
 0x496   : > { %4102 = vmatmul.bf16.gmra.mxu0 %v5546_v47  ;;  %v4156_v39 = vmax.f32 %v4061_v9, 0.0 }
 0x497   : > { %v3725_v22 = vpop.f32.mrf.mxu2 }
 0x498   : > { %v6345_v4 = vpack.c.bf16 %v4156_v39, %v4155_v0  ;;  %v3894_v42 = vpop.f32.mrf.mxu3  ;;  %v3726_v10 = vadd.f32 %v3725_v22, %v3557_v53  ;;  %v8094_v39 = vld [vmem:[#allocation7_spill] sm:$0xff] }
 0x499   : > { %v3558_v16 = vpop.f32.mrf.mxu1 }
 0x49a   : > { %6417 = vst [vmem:[%s7697_s11 + $0xa8] sm:$0xff] %v6345_v4   ;;  %v3895_v19 = vadd.f32 %v3894_v42, %v3726_v10  ;;  %v3559_v45 = vadd.f32 %v3558_v16, %v8090_v5 }
 0x49b   : > { %v4065_v40 = vpop.f32.mrf.mxu0 }
 0x49c   : > { %v4064_v37 = vadd.f32 %v4063_v51, %v3895_v19  ;;  %v8095_v19 = vld [vmem:[#allocation8_spill] sm:$0xff] }
 0x49e   : > { %v4157_v62 = vmax.f32 %v4064_v37, 0.0 }
 0x49f   : > { %v3727_v1 = vpop.f32.mrf.mxu2 }
 0x4a0   : > { %v3728_v11 = vadd.f32 %v3727_v1, %v3559_v45  ;;  %v3896_v12 = vpop.f32.mrf.mxu3 }
 0x4a1   : > { %v3561_v56 = vpop.f32.mrf.mxu1 }
 0x4a2   : > { %v3897_v26 = vadd.f32 %v3896_v12, %v3728_v11  ;;  %v3562_v30 = vadd.f32 %v3561_v56, %v8091_v43  ;;  %v8096_v11 = vld [vmem:[#allocation9_spill] sm:$0xff] }
 0x4a3   : > { %v4068_v60 = vpop.f32.mrf.mxu0 }
 0x4a4   : > { %v4066_v55 = vadd.f32 %v4065_v40, %v3897_v26  ;;  %3600 = vmatmul.bf16.gmra.mxu1 %v5570_v35  ;;  %3769 = vmatmul.bf16.gmra.mxu2 %v5574_v15 }
 0x4a5   : > { %3938 = vmatmul.bf16.gmra.mxu3 %v5578_v32 }
 0x4a6   : > { %4107 = vmatmul.bf16.gmra.mxu0 %v5582_v29  ;;  %v4158_v57 = vmax.f32 %v4066_v55, 0.0 }
 0x4a7   : > { %v3730_v17 = vpop.f32.mrf.mxu2 }
 0x4a8   : > { %v6350_v48 = vpack.c.bf16 %v4158_v57, %v4157_v62  ;;  %v3899_v14 = vpop.f32.mrf.mxu3  ;;  %v3731_v59 = vadd.f32 %v3730_v17, %v3562_v30 }
 0x4a9   : > { %v3563_v20 = vpop.f32.mrf.mxu1 }
 0x4aa   : > { %6418 = vst [vmem:[%s7697_s11 + $0xb0] sm:$0xff] %v6350_v48   ;;  %v3900_v31 = vadd.f32 %v3899_v14, %v3731_v59  ;;  %v3564_v46 = vadd.f32 %v3563_v20, %v8092_v63  ;;  %v8097_v48 = vld [vmem:[#allocation10_spill] sm:$0xff] }
 0x4ab   : > { %v4070_v50 = vpop.f32.mrf.mxu0 }
 0x4ac   : > { %v4069_v6 = vadd.f32 %v4068_v60, %v3900_v31  ;;  %v8098_v31 = vld [vmem:[#allocation11_spill] sm:$0xff] }
 0x4ae   : > { %v4159_v13 = vmax.f32 %v4069_v6, 0.0 }
 0x4af   : > { %v3732_v8 = vpop.f32.mrf.mxu2 }
 0x4b0   : > { %v3733_v36 = vadd.f32 %v3732_v8, %v3564_v46  ;;  %v3901_v27 = vpop.f32.mrf.mxu3 }
 0x4b1   : > { %v3566_v21 = vpop.f32.mrf.mxu1 }
 0x4b2   : > { %v3902_v23 = vadd.f32 %v3901_v27, %v3733_v36  ;;  %v3567_v47 = vadd.f32 %v3566_v21, %v8093_v44 }
 0x4b3   : > { %v4073_v41 = vpop.f32.mrf.mxu0 }
 0x4b4   : > { %v4071_v54 = vadd.f32 %v4070_v50, %v3902_v23 }
 0x4b6   : > { %v4160_v34 = vmax.f32 %v4071_v54, 0.0 }
 0x4b7   : > { %v3735_v3 = vpop.f32.mrf.mxu2 }
 0x4b8   : > { %v6355_v52 = vpack.c.bf16 %v4160_v34, %v4159_v13  ;;  %v3904_v33 = vpop.f32.mrf.mxu3  ;;  %v3736_v51 = vadd.f32 %v3735_v3, %v3567_v47 }
 0x4b9   : > { %v3568_v25 = vpop.f32.mrf.mxu1 }
 0x4ba   : > { %6419 = vst [vmem:[%s7697_s11 + $0xb8] sm:$0xff] %v6355_v52   ;;  %v3905_v0 = vadd.f32 %v3904_v33, %v3736_v51  ;;  %v3569_v22 = vadd.f32 %v3568_v25, %v8094_v39  ;;  %v8099_v52 = vld [vmem:[#allocation12_spill] sm:$0xff] }
 0x4bb   : > { %v4075_v9 = vpop.f32.mrf.mxu0 }
 0x4bc   : > { %v4074_v16 = vadd.f32 %v4073_v41, %v3905_v0  ;;  %v8100_v0 = vld [vmem:[#allocation13_spill] sm:$0xff] }
 0x4be   : > { %v4161_v61 = vmax.f32 %v4074_v16, 0.0 }
 0x4bf   : > { %v3737_v4 = vpop.f32.mrf.mxu2 }
 0x4c0   : > { %v3738_v49 = vadd.f32 %v3737_v4, %v3569_v22  ;;  %v3906_v53 = vpop.f32.mrf.mxu3 }
 0x4c1   : > { %v3571_v42 = vpop.f32.mrf.mxu1 }
 0x4c2   : > { %v3907_v10 = vadd.f32 %v3906_v53, %v3738_v49  ;;  %v3572_v5 = vadd.f32 %v3571_v42, %v8095_v19 }
 0x4c3   : > { %v4078_v40 = vpop.f32.mrf.mxu0 }
 0x4c4   : > { %v4076_v7 = vadd.f32 %v4075_v9, %v3907_v10 }
 0x4c6   : > { %v4162_v18 = vmax.f32 %v4076_v7, 0.0 }
 0x4c7   : > { %v3740_v38 = vpop.f32.mrf.mxu2 }
 0x4c8   : > { %v6360_v58 = vpack.c.bf16 %v4162_v18, %v4161_v61  ;;  %v3909_v45 = vpop.f32.mrf.mxu3  ;;  %v3741_v28 = vadd.f32 %v3740_v38, %v3572_v5 }
 0x4c9   : > { %v3573_v2 = vpop.f32.mrf.mxu1 }
 0x4ca   : > { %6420 = vst [vmem:[%s7697_s11 + $0xc0] sm:$0xff] %v6360_v58   ;;  %v3910_v1 = vadd.f32 %v3909_v45, %v3741_v28  ;;  %v3574_v12 = vadd.f32 %v3573_v2, %v8096_v11  ;;  %v8101_v58 = vld [vmem:[#allocation14_spill] sm:$0xff] }
 0x4cb   : > { %v4080_v24 = vpop.f32.mrf.mxu0 }
 0x4cc   : > { %v4079_v29 = vadd.f32 %v4078_v40, %v3910_v1  ;;  %v8102_v1 = vld [vmem:[#allocation16_spill] sm:$0xff] }
 0x4ce   : > { %v4163_v55 = vmax.f32 %v4079_v29, 0.0 }
 0x4cf   : > { %v3742_v35 = vpop.f32.mrf.mxu2 }
 0x4d0   : > { %v3743_v15 = vadd.f32 %v3742_v35, %v3574_v12  ;;  %v3911_v56 = vpop.f32.mrf.mxu3 }
 0x4d1   : > { %v3576_v32 = vpop.f32.mrf.mxu1 }
 0x4d2   : > { %v3912_v37 = vadd.f32 %v3911_v56, %v3743_v15  ;;  %v3577_v43 = vadd.f32 %v3576_v32, %v8097_v48 }
 0x4d3   : > { %v4083_v26 = vpop.f32.mrf.mxu0 }
 0x4d4   : > { %v4081_v60 = vadd.f32 %v4080_v24, %v3912_v37 }
 0x4d6   : > { %v4164_v62 = vmax.f32 %v4081_v60, 0.0 }
 0x4d7   : > { %v3745_v57 = vpop.f32.mrf.mxu2 }
 0x4d8   : > { %v6365_v17 = vpack.c.bf16 %v4164_v62, %v4163_v55  ;;  %v3914_v30 = vpop.f32.mrf.mxu3  ;;  %v3746_v20 = vadd.f32 %v3745_v57, %v3577_v43 }
 0x4d9   : > { %v3578_v14 = vpop.f32.mrf.mxu1 }
 0x4da   : > { %6421 = vst [vmem:[%s7697_s11 + $0xc8] sm:$0xff] %v6365_v17   ;;  %v3915_v50 = vadd.f32 %v3914_v30, %v3746_v20  ;;  %v3579_v63 = vadd.f32 %v3578_v14, %v8098_v31  ;;  %v8103_v17 = vld [vmem:[#allocation18_spill] sm:$0xff] }
 0x4db   : > { %v4085_v59 = vpop.f32.mrf.mxu0 }
 0x4dc   : > { %v4084_v21 = vadd.f32 %v4083_v26, %v3915_v50  ;;  %v8104_v50 = vld [vmem:[#allocation20_spill] sm:$0xff] }
 0x4de   : > { %v4165_v54 = vmax.f32 %v4084_v21, 0.0 }
 0x4df   : > { %v3747_v46 = vpop.f32.mrf.mxu2 }
 0x4e0   : > { %v3748_v8 = vadd.f32 %v3747_v46, %v3579_v63  ;;  %v3916_v36 = vpop.f32.mrf.mxu3 }
 0x4e1   : > { %v3581_v27 = vpop.f32.mrf.mxu1 }
 0x4e2   : > { %v3917_v6 = vadd.f32 %v3916_v36, %v3748_v8  ;;  %v3582_v44 = vadd.f32 %v3581_v27, %v8099_v52 }
 0x4e3   : > { %v4088_v23 = vpop.f32.mrf.mxu0 }
 0x4e4   : > { %v4086_v41 = vadd.f32 %v4085_v59, %v3917_v6 }
 0x4e6   : > { %v4166_v13 = vmax.f32 %v4086_v41, 0.0 }
 0x4e7   : > { %v3750_v34 = vpop.f32.mrf.mxu2 }
 0x4e8   : > { %v6370_v3 = vpack.c.bf16 %v4166_v13, %v4165_v54  ;;  %v3919_v47 = vpop.f32.mrf.mxu3  ;;  %v3751_v25 = vadd.f32 %v3750_v34, %v3582_v44 }
 0x4e9   : > { %v3583_v33 = vpop.f32.mrf.mxu1 }
 0x4ea   : > { %6422 = vst [vmem:[%s7697_s11 + $0xd0] sm:$0xff] %v6370_v3   ;;  %v3920_v9 = vadd.f32 %v3919_v47, %v3751_v25  ;;  %v3584_v39 = vadd.f32 %v3583_v33, %v8100_v0  ;;  %v8105_v3 = vld [vmem:[#allocation22_spill] sm:$0xff] }
 0x4eb   : > { %v4090_v51 = vpop.f32.mrf.mxu0 }
 0x4ec   : > { %v4089_v42 = vadd.f32 %v4088_v23, %v3920_v9 }
 0x4ee   : > { %v4167_v7 = vmax.f32 %v4089_v42, 0.0 }
 0x4ef   : > { %v3752_v22 = vpop.f32.mrf.mxu2 }
 0x4f0   : > { %v3753_v4 = vadd.f32 %v3752_v22, %v3584_v39  ;;  %v3921_v49 = vpop.f32.mrf.mxu3 }
 0x4f1   : > { %v3586_v53 = vpop.f32.mrf.mxu1 }
 0x4f2   : > { %v3922_v16 = vadd.f32 %v3921_v49, %v3753_v4  ;;  %v3587_v19 = vadd.f32 %v3586_v53, %v8101_v58 }
 0x4f3   : > { %v4093_v10 = vpop.f32.mrf.mxu0 }
 0x4f4   : > { %v4091_v40 = vadd.f32 %v4090_v51, %v3922_v16  ;;  %v8106_v51 = vld [vmem:[#allocation24_spill] sm:$0xff] }
 0x4f6   : > { %v4168_v61 = vmax.f32 %v4091_v40, 0.0 }
 0x4f7   : > { %v3755_v18 = vpop.f32.mrf.mxu2 }
 0x4f8   : > { %v6375_v38 = vpack.c.bf16 %v4168_v61, %v4167_v7  ;;  %v3924_v5 = vpop.f32.mrf.mxu3  ;;  %v3756_v2 = vadd.f32 %v3755_v18, %v3587_v19  ;;  %v8107_v18 = vld [vmem:[#allocation26_spill] sm:$0xff] }
 0x4f9   : > { %v3588_v45 = vpop.f32.mrf.mxu1 }
 0x4fa   : > { %6423 = vst [vmem:[%s7697_s11 + $0xd8] sm:$0xff] %v6375_v38   ;;  %v3925_v24 = vadd.f32 %v3924_v5, %v3756_v2  ;;  %v3589_v11 = vadd.f32 %v3588_v45, %v8102_v1 }
 0x4fb   : > { %v4095_v28 = vpop.f32.mrf.mxu0 }
 0x4fc   : > { %v4094_v32 = vadd.f32 %v4093_v10, %v3925_v24 }
 0x4fe   : > { %v4169_v60 = vmax.f32 %v4094_v32, 0.0 }
 0x4ff   : > { %v3757_v12 = vpop.f32.mrf.mxu2 }
 0x500   : > { %v3758_v35 = vadd.f32 %v3757_v12, %v3589_v11  ;;  %v3926_v15 = vpop.f32.mrf.mxu3 }
 0x501   : > { %v3591_v56 = vpop.f32.mrf.mxu1 }
 0x502   : > { %v3927_v29 = vadd.f32 %v3926_v15, %v3758_v35  ;;  %v3592_v48 = vadd.f32 %v3591_v56, %v8103_v17 }
 0x503   : > { %v4098_v37 = vpop.f32.mrf.mxu0 }
 0x504   : > { %v4096_v26 = vadd.f32 %v4095_v28, %v3927_v29  ;;  %v8108_v28 = vld [vmem:[#allocation30_spill] sm:$0xff] }
 0x506   : > { %v4170_v55 = vmax.f32 %v4096_v26, 0.0 }
 0x507   : > { %v3760_v62 = vpop.f32.mrf.mxu2 }
 0x508   : > { %v6380_v57 = vpack.c.bf16 %v4170_v55, %v4169_v60  ;;  %v3929_v43 = vpop.f32.mrf.mxu3  ;;  %v3761_v14 = vadd.f32 %v3760_v62, %v3592_v48 }
 0x509   : > { %v3593_v30 = vpop.f32.mrf.mxu1 }
 0x50a   : > { %6424 = vst [vmem:[%s7697_s11 + $0xe0] sm:$0xff] %v6380_v57   ;;  %v3930_v59 = vadd.f32 %v3929_v43, %v3761_v14  ;;  %v3594_v31 = vadd.f32 %v3593_v30, %v8104_v50 }
 0x50b   : > { %v4100_v20 = vpop.f32.mrf.mxu0 }
 0x50c   : > { %v4099_v27 = vadd.f32 %v4098_v37, %v3930_v59 }
 0x50e   : > { %v4171_v41 = vmax.f32 %v4099_v27, 0.0 }
 0x50f   : > { %v3762_v63 = vpop.f32.mrf.mxu2 }
 0x510   : > { %v3763_v46 = vadd.f32 %v3762_v63, %v3594_v31  ;;  %v3931_v8 = vpop.f32.mrf.mxu3 }
 0x511   : > { %v3596_v36 = vpop.f32.mrf.mxu1 }
 0x512   : > { %v3932_v21 = vadd.f32 %v3931_v8, %v3763_v46  ;;  %v3597_v52 = vadd.f32 %v3596_v36, %v8105_v3 }
 0x513   : > { %v4103_v23 = vpop.f32.mrf.mxu0 }
 0x514   : > { %v4101_v6 = vadd.f32 %v4100_v20, %v3932_v21 }
 0x516   : > { %v4172_v54 = vmax.f32 %v4101_v6, 0.0 }
 0x517   : > { %v3765_v13 = vpop.f32.mrf.mxu2 }
 0x518   : > { %v6385_v34 = vpack.c.bf16 %v4172_v54, %v4171_v41  ;;  %v3934_v44 = vpop.f32.mrf.mxu3  ;;  %v3766_v33 = vadd.f32 %v3765_v13, %v3597_v52 }
 0x519   : > { %v3598_v47 = vpop.f32.mrf.mxu1 }
 0x51a   : > { %6425 = vst [vmem:[%s7697_s11 + $0xe8] sm:$0xff] %v6385_v34   ;;  %v3935_v25 = vadd.f32 %v3934_v44, %v3766_v33  ;;  %v3599_v9 = vadd.f32 %v3598_v47, %v8106_v51 }
 0x51b   : > { %v4105_v0 = vpop.f32.mrf.mxu0 }
 0x51c   : > { %v4104_v53 = vadd.f32 %v4103_v23, %v3935_v25 }
 0x51e   : > { %v4173_v10 = vmax.f32 %v4104_v53, 0.0 }
 0x51f   : > { %v3767_v39 = vpop.f32.mrf.mxu2 }
 0x520   : > { %v3768_v22 = vadd.f32 %v3767_v39, %v3599_v9  ;;  %v3936_v4 = vpop.f32.mrf.mxu3 }
 0x521   : > { %v3601_v49 = vpop.f32.mrf.mxu1 }
 0x522   : > { %v3937_v42 = vadd.f32 %v3936_v4, %v3768_v22  ;;  %v3602_v38 = vadd.f32 %v3601_v49, %v8107_v18 }
 0x523   : > { %v4108_v19 = vpop.f32.mrf.mxu0 }
 0x524   : > { %v4106_v16 = vadd.f32 %v4105_v0, %v3937_v42 }
 0x526   : > { %v4174_v40 = vmax.f32 %v4106_v16, 0.0 }
 0x527   : > { %v3770_v7 = vpop.f32.mrf.mxu2 }
 0x528   : > { %v6390_v61 = vpack.c.bf16 %v4174_v40, %v4173_v10  ;;  %v3939_v58 = vpop.f32.mrf.mxu3  ;;  %v3771_v5 = vadd.f32 %v3770_v7, %v3602_v38 }
 0x529   : > { %v3603_v45 = vpop.f32.mrf.mxu1 }
 0x52a   : > { %6426 = vst [vmem:[%s7697_s11 + $0xf0] sm:$0xff] %v6390_v61   ;;  %v3940_v2 = vadd.f32 %v3939_v58, %v3771_v5  ;;  %v3604_v24 = vadd.f32 %v3603_v45, %v8108_v28 }
 0x52b   : > { %v4110_v56 = vpop.f32.mrf.mxu0 }
 0x52c   : > { %v4109_v35 = vadd.f32 %v4108_v19, %v3940_v2 }
 0x52e   : > { %v4175_v29 = vmax.f32 %v4109_v35, 0.0 }
 0x52f   : > { %v3772_v1 = vpop.f32.mrf.mxu2 }
 0x530   : > { %v3773_v11 = vadd.f32 %v3772_v1, %v3604_v24  ;;  %v3941_v12 = vpop.f32.mrf.mxu3 }
 0x532   : > { %v3942_v15 = vadd.f32 %v3941_v12, %v3773_v11 }
 0x534   : > { %v4111_v32 = vadd.f32 %v4110_v56, %v3942_v15 }
 0x536   : > { %v4176_v37 = vmax.f32 %v4111_v32, 0.0 }
 0x538   : > { %v6395_v26 = vpack.c.bf16 %v4176_v37, %v4175_v29 }
 0x53a   : > { %6427 = vst [vmem:[%s7697_s11 + $0xf8] sm:$0xff] %v6395_v26  }
 0x53b   : > { %6540 = shalt.err (!%p6537_p5)
}
 0x53c   : > { %s6593_s8 = smov 64   ;;  %s6594_s9 = smov 4  }
 0x53d   : > { %6453 = dma.vmem_to_hbm [thread:$0]  (%p6655_p4), %s4320_s23, 4096, %s4322_s26, %s4306_s15, %s6593_s8, %s6593_s8, %s6594_s9  }
 0x53e PF: > { %p6459_p6 = scmp.ge.s32.totalorder %s6591_s17, 2  ;;  %s4336_s10 = sand.u32 1, %s6571_s12  }
 0x53f   : > { %s4337_s11 = scalar_lea.sflag [#allocation3], %s4336_s10 }
 0x540   : > { %p6456_p7 = pnand %p6459_p6, %p6662_p8 }
 0x542   : > { %p6457_p9 = pneg %p6456_p7 }
 0x544   : > { %6566 = dma.done.wait (%p6457_p9), %s4337_s11, 4096  }
 0x545   : > { %6568 = vsyncadd (%p6457_p9), %s4337_s11, 4294963200  ;;  %s16_s17 = sadd.s32 1, %s6591_s17   ;;  %s8109_s12 = smov %s6575_s13 }
 0x546   : > { %p13_p10 = scmp.ge.s32.totalorder %s16_s17, 6   ;;  %s8110_s13 = smov %s6579_s14 }
 0x547   : > { %s8111_s14 = smov %s6668_s25  ;;  %s8112_s15 = smov %s6587_s16 }
 0x548   : > { %s8113_s16 = smov %s8115_s20  ;;  %15 = sbr.rel (!%p13_p10) target bundleno = 4 (0x4), region = 73 }
 0x54d   :  { %4343 = vsyncpa [#allocation3], 1 }
 0x54e   :  { %4345 = vsyncpa [#allocation3 + $0x1], 1 }

</bundles_post_ra>
